<compile_context>
chip_gen: v5e
topology: v5e:2x2
jax: 0.10.0
libtpu: 0.0.40
codegen_flags: <defaults>
</compile_context>

<pallas_src>
import functools

import jax
import jax.numpy as jnp
from jax.experimental import pallas as pl
from jax.experimental.pallas import tpu as pltpu


def _round_up(x, m):
    return (x + m - 1) // m * m


def conv2d_size_out(size, kernel_size=1, stride=1):
    return (size - (kernel_size - 1) - 1) // stride + 1


# ----------------------------------------------------------------------------
# Pallas kernels
# ----------------------------------------------------------------------------
def _linear_kernel(x_ref, w_ref, b_ref, o_ref, *, apply_relu):
    # bf16 operands -> f32 accumulate on the MXU; bias/ReLU epilogue in f32.
    acc = jnp.dot(x_ref[...], w_ref[...], preferred_element_type=jnp.float32)
    acc = acc + b_ref[...]
    if apply_relu:
        acc = jnp.maximum(acc, 0.0)
    o_ref[...] = acc.astype(o_ref.dtype)


def _mlp_kernel(x_ref, w1_ref, b1_ref, w2_ref, b2_ref, o_ref, acc_ref):
    # Fused fc1 (K-tiled matmul into f32 accumulator) -> bias+ReLU -> fc2.
    kk = pl.program_id(1)

    @pl.when(kk == 0)
    def _():
        acc_ref[...] = jnp.zeros_like(acc_ref)

    acc_ref[...] += jnp.dot(x_ref[...], w1_ref[...],
                            preferred_element_type=jnp.float32)

    @pl.when(kk == pl.num_programs(1) - 1)
    def _():
        h = jnp.maximum(acc_ref[...] + b1_ref[...], 0.0).astype(jnp.bfloat16)
        out = jnp.dot(h, w2_ref[...], preferred_element_type=jnp.float32)
        o_ref[...] = (out + b2_ref[...]).astype(o_ref.dtype)


_VMEM_LIMIT = 32 * 1024 * 1024  # legal on v5e/v6e/v7x; ample for these blocks


def _m_tiling(M, cap=1024):
    """M tile size: 16-row (bf16 sublane) granule, <=15 padded rows total."""
    n_tiles = -(-M // cap)                       # ceil(M / cap)
    TM = _round_up(-(-M // n_tiles), 16)         # ceil(M / n_tiles) -> x16
    Mp = _round_up(M, TM)
    return TM, Mp


def _k_chunk(Kp, target=640):
    for tk in (target, 512, 384, 256, 128):
        if Kp % tk == 0:
            return tk
    return Kp


def linear_pallas(x, w, b, *, relu, out_dtype=jnp.float32):
    """y = x @ w + b (optionally ReLU).

    x : (M, K)   activations (bf16 preferred; cast is a no-op then)
    w : (Kp, Np) bfloat16, K/N already zero-padded to multiples of 128
    b : (1, Np)  float32
    returns (M, Np) `out_dtype` (caller slices the valid N columns).
    """
    M, K = x.shape
    Kp, Np = w.shape
    TM, Mp = _m_tiling(M)
    xp = jnp.pad(x.astype(jnp.bfloat16), ((0, Mp - M), (0, Kp - K)))

    out = pl.pallas_call(
        functools.partial(_linear_kernel, apply_relu=relu),
        out_shape=jax.ShapeDtypeStruct((Mp, Np), out_dtype),
        grid=(Mp // TM,),
        in_specs=[
            pl.BlockSpec((TM, Kp), lambda i: (i, 0)),
            pl.BlockSpec((Kp, Np), lambda i: (0, 0)),
            pl.BlockSpec((1, Np), lambda i: (0, 0)),
        ],
        out_specs=pl.BlockSpec((TM, Np), lambda i: (i, 0)),
        compiler_params=pltpu.CompilerParams(
            dimension_semantics=("parallel",),   # independent M tiles
            vmem_limit_bytes=_VMEM_LIMIT),
    )(xp, w, b)
    return out[:M]


def mlp_pallas(x, w1, b1, w2, b2):
    """Fused relu(x @ w1 + b1) @ w2 + b2 with a K-tiled fc1 (one pallas_call)."""
    M, K = x.shape
    K1p, H = w1.shape
    _, Np = w2.shape
    TM, Mp = _m_tiling(M)
    TK = _k_chunk(K1p)
    xp = jnp.pad(x.astype(jnp.bfloat16), ((0, Mp - M), (0, K1p - K)))

    out = pl.pallas_call(
        _mlp_kernel,
        out_shape=jax.ShapeDtypeStruct((Mp, Np), jnp.float32),
        grid=(Mp // TM, K1p // TK),
        in_specs=[
            pl.BlockSpec((TM, TK), lambda i, kk: (i, kk)),
            pl.BlockSpec((TK, H), lambda i, kk: (kk, 0)),
            pl.BlockSpec((1, H), lambda i, kk: (0, 0)),
            pl.BlockSpec((H, Np), lambda i, kk: (0, 0)),
            pl.BlockSpec((1, Np), lambda i, kk: (0, 0)),
        ],
        out_specs=pl.BlockSpec((TM, Np), lambda i, kk: (i, 0)),
        scratch_shapes=[pltpu.VMEM((TM, H), jnp.float32)],
        compiler_params=pltpu.CompilerParams(
            dimension_semantics=("parallel", "arbitrary"),
            vmem_limit_bytes=_VMEM_LIMIT),
    )(xp, w1, b1, w2, b2)
    return out[:M]


# ----------------------------------------------------------------------------
# Conv2d = fused patch extraction (single XLA op, bf16) + Pallas matmul kernel
# ----------------------------------------------------------------------------
def conv2d_relu_pallas(x_nhwc, w, b, *, k, stride, out_channels):
    """PyTorch-semantics Conv2d (valid padding) + ReLU, NHWC in/out, bf16.

    x_nhwc : (B, H, W, C) bfloat16
    w      : (Kp, Np) bfloat16 prepared weight (K = (C, kh, kw) flatten, padded)
    b      : (1, Np) float32 prepared bias
    returns (B, OH, OW, out_channels) bfloat16
    """
    B, H, W, C = x_nhwc.shape
    OH = conv2d_size_out(H, k, stride)
    OW = conv2d_size_out(W, k, stride)
    # Single fused op; output feature dim is ordered (C, kh, kw), matching the
    # (OC, IC, kh, kw) -> (OC, IC*k*k) weight flatten used in prepare_params.
    patches = jax.lax.conv_general_dilated_patches(
        x_nhwc,
        filter_shape=(k, k),
        window_strides=(stride, stride),
        padding="VALID",
        dimension_numbers=("NHWC", "HWIO", "NHWC"),
    )                                                   # (B, OH, OW, C*k*k)
    patches = patches.reshape(B * OH * OW, C * k * k)
    y = linear_pallas(patches, w, b, relu=True, out_dtype=jnp.bfloat16)
    return y[:, :out_channels].reshape(B, OH, OW, out_channels)


# ----------------------------------------------------------------------------
# DQN parameters + forward
# ----------------------------------------------------------------------------
def init_dqn_params(key, input_dim, num_actions):
    """PyTorch-layout parameters (same shapes/semantics as the nn.Module)."""
    convw = conv2d_size_out(conv2d_size_out(conv2d_size_out(84, 8, 4), 4, 2), 3, 1)
    convh = conv2d_size_out(conv2d_size_out(conv2d_size_out(84, 8, 4), 4, 2), 3, 1)
    linear_input_size = convw * convh * 64

    ks = jax.random.split(key, 10)
    scale = 0.05
    return {
        "c1_w": scale * jax.random.normal(ks[0], (32, input_dim, 8, 8), jnp.float32),
        "c1_b": scale * jax.random.normal(ks[1], (32,), jnp.float32),
        "c2_w": scale * jax.random.normal(ks[2], (64, 32, 4, 4), jnp.float32),
        "c2_b": scale * jax.random.normal(ks[3], (64,), jnp.float32),
        "c3_w": scale * jax.random.normal(ks[4], (64, 64, 3, 3), jnp.float32),
        "c3_b": scale * jax.random.normal(ks[5], (64,), jnp.float32),
        # PyTorch Linear stores weight as (out_features, in_features)
        "fc1_w": scale * jax.random.normal(ks[6], (512, linear_input_size), jnp.float32),
        "fc1_b": scale * jax.random.normal(ks[7], (512,), jnp.float32),
        "fc2_w": scale * jax.random.normal(ks[8], (num_actions, 512), jnp.float32),
        "fc2_b": scale * jax.random.normal(ks[9], (num_actions,), jnp.float32),
    }


def _prep_conv(w, b):
    """(OC, IC, k, k) PyTorch conv weight -> (Kp, Np) bf16 matmul weight + bias."""
    OC, IC, k, _ = w.shape
    K = IC * k * k
    Kp = _round_up(K, 128)
    Np = _round_up(OC, 128)
    wm = jnp.transpose(w.reshape(OC, K))                                # (K, OC)
    wm = jnp.pad(wm, ((0, Kp - K), (0, Np - OC))).astype(jnp.bfloat16)
    bm = jnp.pad(b, (0, Np - OC)).astype(jnp.float32).reshape(1, Np)
    return wm, bm


def prepare_params(params, num_actions):
    """One-time conversion to kernel-ready (padded, bf16, pre-transposed) mats."""
    prep = {}
    prep["c1_w"], prep["c1_b"] = _prep_conv(params["c1_w"], params["c1_b"])
    prep["c2_w"], prep["c2_b"] = _prep_conv(params["c2_w"], params["c2_b"])
    prep["c3_w"], prep["c3_b"] = _prep_conv(params["c3_w"], params["c3_b"])

    # fc1: permute columns once so it consumes the NHWC flatten (h, w, c)
    # instead of PyTorch's NCHW flatten (c, h, w).  Conv tower output for
    # 84x84 inputs is (B, 7, 7, 64).
    convs = conv2d_size_out(conv2d_size_out(conv2d_size_out(84, 8, 4), 4, 2), 3, 1)
    hidden, lin_in = params["fc1_w"].shape                       # (512, 3136)
    fc1_w = params["fc1_w"].reshape(hidden, 64, convs, convs)
    fc1_w = fc1_w.transpose(0, 2, 3, 1).reshape(hidden, lin_in)  # cols -> (h, w, c)
    K1p = _round_up(lin_in, 128)
    prep["fc1_w"] = jnp.pad(fc1_w.T, ((0, K1p - lin_in), (0, 0))).astype(jnp.bfloat16)
    prep["fc1_b"] = params["fc1_b"].astype(jnp.float32).reshape(1, hidden)

    # fc2: (num_actions, 512) -> (512, Np) with lane-dense padded N.
    Np2 = _round_up(num_actions, 128)
    prep["fc2_w"] = jnp.pad(
        params["fc2_w"].T, ((0, 0), (0, Np2 - num_actions))).astype(jnp.bfloat16)
    prep["fc2_b"] = jnp.pad(
        params["fc2_b"], (0, Np2 - num_actions)).astype(jnp.float32).reshape(1, Np2)
    return prep


@functools.partial(jax.jit, static_argnames=("num_actions",))
def dqn_forward(prep, x, *, num_actions):
    """x: (B, input_dim, 84, 84) NCHW float32 -> (B, num_actions) float32."""
    x = jnp.transpose(x, (0, 2, 3, 1)).astype(jnp.bfloat16)        # NHWC + bf16 once
    x = conv2d_relu_pallas(x, prep["c1_w"], prep["c1_b"], k=8, stride=4, out_channels=32)
    x = conv2d_relu_pallas(x, prep["c2_w"], prep["c2_b"], k=4, stride=2, out_channels=64)
    x = conv2d_relu_pallas(x, prep["c3_w"], prep["c3_b"], k=3, stride=1, out_channels=64)
    B = x.shape[0]
    x = x.reshape(B, -1)               # NHWC flatten (fc1 columns permuted to match)
    y = mlp_pallas(x, prep["fc1_w"], prep["fc1_b"], prep["fc2_w"], prep["fc2_b"])
    return y[:, :num_actions]


if __name__ == "__main__":
    # The module hardcodes 84x84 spatial input (via linear_input_size), so we
    # keep H=W=84; batch / channels / actions are small.
    batch, input_dim, num_actions = 2, 4, 6

    key = jax.random.PRNGKey(0)
    k_params, k_x = jax.random.split(key)
    params = init_dqn_params(k_params, input_dim, num_actions)
    prep = prepare_params(params, num_actions)
    x = jax.random.normal(k_x, (batch, input_dim, 84, 84), jnp.float32)

    out = dqn_forward(prep, x, num_actions=num_actions)
    out = jax.block_until_ready(out)
    assert out.shape == (batch, num_actions), out.shape
    assert bool(jnp.all(jnp.isfinite(out)))
    print("KERNEL_OK")
</pallas_src>

<mosaic_0001>
module attributes {stable_mosaic.version = 11 : i64} {
  func.func @_linear_kernel(%arg0: i32, %arg1: memref<800x256xbf16, #tpu.memory_space<vmem>>, %arg2: memref<256x128xbf16, #tpu.memory_space<vmem>>, %arg3: memref<1x128xf32, #tpu.memory_space<vmem>>, %arg4: memref<800x128xbf16, #tpu.memory_space<vmem>>) attributes {dimension_semantics = [#tpu.dimension_semantics<parallel>], iteration_bounds = array<i64: 1>, scalar_prefetch = 0 : i64, scratch_operands = 0 : i64, tpu.core_type = #tpu.core_type<tc>, window_params = [{transform_indices = @transform_0, window_bounds = array<i64: 800, 256>}, {pipeline_mode = #tpu.pipeline_mode<synchronous>, transform_indices = @transform_1, window_bounds = array<i64: 256, 128>}, {pipeline_mode = #tpu.pipeline_mode<synchronous>, transform_indices = @transform_2, window_bounds = array<i64: 1, 128>}, {transform_indices = @transform_3, window_bounds = array<i64: 800, 128>}]} {
    %c0 = arith.constant 0 : index
    %c0_0 = arith.constant 0 : index
    %0 = vector.load %arg1[%c0, %c0_0] : memref<800x256xbf16, #tpu.memory_space<vmem>>, vector<800x256xbf16>
    %c0_1 = arith.constant 0 : index
    %c0_2 = arith.constant 0 : index
    %1 = vector.load %arg2[%c0_1, %c0_2] : memref<256x128xbf16, #tpu.memory_space<vmem>>, vector<256x128xbf16>
    %cst = arith.constant dense<0.000000e+00> : vector<800x128xf32>
    %2 = tpu.matmul %0, %1, %cst {dimension_numbers = #tpu.dot_dimension_numbers<[1], [0], [0], [1], [0, 0, 1, 1], [], []>} : vector<800x256xbf16>, vector<256x128xbf16>, vector<800x128xf32> -> vector<800x128xf32>
    %c0_3 = arith.constant 0 : index
    %c0_4 = arith.constant 0 : index
    %3 = vector.load %arg3[%c0_3, %c0_4] : memref<1x128xf32, #tpu.memory_space<vmem>>, vector<1x128xf32>
    %4 = vector.broadcast %3 : vector<1x128xf32> to vector<800x128xf32>
    %5 = arith.addf %2, %4 : vector<800x128xf32>
    %cst_5 = arith.constant 0.000000e+00 : f32
    %6 = vector.broadcast %cst_5 : f32 to vector<800x128xf32>
    %7 = arith.maximumf %5, %6 : vector<800x128xf32>
    %8 = arith.truncf %7 : vector<800x128xf32> to vector<800x128xbf16>
    %c0_6 = arith.constant 0 : index
    %c0_7 = arith.constant 0 : index
    %9 = vector.load %arg4[%c0_6, %c0_7] : memref<800x128xbf16, #tpu.memory_space<vmem>>, vector<800x128xbf16>
    tpu.vector_store %arg4[%c0_6, %c0_7], %8 {strides = array<i32>} : memref<800x128xbf16, #tpu.memory_space<vmem>>, vector<800x128xbf16>,
    return
  }
  func.func @transform_0(%arg0: i32) -> (i32, i32) {
    %c0_i32 = arith.constant 0 : i32
    %c0_i32_0 = arith.constant 0 : i32
    return %arg0, %c0_i32 : i32, i32
  }
  func.func @transform_1(%arg0: i32) -> (i32, i32) {
    %c0_i32 = arith.constant 0 : i32
    %c0_i32_0 = arith.constant 0 : i32
    %c0_i32_1 = arith.constant 0 : i32
    return %c0_i32, %c0_i32_0 : i32, i32
  }
  func.func @transform_2(%arg0: i32) -> (i32, i32) {
    %c0_i32 = arith.constant 0 : i32
    %c0_i32_0 = arith.constant 0 : i32
    %c0_i32_1 = arith.constant 0 : i32
    return %c0_i32, %c0_i32_0 : i32, i32
  }
  func.func @transform_3(%arg0: i32) -> (i32, i32) {
    %c0_i32 = arith.constant 0 : i32
    %c0_i32_0 = arith.constant 0 : i32
    return %arg0, %c0_i32 : i32, i32
  }
}

module attributes {stable_mosaic.version = 11 : i64} {
  func.func @_linear_kernel(%arg0: i32, %arg1: memref<176x512xbf16, #tpu.memory_space<vmem>>, %arg2: memref<512x128xbf16, #tpu.memory_space<vmem>>, %arg3: memref<1x128xf32, #tpu.memory_space<vmem>>, %arg4: memref<176x128xbf16, #tpu.memory_space<vmem>>) attributes {dimension_semantics = [#tpu.dimension_semantics<parallel>], iteration_bounds = array<i64: 1>, scalar_prefetch = 0 : i64, scratch_operands = 0 : i64, tpu.core_type = #tpu.core_type<tc>, window_params = [{transform_indices = @transform_0, window_bounds = array<i64: 176, 512>}, {pipeline_mode = #tpu.pipeline_mode<synchronous>, transform_indices = @transform_1, window_bounds = array<i64: 512, 128>}, {pipeline_mode = #tpu.pipeline_mode<synchronous>, transform_indices = @transform_2, window_bounds = array<i64: 1, 128>}, {transform_indices = @transform_3, window_bounds = array<i64: 176, 128>}]} {
    %c0 = arith.constant 0 : index
    %c0_0 = arith.constant 0 : index
    %0 = vector.load %arg1[%c0, %c0_0] : memref<176x512xbf16, #tpu.memory_space<vmem>>, vector<176x512xbf16>
    %c0_1 = arith.constant 0 : index
    %c0_2 = arith.constant 0 : index
    %1 = vector.load %arg2[%c0_1, %c0_2] : memref<512x128xbf16, #tpu.memory_space<vmem>>, vector<512x128xbf16>
    %cst = arith.constant dense<0.000000e+00> : vector<176x128xf32>
    %2 = tpu.matmul %0, %1, %cst {dimension_numbers = #tpu.dot_dimension_numbers<[1], [0], [0], [1], [0, 0, 1, 1], [], []>} : vector<176x512xbf16>, vector<512x128xbf16>, vector<176x128xf32> -> vector<176x128xf32>
    %c0_3 = arith.constant 0 : index
    %c0_4 = arith.constant 0 : index
    %3 = vector.load %arg3[%c0_3, %c0_4] : memref<1x128xf32, #tpu.memory_space<vmem>>, vector<1x128xf32>
    %4 = vector.broadcast %3 : vector<1x128xf32> to vector<176x128xf32>
    %5 = arith.addf %2, %4 : vector<176x128xf32>
    %cst_5 = arith.constant 0.000000e+00 : f32
    %6 = vector.broadcast %cst_5 : f32 to vector<176x128xf32>
    %7 = arith.maximumf %5, %6 : vector<176x128xf32>
    %8 = arith.truncf %7 : vector<176x128xf32> to vector<176x128xbf16>
    %c0_6 = arith.constant 0 : index
    %c0_7 = arith.constant 0 : index
    %9 = vector.load %arg4[%c0_6, %c0_7] : memref<176x128xbf16, #tpu.memory_space<vmem>>, vector<176x128xbf16>
    tpu.vector_store %arg4[%c0_6, %c0_7], %8 {strides = array<i32>} : memref<176x128xbf16, #tpu.memory_space<vmem>>, vector<176x128xbf16>,
    return
  }
  func.func @transform_0(%arg0: i32) -> (i32, i32) {
    %c0_i32 = arith.constant 0 : i32
    %c0_i32_0 = arith.constant 0 : i32
    return %arg0, %c0_i32 : i32, i32
  }
  func.func @transform_1(%arg0: i32) -> (i32, i32) {
    %c0_i32 = arith.constant 0 : i32
    %c0_i32_0 = arith.constant 0 : i32
    %c0_i32_1 = arith.constant 0 : i32
    return %c0_i32, %c0_i32_0 : i32, i32
  }
  func.func @transform_2(%arg0: i32) -> (i32, i32) {
    %c0_i32 = arith.constant 0 : i32
    %c0_i32_0 = arith.constant 0 : i32
    %c0_i32_1 = arith.constant 0 : i32
    return %c0_i32, %c0_i32_0 : i32, i32
  }
  func.func @transform_3(%arg0: i32) -> (i32, i32) {
    %c0_i32 = arith.constant 0 : i32
    %c0_i32_0 = arith.constant 0 : i32
    return %arg0, %c0_i32 : i32, i32
  }
}

module attributes {stable_mosaic.version = 11 : i64} {
  func.func @_linear_kernel(%arg0: i32, %arg1: memref<112x640xbf16, #tpu.memory_space<vmem>>, %arg2: memref<640x128xbf16, #tpu.memory_space<vmem>>, %arg3: memref<1x128xf32, #tpu.memory_space<vmem>>, %arg4: memref<112x128xbf16, #tpu.memory_space<vmem>>) attributes {dimension_semantics = [#tpu.dimension_semantics<parallel>], iteration_bounds = array<i64: 1>, scalar_prefetch = 0 : i64, scratch_operands = 0 : i64, tpu.core_type = #tpu.core_type<tc>, window_params = [{transform_indices = @transform_0, window_bounds = array<i64: 112, 640>}, {pipeline_mode = #tpu.pipeline_mode<synchronous>, transform_indices = @transform_1, window_bounds = array<i64: 640, 128>}, {pipeline_mode = #tpu.pipeline_mode<synchronous>, transform_indices = @transform_2, window_bounds = array<i64: 1, 128>}, {transform_indices = @transform_3, window_bounds = array<i64: 112, 128>}]} {
    %c0 = arith.constant 0 : index
    %c0_0 = arith.constant 0 : index
    %0 = vector.load %arg1[%c0, %c0_0] : memref<112x640xbf16, #tpu.memory_space<vmem>>, vector<112x640xbf16>
    %c0_1 = arith.constant 0 : index
    %c0_2 = arith.constant 0 : index
    %1 = vector.load %arg2[%c0_1, %c0_2] : memref<640x128xbf16, #tpu.memory_space<vmem>>, vector<640x128xbf16>
    %cst = arith.constant dense<0.000000e+00> : vector<112x128xf32>
    %2 = tpu.matmul %0, %1, %cst {dimension_numbers = #tpu.dot_dimension_numbers<[1], [0], [0], [1], [0, 0, 1, 1], [], []>} : vector<112x640xbf16>, vector<640x128xbf16>, vector<112x128xf32> -> vector<112x128xf32>
    %c0_3 = arith.constant 0 : index
    %c0_4 = arith.constant 0 : index
    %3 = vector.load %arg3[%c0_3, %c0_4] : memref<1x128xf32, #tpu.memory_space<vmem>>, vector<1x128xf32>
    %4 = vector.broadcast %3 : vector<1x128xf32> to vector<112x128xf32>
    %5 = arith.addf %2, %4 : vector<112x128xf32>
    %cst_5 = arith.constant 0.000000e+00 : f32
    %6 = vector.broadcast %cst_5 : f32 to vector<112x128xf32>
    %7 = arith.maximumf %5, %6 : vector<112x128xf32>
    %8 = arith.truncf %7 : vector<112x128xf32> to vector<112x128xbf16>
    %c0_6 = arith.constant 0 : index
    %c0_7 = arith.constant 0 : index
    %9 = vector.load %arg4[%c0_6, %c0_7] : memref<112x128xbf16, #tpu.memory_space<vmem>>, vector<112x128xbf16>
    tpu.vector_store %arg4[%c0_6, %c0_7], %8 {strides = array<i32>} : memref<112x128xbf16, #tpu.memory_space<vmem>>, vector<112x128xbf16>,
    return
  }
  func.func @transform_0(%arg0: i32) -> (i32, i32) {
    %c0_i32 = arith.constant 0 : i32
    %c0_i32_0 = arith.constant 0 : i32
    return %arg0, %c0_i32 : i32, i32
  }
  func.func @transform_1(%arg0: i32) -> (i32, i32) {
    %c0_i32 = arith.constant 0 : i32
    %c0_i32_0 = arith.constant 0 : i32
    %c0_i32_1 = arith.constant 0 : i32
    return %c0_i32, %c0_i32_0 : i32, i32
  }
  func.func @transform_2(%arg0: i32) -> (i32, i32) {
    %c0_i32 = arith.constant 0 : i32
    %c0_i32_0 = arith.constant 0 : i32
    %c0_i32_1 = arith.constant 0 : i32
    return %c0_i32, %c0_i32_0 : i32, i32
  }
  func.func @transform_3(%arg0: i32) -> (i32, i32) {
    %c0_i32 = arith.constant 0 : i32
    %c0_i32_0 = arith.constant 0 : i32
    return %arg0, %c0_i32 : i32, i32
  }
}

module attributes {stable_mosaic.version = 11 : i64} {
  func.func @_mlp_kernel(%arg0: i32, %arg1: i32, %arg2: memref<16x640xbf16, #tpu.memory_space<vmem>>, %arg3: memref<640x512xbf16, #tpu.memory_space<vmem>>, %arg4: memref<1x512xf32, #tpu.memory_space<vmem>>, %arg5: memref<512x128xbf16, #tpu.memory_space<vmem>>, %arg6: memref<1x128xf32, #tpu.memory_space<vmem>>, %arg7: memref<16x128xf32, #tpu.memory_space<vmem>>, %arg8: memref<16x512xf32, #tpu.memory_space<vmem>>) attributes {dimension_semantics = [#tpu.dimension_semantics<parallel>, #tpu.dimension_semantics<arbitrary>], iteration_bounds = array<i64: 1, 5>, scalar_prefetch = 0 : i64, scratch_operands = 1 : i64, tpu.core_type = #tpu.core_type<tc>, window_params = [{transform_indices = @transform_0, window_bounds = array<i64: 16, 640>}, {transform_indices = @transform_1, window_bounds = array<i64: 640, 512>}, {pipeline_mode = #tpu.pipeline_mode<synchronous>, transform_indices = @transform_2, window_bounds = array<i64: 1, 512>}, {pipeline_mode = #tpu.pipeline_mode<synchronous>, transform_indices = @transform_3, window_bounds = array<i64: 512, 128>}, {pipeline_mode = #tpu.pipeline_mode<synchronous>, transform_indices = @transform_4, window_bounds = array<i64: 1, 128>}, {transform_indices = @transform_5, window_bounds = array<i64: 16, 128>}]} {
    %c0_i32 = arith.constant 0 : i32
    %0 = arith.cmpi eq, %arg1, %c0_i32 : i32
    %1 = arith.extui %0 : i1 to i32
    %c0_i32_0 = arith.constant 0 : i32
    %2 = arith.cmpi ne, %1, %c0_i32_0 : i32
    scf.if %2 {
      %cst_9 = arith.constant 0.000000e+00 : f32
      %12 = vector.broadcast %cst_9 : f32 to vector<16x512xf32>
      %c0_10 = arith.constant 0 : index
      %c0_11 = arith.constant 0 : index
      %13 = vector.load %arg8[%c0_10, %c0_11] : memref<16x512xf32, #tpu.memory_space<vmem>>, vector<16x512xf32>
      tpu.vector_store %arg8[%c0_10, %c0_11], %12 {strides = array<i32>} : memref<16x512xf32, #tpu.memory_space<vmem>>, vector<16x512xf32>,
    } else {
    }
    %c0 = arith.constant 0 : index
    %c0_1 = arith.constant 0 : index
    %3 = vector.load %arg8[%c0, %c0_1] : memref<16x512xf32, #tpu.memory_space<vmem>>, vector<16x512xf32>
    %c0_2 = arith.constant 0 : index
    %c0_3 = arith.constant 0 : index
    %4 = vector.load %arg2[%c0_2, %c0_3] : memref<16x640xbf16, #tpu.memory_space<vmem>>, vector<16x640xbf16>
    %c0_4 = arith.constant 0 : index
    %c0_5 = arith.constant 0 : index
    %5 = vector.load %arg3[%c0_4, %c0_5] : memref<640x512xbf16, #tpu.memory_space<vmem>>, vector<640x512xbf16>
    %cst = arith.constant dense<0.000000e+00> : vector<16x512xf32>
    %6 = tpu.matmul %4, %5, %cst {dimension_numbers = #tpu.dot_dimension_numbers<[1], [0], [0], [1], [0, 0, 1, 1], [], []>} : vector<16x640xbf16>, vector<640x512xbf16>, vector<16x512xf32> -> vector<16x512xf32>
    %7 = arith.addf %3, %6 : vector<16x512xf32>
    %c0_6 = arith.constant 0 : index
    %c0_7 = arith.constant 0 : index
    %8 = vector.load %arg8[%c0_6, %c0_7] : memref<16x512xf32, #tpu.memory_space<vmem>>, vector<16x512xf32>
    tpu.vector_store %arg8[%c0_6, %c0_7], %7 {strides = array<i32>} : memref<16x512xf32, #tpu.memory_space<vmem>>, vector<16x512xf32>,
    %c4_i32 = arith.constant 4 : i32
    %9 = arith.cmpi eq, %arg1, %c4_i32 : i32
    %10 = arith.extui %9 : i1 to i32
    %c0_i32_8 = arith.constant 0 : i32
    %11 = arith.cmpi ne, %10, %c0_i32_8 : i32
    scf.if %11 {
      %c0_9 = arith.constant 0 : index
      %c0_10 = arith.constant 0 : index
      %12 = vector.load %arg8[%c0_9, %c0_10] : memref<16x512xf32, #tpu.memory_space<vmem>>, vector<16x512xf32>
      %c0_11 = arith.constant 0 : index
      %c0_12 = arith.constant 0 : index
      %13 = vector.load %arg4[%c0_11, %c0_12] : memref<1x512xf32, #tpu.memory_space<vmem>>, vector<1x512xf32>
      %14 = vector.broadcast %13 : vector<1x512xf32> to vector<16x512xf32>
      %15 = arith.addf %12, %14 : vector<16x512xf32>
      %cst_13 = arith.constant 0.000000e+00 : f32
      %16 = vector.broadcast %cst_13 : f32 to vector<16x512xf32>
      %17 = arith.maximumf %15, %16 : vector<16x512xf32>
      %18 = arith.truncf %17 : vector<16x512xf32> to vector<16x512xbf16>
      %c0_14 = arith.constant 0 : index
      %c0_15 = arith.constant 0 : index
      %19 = vector.load %arg5[%c0_14, %c0_15] : memref<512x128xbf16, #tpu.memory_space<vmem>>, vector<512x128xbf16>
      %cst_16 = arith.constant dense<0.000000e+00> : vector<16x128xf32>
      %20 = tpu.matmul %18, %19, %cst_16 {dimension_numbers = #tpu.dot_dimension_numbers<[1], [0], [0], [1], [0, 0, 1, 1], [], []>} : vector<16x512xbf16>, vector<512x128xbf16>, vector<16x128xf32> -> vector<16x128xf32>
      %c0_17 = arith.constant 0 : index
      %c0_18 = arith.constant 0 : index
      %21 = vector.load %arg6[%c0_17, %c0_18] : memref<1x128xf32, #tpu.memory_space<vmem>>, vector<1x128xf32>
      %22 = vector.broadcast %21 : vector<1x128xf32> to vector<16x128xf32>
      %23 = arith.addf %20, %22 : vector<16x128xf32>
      %c0_19 = arith.constant 0 : index
      %c0_20 = arith.constant 0 : index
      %24 = vector.load %arg7[%c0_19, %c0_20] : memref<16x128xf32, #tpu.memory_space<vmem>>, vector<16x128xf32>
      tpu.vector_store %arg7[%c0_19, %c0_20], %23 {strides = array<i32>} : memref<16x128xf32, #tpu.memory_space<vmem>>, vector<16x128xf32>,
    } else {
    }
    return
  }
  func.func @transform_0(%arg0: i32, %arg1: i32) -> (i32, i32) {
    %c0_i32 = arith.constant 0 : i32
    return %arg0, %arg1 : i32, i32
  }
  func.func @transform_1(%arg0: i32, %arg1: i32) -> (i32, i32) {
    %c0_i32 = arith.constant 0 : i32
    %c0_i32_0 = arith.constant 0 : i32
    return %arg1, %c0_i32 : i32, i32
  }
  func.func @transform_2(%arg0: i32, %arg1: i32) -> (i32, i32) {
    %c0_i32 = arith.constant 0 : i32
    %c0_i32_0 = arith.constant 0 : i32
    %c0_i32_1 = arith.constant 0 : i32
    return %c0_i32, %c0_i32_0 : i32, i32
  }
  func.func @transform_3(%arg0: i32, %arg1: i32) -> (i32, i32) {
    %c0_i32 = arith.constant 0 : i32
    %c0_i32_0 = arith.constant 0 : i32
    %c0_i32_1 = arith.constant 0 : i32
    return %c0_i32, %c0_i32_0 : i32, i32
  }
  func.func @transform_4(%arg0: i32, %arg1: i32) -> (i32, i32) {
    %c0_i32 = arith.constant 0 : i32
    %c0_i32_0 = arith.constant 0 : i32
    %c0_i32_1 = arith.constant 0 : i32
    return %c0_i32, %c0_i32_0 : i32, i32
  }
  func.func @transform_5(%arg0: i32, %arg1: i32) -> (i32, i32) {
    %c0_i32 = arith.constant 0 : i32
    %c0_i32_0 = arith.constant 0 : i32
    return %arg0, %c0_i32 : i32, i32
  }
}

</mosaic_0001>

<bundles_post_ra>
// kernel: dqn_forward.4
= control target key start
LH: loop header
LB: loop body
LE: loop exit
PB: predicated region body
PF: predicated region fallthrough
CT: control target
= control target key end

     0   :  { %s3393_s1 = inlined_call_operand.vmem [shape: bf16[256,128], index: 1, kind: input, shape index: {}]   ;;  %s3394_s2 = inlined_call_operand.vmem [shape: f32[1,128], index: 2, kind: input, shape index: {}]   ;;  %s3395_s0 = inlined_call_operand.vmem [shape: bf16[800,256], index: 0, kind: input, shape index: {}]   ;;  %s3396_s3 = inlined_call_operand.vmem [shape: bf16[800,128], index: 3, kind: output, shape index: {}]  }
   0x1   :  { %v2139_v0 = vld [vmem:[%s3393_s1 + $0x38] sm:$0xff]  ;;  %v2138_v2 = vld [vmem:[%s3393_s1 + $0x30] sm:$0xff]  ;;  %v2137_v4 = vld [vmem:[%s3393_s1 + $0x28] sm:$0xff] }
   0x2   :  { %v2147_v1 = vld [vmem:[%s3393_s1 + $0x78] sm:$0xff]  ;;  %746 = vmatpush.bf16.msra.mxu0 %v2139_v0  ;;  %2447 = vmatpush.bf16.msra.mxu2 %v2139_v0  ;;  %v2146_v3 = vld [vmem:[%s3393_s1 + $0x70] sm:$0xff]  ;;  %v2145_v5 = vld [vmem:[%s3393_s1 + $0x68] sm:$0xff] }
   0x3   :  { %1005 = vmatpush.bf16.msra.mxu1 %v2147_v1  ;;  %2455 = vmatpush.bf16.msra.mxu3 %v2147_v1  ;;  %v2136_v6 = vld [vmem:[%s3393_s1 + $0x20] sm:$0xff]  ;;  %v2135_v8 = vld [vmem:[%s3393_s1 + $0x18] sm:$0xff]  ;;  %v2134_v10 = vld [vmem:[%s3393_s1 + $0x10] sm:$0xff] }
   0x4   :  { %v2144_v7 = vld [vmem:[%s3393_s1 + $0x60] sm:$0xff]  ;;  %v2143_v9 = vld [vmem:[%s3393_s1 + $0x58] sm:$0xff]  ;;  %v2142_v11 = vld [vmem:[%s3393_s1 + $0x50] sm:$0xff] }
   0x5   :  { %v2133_v12 = vld [vmem:[%s3393_s1 + $0x8] sm:$0xff]  ;;  %v2132_v14 = vld [vmem:[%s3393_s1] sm:$0xff]  ;;  %v1770_v18 = vld [vmem:[%s3395_s0 + $0x190] sm:$0xf] }
   0x6   :  { %747 = vmatpush.bf16.msra.mxu0 %v2138_v2  ;;  %2448 = vmatpush.bf16.msra.mxu2 %v2138_v2  ;;  %v2141_v13 = vld [vmem:[%s3393_s1 + $0x48] sm:$0xff]  ;;  %v2140_v15 = vld [vmem:[%s3393_s1 + $0x40] sm:$0xff]  ;;  %v2083_v19 = vld [vmem:[%s3395_s0 + $0x194] sm:$0xf0] }
   0x7   :  { %1006 = vmatpush.bf16.msra.mxu1 %v2146_v3  ;;  %2456 = vmatpush.bf16.msra.mxu3 %v2146_v3  ;;  %v1570_v16 = vld [vmem:[%s3395_s0] sm:$0xf]  ;;  %v2033_v17 = vld [vmem:[%s3395_s0 + $0x4] sm:$0xf0]  ;;  %v2032_v20 = vld [vmem:[%s3395_s0 + $0x4] sm:$0xf]  ;;  %v1771_v25 = vor.u32 %v2083_v19, %v1770_v18 }
   0x8   :  { %v1572_v21 = vld [vmem:[%s3395_s0 + $0x8] sm:$0xf0]  ;;  %v2082_v22 = vld [vmem:[%s3395_s0 + $0x194] sm:$0xf]  ;;  %v1772_v23 = vld [vmem:[%s3395_s0 + $0x198] sm:$0xf0]  ;;  %v1571_v24 = vor.u32 %v2033_v17, %v1570_v16 }
   0x9   :  { %v1575_v26 = vor.u32 %v2032_v20, %v1572_v21  ;;  %v1775_v27 = vor.u32 %v2082_v22, %v1772_v23  ;;  %v1578_v28 = vld [vmem:[%s3395_s0 + $0x10] sm:$0xf]  ;;  %v2035_v29 = vld [vmem:[%s3395_s0 + $0x14] sm:$0xf0]  ;;  %v1778_v30 = vld [vmem:[%s3395_s0 + $0x1a0] sm:$0xf] }
   0xa   :  { %748 = vmatpush.bf16.msra.mxu0 %v2137_v4  ;;  %2449 = vmatpush.bf16.msra.mxu2 %v2137_v4  ;;  %v2085_v31 = vld [vmem:[%s3395_s0 + $0x1a4] sm:$0xf0]  ;;  %v2034_v32 = vld [vmem:[%s3395_s0 + $0x14] sm:$0xf]  ;;  %v1580_v33 = vld [vmem:[%s3395_s0 + $0x18] sm:$0xf0]  ;;  %v1579_v36 = vor.u32 %v2035_v29, %v1578_v28 }
   0xb   :  { %1007 = vmatpush.bf16.msra.mxu1 %v2145_v5  ;;  %2457 = vmatpush.bf16.msra.mxu3 %v2145_v5  ;;  %v2084_v34 = vld [vmem:[%s3395_s0 + $0x1a4] sm:$0xf]  ;;  %v1780_v35 = vld [vmem:[%s3395_s0 + $0x1a8] sm:$0xf0]  ;;  %v1779_v37 = vor.u32 %v2085_v31, %v1778_v30  ;;  %v1583_v38 = vor.u32 %v2034_v32, %v1580_v33  ;;  %v1586_v40 = vld [vmem:[%s3395_s0 + $0x20] sm:$0xf] }
   0xc   :  { %v1783_v39 = vor.u32 %v2084_v34, %v1780_v35  ;;  %v2037_v41 = vld [vmem:[%s3395_s0 + $0x24] sm:$0xf0]  ;;  %v1786_v42 = vld [vmem:[%s3395_s0 + $0x1b0] sm:$0xf]  ;;  %v2087_v43 = vld [vmem:[%s3395_s0 + $0x1b4] sm:$0xf0] }
   0xd   :  { %v2036_v44 = vld [vmem:[%s3395_s0 + $0x24] sm:$0xf]  ;;  %v1588_v45 = vld [vmem:[%s3395_s0 + $0x28] sm:$0xf0]  ;;  %v2086_v46 = vld [vmem:[%s3395_s0 + $0x1b4] sm:$0xf]  ;;  %v1587_v48 = vor.u32 %v2037_v41, %v1586_v40  ;;  %v1787_v49 = vor.u32 %v2087_v43, %v1786_v42 }
   0xe   :  { %749 = vmatpush.bf16.msra.mxu0 %v2136_v6  ;;  %2450 = vmatpush.bf16.msra.mxu2 %v2136_v6  ;;  %v1788_v47 = vld [vmem:[%s3395_s0 + $0x1b8] sm:$0xf0]  ;;  %v1591_v50 = vor.u32 %v2036_v44, %v1588_v45  ;;  %v1594_v52 = vld [vmem:[%s3395_s0 + $0x30] sm:$0xf]  ;;  %v2039_v53 = vld [vmem:[%s3395_s0 + $0x34] sm:$0xf0] }
   0xf   :  { %1008 = vmatpush.bf16.msra.mxu1 %v2144_v7  ;;  %2458 = vmatpush.bf16.msra.mxu3 %v2144_v7  ;;  %v1791_v51 = vor.u32 %v2086_v46, %v1788_v47  ;;  %v1794_v54 = vld [vmem:[%s3395_s0 + $0x1c0] sm:$0xf]  ;;  %v2089_v55 = vld [vmem:[%s3395_s0 + $0x1c4] sm:$0xf0]  ;;  %v2038_v56 = vld [vmem:[%s3395_s0 + $0x34] sm:$0xf]  ;;  %v1595_v60 = vor.u32 %v2039_v53, %v1594_v52 }
  0x10   :  { %v1596_v57 = vld [vmem:[%s3395_s0 + $0x38] sm:$0xf0]  ;;  %v2088_v58 = vld [vmem:[%s3395_s0 + $0x1c4] sm:$0xf]  ;;  %v1796_v59 = vld [vmem:[%s3395_s0 + $0x1c8] sm:$0xf0]  ;;  %v1795_v61 = vor.u32 %v2089_v55, %v1794_v54 }
  0x11   :  { %v1599_v62 = vor.u32 %v2038_v56, %v1596_v57  ;;  %v1799_v63 = vor.u32 %v2088_v58, %v1796_v59  ;;  %v1602_v0 = vld [vmem:[%s3395_s0 + $0x40] sm:$0xf]  ;;  %v2041_v1 = vld [vmem:[%s3395_s0 + $0x44] sm:$0xf0]  ;;  %v1802_v2 = vld [vmem:[%s3395_s0 + $0x1d0] sm:$0xf] }
  0x12   :  { %750 = vmatpush.bf16.msra.mxu0 %v2135_v8  ;;  %2451 = vmatpush.bf16.msra.mxu2 %v2135_v8  ;;  %v2091_v3 = vld [vmem:[%s3395_s0 + $0x1d4] sm:$0xf0]  ;;  %v2040_v4 = vld [vmem:[%s3395_s0 + $0x44] sm:$0xf]  ;;  %v1604_v5 = vld [vmem:[%s3395_s0 + $0x48] sm:$0xf0]  ;;  %v1603_v8 = vor.u32 %v2041_v1, %v1602_v0 }
  0x13   :  { %1009 = vmatpush.bf16.msra.mxu1 %v2143_v9  ;;  %2459 = vmatpush.bf16.msra.mxu3 %v2143_v9  ;;  %v2090_v6 = vld [vmem:[%s3395_s0 + $0x1d4] sm:$0xf]  ;;  %v1804_v7 = vld [vmem:[%s3395_s0 + $0x1d8] sm:$0xf0]  ;;  %v1803_v9 = vor.u32 %v2091_v3, %v1802_v2  ;;  %v2092_v18 = vld [vmem:[%s3395_s0 + $0x1e4] sm:$0xf] }
  0x14   :  { %v2042_v16 = vld [vmem:[%s3395_s0 + $0x54] sm:$0xf]  ;;  %v1612_v17 = vld [vmem:[%s3395_s0 + $0x58] sm:$0xf0]  ;;  %v1812_v19 = vld [vmem:[%s3395_s0 + $0x1e8] sm:$0xf0] }
  0x15   :  { %v1615_v22 = vor.u32 %v2042_v16, %v1612_v17  ;;  %v1815_v23 = vor.u32 %v2092_v18, %v1812_v19  ;;  %v2044_v28 = vld [vmem:[%s3395_s0 + $0x64] sm:$0xf]  ;;  %v1620_v29 = vld [vmem:[%s3395_s0 + $0x68] sm:$0xf0]  ;;  %v2094_v30 = vld [vmem:[%s3395_s0 + $0x1f4] sm:$0xf] }
  0x16   :  { %751 = vmatpush.bf16.msra.mxu0 %v2134_v10  ;;  %2452 = vmatpush.bf16.msra.mxu2 %v2134_v10  ;;  %v1607_v10 = vor.u32 %v2040_v4, %v1604_v5  ;;  %v1820_v31 = vld [vmem:[%s3395_s0 + $0x1f8] sm:$0xf0]  ;;  %v1623_v34 = vor.u32 %v2044_v28, %v1620_v29  ;;  %v2046_v40 = vld [vmem:[%s3395_s0 + $0x74] sm:$0xf]  ;;  %v2096_v42 = vld [vmem:[%s3395_s0 + $0x204] sm:$0xf] }
  0x17   :  { %1010 = vmatpush.bf16.msra.mxu1 %v2142_v11  ;;  %2460 = vmatpush.bf16.msra.mxu3 %v2142_v11  ;;  %v1807_v11 = vor.u32 %v2090_v6, %v1804_v7  ;;  %v1823_v35 = vor.u32 %v2094_v30, %v1820_v31  ;;  %v1628_v41 = vld [vmem:[%s3395_s0 + $0x78] sm:$0xf0]  ;;  %v1828_v43 = vld [vmem:[%s3395_s0 + $0x208] sm:$0xf0]  ;;  %v2048_v52 = vld [vmem:[%s3395_s0 + $0x84] sm:$0xf] }
  0x18   :  { %v1631_v46 = vor.u32 %v2046_v40, %v1628_v41  ;;  %v1831_v47 = vor.u32 %v2096_v42, %v1828_v43  ;;  %v1636_v53 = vld [vmem:[%s3395_s0 + $0x88] sm:$0xf0]  ;;  %v2098_v54 = vld [vmem:[%s3395_s0 + $0x214] sm:$0xf]  ;;  %v1836_v55 = vld [vmem:[%s3395_s0 + $0x218] sm:$0xf0] }
  0x19   :  { %v1639_v59 = vor.u32 %v2048_v52, %v1636_v53  ;;  %v2100_v16 = vld [vmem:[%s3395_s0 + $0x224] sm:$0xf]  ;;  %v1844_v17 = vld [vmem:[%s3395_s0 + $0x228] sm:$0xf0]  ;;  %v1650_v42 = vld [vmem:[%s3395_s0 + $0xa0] sm:$0xf] }
  0x1a   :  { %752 = vmatpush.bf16.msra.mxu0 %v2133_v12  ;;  %2453 = vmatpush.bf16.msra.mxu2 %v2133_v12  ;;  %v1610_v12 = vld [vmem:[%s3395_s0 + $0x50] sm:$0xf]  ;;  %v2053_v43 = vld [vmem:[%s3395_s0 + $0xa4] sm:$0xf0] }
  0x1b   :  { %1011 = vmatpush.bf16.msra.mxu1 %v2141_v13  ;;  %2461 = vmatpush.bf16.msra.mxu3 %v2141_v13  ;;  %v2043_v13 = vld [vmem:[%s3395_s0 + $0x54] sm:$0xf0]  ;;  %v1651_v53 = vor.u32 %v2053_v43, %v1650_v42 }
  0x1c   :  { %v1611_v20 = vor.u32 %v2043_v13, %v1610_v12  ;;  %v2050_v12 = vld [vmem:[%s3395_s0 + $0x94] sm:$0xf]  ;;  %v1644_v13 = vld [vmem:[%s3395_s0 + $0x98] sm:$0xf0] }
  0x1e   :  { %753 = vmatpush.bf16.msra.mxu0 %v2132_v14  ;;  %2454 = vmatpush.bf16.msra.mxu2 %v2132_v14  ;;  %v1810_v14 = vld [vmem:[%s3395_s0 + $0x1e0] sm:$0xf] }
  0x1f   :  { %1012 = vmatpush.bf16.msra.mxu1 %v2140_v15  ;;  %2462 = vmatpush.bf16.msra.mxu3 %v2140_v15  ;;  %v2093_v15 = vld [vmem:[%s3395_s0 + $0x1e4] sm:$0xf0] }
  0x20   :  { %v1811_v21 = vor.u32 %v2093_v15, %v1810_v14 }
  0x21   :  { %754 = vmatmul.bf16.vlgmr.msra.gmra.mxu0 %v1571_v24  ;;  %879 = vmatmul.bf16.vlgmr.msra.gmra.mxu2 %v1771_v25  ;;  %v1618_v24 = vld [vmem:[%s3395_s0 + $0x60] sm:$0xf]  ;;  %v2045_v25 = vld [vmem:[%s3395_s0 + $0x64] sm:$0xf0] }
  0x22   :  { %1013 = vmatmul.bf16.vlgmr.msra.gmra.mxu1 %v1575_v26  ;;  %1138 = vmatmul.bf16.vlgmr.msra.gmra.mxu3 %v1775_v27  ;;  %v1818_v26 = vld [vmem:[%s3395_s0 + $0x1f0] sm:$0xf]  ;;  %v2095_v27 = vld [vmem:[%s3395_s0 + $0x1f4] sm:$0xf0]  ;;  %v1619_v32 = vor.u32 %v2045_v25, %v1618_v24 }
  0x23   :  { %v1819_v33 = vor.u32 %v2095_v27, %v1818_v26  ;;  %v1647_v26 = vor.u32 %v2050_v12, %v1644_v13  ;;  %v1847_v27 = vor.u32 %v2100_v16, %v1844_v17  ;;  %v1658_v13 = vld [vmem:[%s3395_s0 + $0xb0] sm:$0xf]  ;;  %v2105_v16 = vld [vmem:[%s3395_s0 + $0x244] sm:$0xf0]  ;;  %v2054_v17 = vld [vmem:[%s3395_s0 + $0xb4] sm:$0xf] }
  0x31   :  { %759 = vmatmul.bf16.gmra.mxu0 %v1579_v36  ;;  %884 = vmatmul.bf16.gmra.mxu2 %v1779_v37  ;;  %v1626_v36 = vld [vmem:[%s3395_s0 + $0x70] sm:$0xf]  ;;  %v2047_v37 = vld [vmem:[%s3395_s0 + $0x74] sm:$0xf0] }
  0x32   :  { %1018 = vmatmul.bf16.gmra.mxu1 %v1583_v38  ;;  %1143 = vmatmul.bf16.gmra.mxu3 %v1783_v39  ;;  %v1826_v38 = vld [vmem:[%s3395_s0 + $0x200] sm:$0xf]  ;;  %v2097_v39 = vld [vmem:[%s3395_s0 + $0x204] sm:$0xf0]  ;;  %v1627_v44 = vor.u32 %v2047_v37, %v1626_v36 }
  0x33   :  { %v1827_v45 = vor.u32 %v2097_v39, %v1826_v38 }
  0x41   :  { %764 = vmatmul.bf16.gmra.mxu0 %v1587_v48  ;;  %889 = vmatmul.bf16.gmra.mxu2 %v1787_v49  ;;  %v1634_v48 = vld [vmem:[%s3395_s0 + $0x80] sm:$0xf]  ;;  %v2049_v49 = vld [vmem:[%s3395_s0 + $0x84] sm:$0xf0] }
  0x42   :  { %1023 = vmatmul.bf16.gmra.mxu1 %v1591_v50  ;;  %1148 = vmatmul.bf16.gmra.mxu3 %v1791_v51  ;;  %v1834_v50 = vld [vmem:[%s3395_s0 + $0x210] sm:$0xf]  ;;  %v2099_v51 = vld [vmem:[%s3395_s0 + $0x214] sm:$0xf0]  ;;  %v1635_v56 = vor.u32 %v2049_v49, %v1634_v48 }
  0x43   :  { %v1835_v57 = vor.u32 %v2099_v51, %v1834_v50  ;;  %v2102_v50 = vld [vmem:[%s3395_s0 + $0x234] sm:$0xf]  ;;  %v1852_v51 = vld [vmem:[%s3395_s0 + $0x238] sm:$0xf0] }
  0x51   :  { %769 = vmatmul.bf16.gmra.mxu0 %v1595_v60  ;;  %894 = vmatmul.bf16.gmra.mxu2 %v1795_v61  ;;  %v1839_v60 = vor.u32 %v2098_v54, %v1836_v55  ;;  %v2752_v61 = vld [vmem:[%s3394_s2] ss:$0 sm:$0xff] }
  0x52   :  { %1028 = vmatmul.bf16.gmra.mxu1 %v1599_v62  ;;  %1153 = vmatmul.bf16.gmra.mxu3 %v1799_v63 }
  0x61   :  { %774 = vmatmul.bf16.gmra.mxu0 %v1603_v8  ;;  %899 = vmatmul.bf16.gmra.mxu2 %v1803_v9  ;;  %v1642_v8 = vld [vmem:[%s3395_s0 + $0x90] sm:$0xf]  ;;  %v2051_v9 = vld [vmem:[%s3395_s0 + $0x94] sm:$0xf0] }
  0x62   :  { %1033 = vmatmul.bf16.gmra.mxu1 %v1607_v10  ;;  %1158 = vmatmul.bf16.gmra.mxu3 %v1807_v11  ;;  %v1842_v10 = vld [vmem:[%s3395_s0 + $0x220] sm:$0xf]  ;;  %v2101_v11 = vld [vmem:[%s3395_s0 + $0x224] sm:$0xf0]  ;;  %v1643_v19 = vor.u32 %v2051_v9, %v1642_v8 }
  0x63   :  { %v1843_v24 = vor.u32 %v2101_v11, %v1842_v10 }
  0x71   :  { %779 = vmatmul.bf16.gmra.mxu0 %v1611_v20  ;;  %904 = vmatmul.bf16.gmra.mxu2 %v1811_v21 }
  0x72   :  { %1038 = vmatmul.bf16.gmra.mxu1 %v1615_v22  ;;  %1163 = vmatmul.bf16.gmra.mxu3 %v1815_v23 }
  0x81   :  { %784 = vmatmul.bf16.gmra.mxu0 %v1619_v32  ;;  %909 = vmatmul.bf16.gmra.mxu2 %v1819_v33 }
  0x82   :  { %1043 = vmatmul.bf16.gmra.mxu1 %v1623_v34  ;;  %1168 = vmatmul.bf16.gmra.mxu3 %v1823_v35 }
  0x91   :  { %789 = vmatmul.bf16.gmra.mxu0 %v1627_v44  ;;  %914 = vmatmul.bf16.gmra.mxu2 %v1827_v45  ;;  %v1850_v44 = vld [vmem:[%s3395_s0 + $0x230] sm:$0xf]  ;;  %v2103_v45 = vld [vmem:[%s3395_s0 + $0x234] sm:$0xf0] }
  0x92   :  { %1048 = vmatmul.bf16.gmra.mxu1 %v1631_v46  ;;  %1173 = vmatmul.bf16.gmra.mxu3 %v1831_v47  ;;  %v2052_v46 = vld [vmem:[%s3395_s0 + $0xa4] sm:$0xf]  ;;  %v1652_v47 = vld [vmem:[%s3395_s0 + $0xa8] sm:$0xf0] }
  0x9e   :  { %v755_v58 = vpop.f32.mrf.mxu0 }
  0x9f   :  { %v1014_v62 = vpop.f32.mrf.mxu1  ;;  %v756_v63 = vadd.f32 %v2752_v61, %v755_v58  ;;  %v1851_v58 = vor.u32 %v2103_v45, %v1850_v44 }
  0xa1   :  { %794 = vmatmul.bf16.gmra.mxu0 %v1635_v56  ;;  %919 = vmatmul.bf16.gmra.mxu2 %v1835_v57  ;;  %v1015_v3 = vadd.f32 %v1014_v62, %v756_v63  ;;  %v1855_v62 = vor.u32 %v2102_v50, %v1852_v51  ;;  %v2107_v50 = vld [vmem:[%s3395_s0 + $0x254] sm:$0xf0]  ;;  %v2056_v51 = vld [vmem:[%s3395_s0 + $0xc4] sm:$0xf] }
  0xa2   :  { %1053 = vmatmul.bf16.gmra.mxu1 %v1639_v59  ;;  %1178 = vmatmul.bf16.gmra.mxu3 %v1839_v60  ;;  %v1655_v60 = vor.u32 %v2052_v46, %v1652_v47  ;;  %v1666_v47 = vld [vmem:[%s3395_s0 + $0xc0] sm:$0xf] }
  0xa3   :  { %v1264_v14 = vmax.f32 %v1015_v3, 0.0 }
  0xa4   :  { %v880_v0 = vpop.f32.mrf.mxu2 }
  0xa5   :  { %v1139_v1 = vpop.f32.mrf.mxu3  ;;  %v881_v6 = vadd.f32 %v2752_v61, %v880_v0 }
  0xa6   :  { %v757_v2 = vpop.f32.mrf.mxu0 }
  0xa7   :  { %v758_v4 = vadd.f32 %v2752_v61, %v757_v2  ;;  %v1016_v5 = vpop.f32.mrf.mxu1  ;;  %v1140_v20 = vadd.f32 %v1139_v1, %v881_v6 }
  0xa9   :  { %v1017_v7 = vadd.f32 %v1016_v5, %v758_v4  ;;  %v1314_v30 = vmax.f32 %v1140_v20, 0.0 }
  0xab   :  { %v1265_v15 = vmax.f32 %v1017_v7, 0.0 }
  0xac   :  { %v882_v18 = vpop.f32.mrf.mxu2 }
  0xad   :  { %v2151_v21 = vpack.c.bf16 %v1265_v15, %v1264_v14  ;;  %v883_v22 = vadd.f32 %v2752_v61, %v882_v18  ;;  %v1141_v23 = vpop.f32.mrf.mxu3  ;;  %v2055_v14 = vld [vmem:[%s3395_s0 + $0xb4] sm:$0xf0]  ;;  %v1858_v15 = vld [vmem:[%s3395_s0 + $0x240] sm:$0xf]  ;;  %v1660_v18 = vld [vmem:[%s3395_s0 + $0xb8] sm:$0xf0] }
  0xae   :  { %v760_v25 = vpop.f32.mrf.mxu0 }
  0xaf   :  { %2152 = vst [vmem:[%s3396_s3] sm:$0xff] %v2151_v21   ;;  %v1142_v28 = vadd.f32 %v1141_v23, %v883_v22  ;;  %v1019_v29 = vpop.f32.mrf.mxu1  ;;  %v761_v33 = vadd.f32 %v2752_v61, %v760_v25  ;;  %v2104_v21 = vld [vmem:[%s3395_s0 + $0x244] sm:$0xf]  ;;  %v1860_v22 = vld [vmem:[%s3395_s0 + $0x248] sm:$0xf0] }
  0xb1   :  { %v1315_v31 = vmax.f32 %v1142_v28, 0.0  ;;  %799 = vmatmul.bf16.gmra.mxu0 %v1643_v19  ;;  %924 = vmatmul.bf16.gmra.mxu2 %v1843_v24  ;;  %v1020_v37 = vadd.f32 %v1019_v29, %v761_v33  ;;  %v1659_v24 = vor.u32 %v2055_v14, %v1658_v13  ;;  %v1859_v29 = vor.u32 %v2105_v16, %v1858_v15 }
  0xb2   :  { %1058 = vmatmul.bf16.gmra.mxu1 %v1647_v26  ;;  %1183 = vmatmul.bf16.gmra.mxu3 %v1847_v27 }
  0xb3   :  { %v2276_v32 = vpack.c.bf16 %v1315_v31, %v1314_v30  ;;  %v1266_v48 = vmax.f32 %v1020_v37, 0.0  ;;  %v1663_v31 = vor.u32 %v2054_v17, %v1660_v18  ;;  %v1674_v18 = vld [vmem:[%s3395_s0 + $0xd0] sm:$0xf] }
  0xb4   :  { %v885_v34 = vpop.f32.mrf.mxu2 }
  0xb5   :  { %2422 = vst [vmem:[%s3396_s3 + $0xc8] sm:$0xff] %v2276_v32   ;;  %v1144_v35 = vpop.f32.mrf.mxu3  ;;  %v886_v40 = vadd.f32 %v2752_v61, %v885_v34  ;;  %v1863_v32 = vor.u32 %v2104_v21, %v1860_v22  ;;  %v2109_v21 = vld [vmem:[%s3395_s0 + $0x264] sm:$0xf0]  ;;  %v2058_v22 = vld [vmem:[%s3395_s0 + $0xd4] sm:$0xf] }
  0xb6   :  { %v762_v36 = vpop.f32.mrf.mxu0 }
  0xb7   :  { %v763_v38 = vadd.f32 %v2752_v61, %v762_v36  ;;  %v1021_v39 = vpop.f32.mrf.mxu1  ;;  %v1145_v54 = vadd.f32 %v1144_v35, %v886_v40 }
  0xb9   :  { %v1022_v41 = vadd.f32 %v1021_v39, %v763_v38  ;;  %v1316_v1 = vmax.f32 %v1145_v54, 0.0 }
  0xbb   :  { %v1267_v49 = vmax.f32 %v1022_v41, 0.0 }
  0xbc   :  { %v887_v52 = vpop.f32.mrf.mxu2 }
  0xbd   :  { %v2156_v55 = vpack.c.bf16 %v1267_v49, %v1266_v48  ;;  %v888_v56 = vadd.f32 %v2752_v61, %v887_v52  ;;  %v1146_v57 = vpop.f32.mrf.mxu3  ;;  %v2057_v48 = vld [vmem:[%s3395_s0 + $0xc4] sm:$0xf0]  ;;  %v1866_v49 = vld [vmem:[%s3395_s0 + $0x250] sm:$0xf]  ;;  %v1668_v52 = vld [vmem:[%s3395_s0 + $0xc8] sm:$0xf0] }
  0xbe   :  { %v765_v59 = vpop.f32.mrf.mxu0 }
  0xbf   :  { %2398 = vst [vmem:[%s3396_s3 + $0x8] sm:$0xff] %v2156_v55   ;;  %v1147_v63 = vadd.f32 %v1146_v57, %v888_v56  ;;  %v1024_v0 = vpop.f32.mrf.mxu1  ;;  %v766_v4 = vadd.f32 %v2752_v61, %v765_v59  ;;  %v2106_v55 = vld [vmem:[%s3395_s0 + $0x254] sm:$0xf]  ;;  %v1868_v56 = vld [vmem:[%s3395_s0 + $0x258] sm:$0xf0] }
  0xc1   :  { %v1317_v2 = vmax.f32 %v1147_v63, 0.0  ;;  %804 = vmatmul.bf16.gmra.mxu0 %v1651_v53  ;;  %929 = vmatmul.bf16.gmra.mxu2 %v1851_v58  ;;  %v1025_v8 = vadd.f32 %v1024_v0, %v766_v4  ;;  %v1667_v58 = vor.u32 %v2057_v48, %v1666_v47  ;;  %v1867_v0 = vor.u32 %v2107_v50, %v1866_v49 }
  0xc2   :  { %1063 = vmatmul.bf16.gmra.mxu1 %v1655_v60  ;;  %1188 = vmatmul.bf16.gmra.mxu3 %v1855_v62 }
  0xc3   :  { %v2281_v3 = vpack.c.bf16 %v1317_v2, %v1316_v1  ;;  %v1268_v19 = vmax.f32 %v1025_v8, 0.0  ;;  %v1671_v2 = vor.u32 %v2056_v51, %v1668_v52  ;;  %v1682_v52 = vld [vmem:[%s3395_s0 + $0xe0] sm:$0xf] }
  0xc4   :  { %v890_v5 = vpop.f32.mrf.mxu2 }
  0xc5   :  { %2423 = vst [vmem:[%s3396_s3 + $0xd0] sm:$0xff] %v2281_v3   ;;  %v1149_v6 = vpop.f32.mrf.mxu3  ;;  %v891_v11 = vadd.f32 %v2752_v61, %v890_v5  ;;  %v1871_v3 = vor.u32 %v2106_v55, %v1868_v56  ;;  %v2111_v55 = vld [vmem:[%s3395_s0 + $0x274] sm:$0xf0]  ;;  %v2060_v56 = vld [vmem:[%s3395_s0 + $0xe4] sm:$0xf] }
  0xc6   :  { %v767_v7 = vpop.f32.mrf.mxu0 }
  0xc7   :  { %v768_v9 = vadd.f32 %v2752_v61, %v767_v7  ;;  %v1026_v10 = vpop.f32.mrf.mxu1  ;;  %v1150_v25 = vadd.f32 %v1149_v6, %v891_v11 }
  0xc9   :  { %v1027_v12 = vadd.f32 %v1026_v10, %v768_v9  ;;  %v1318_v35 = vmax.f32 %v1150_v25, 0.0 }
  0xcb   :  { %v1269_v20 = vmax.f32 %v1027_v12, 0.0 }
  0xcc   :  { %v892_v23 = vpop.f32.mrf.mxu2 }
  0xcd   :  { %v2161_v26 = vpack.c.bf16 %v1269_v20, %v1268_v19  ;;  %v893_v27 = vadd.f32 %v2752_v61, %v892_v23  ;;  %v1151_v28 = vpop.f32.mrf.mxu3  ;;  %v2059_v19 = vld [vmem:[%s3395_s0 + $0xd4] sm:$0xf0]  ;;  %v1874_v20 = vld [vmem:[%s3395_s0 + $0x260] sm:$0xf]  ;;  %v1676_v23 = vld [vmem:[%s3395_s0 + $0xd8] sm:$0xf0] }
  0xce   :  { %v770_v30 = vpop.f32.mrf.mxu0 }
  0xcf   :  { %2399 = vst [vmem:[%s3396_s3 + $0x10] sm:$0xff] %v2161_v26   ;;  %v1152_v33 = vadd.f32 %v1151_v28, %v893_v27  ;;  %v1029_v34 = vpop.f32.mrf.mxu1  ;;  %v771_v38 = vadd.f32 %v2752_v61, %v770_v30  ;;  %v2108_v26 = vld [vmem:[%s3395_s0 + $0x264] sm:$0xf]  ;;  %v1876_v27 = vld [vmem:[%s3395_s0 + $0x268] sm:$0xf0] }
  0xd1   :  { %v1319_v36 = vmax.f32 %v1152_v33, 0.0  ;;  %809 = vmatmul.bf16.gmra.mxu0 %v1659_v24  ;;  %934 = vmatmul.bf16.gmra.mxu2 %v1859_v29  ;;  %v1030_v42 = vadd.f32 %v1029_v34, %v771_v38  ;;  %v1675_v29 = vor.u32 %v2059_v19, %v1674_v18  ;;  %v1875_v34 = vor.u32 %v2109_v21, %v1874_v20 }
  0xd2   :  { %1068 = vmatmul.bf16.gmra.mxu1 %v1663_v31  ;;  %1193 = vmatmul.bf16.gmra.mxu3 %v1863_v32 }
  0xd3   :  { %v2286_v37 = vpack.c.bf16 %v1319_v36, %v1318_v35  ;;  %v1270_v53 = vmax.f32 %v1030_v42, 0.0  ;;  %v1679_v36 = vor.u32 %v2058_v22, %v1676_v23  ;;  %v1690_v23 = vld [vmem:[%s3395_s0 + $0xf0] sm:$0xf] }
  0xd4   :  { %v895_v39 = vpop.f32.mrf.mxu2 }
  0xd5   :  { %2424 = vst [vmem:[%s3396_s3 + $0xd8] sm:$0xff] %v2286_v37   ;;  %v1154_v40 = vpop.f32.mrf.mxu3  ;;  %v896_v45 = vadd.f32 %v2752_v61, %v895_v39  ;;  %v1879_v37 = vor.u32 %v2108_v26, %v1876_v27  ;;  %v2113_v26 = vld [vmem:[%s3395_s0 + $0x284] sm:$0xf0]  ;;  %v2062_v27 = vld [vmem:[%s3395_s0 + $0xf4] sm:$0xf] }
  0xd6   :  { %v772_v41 = vpop.f32.mrf.mxu0 }
  0xd7   :  { %v773_v43 = vadd.f32 %v2752_v61, %v772_v41  ;;  %v1031_v44 = vpop.f32.mrf.mxu1  ;;  %v1155_v59 = vadd.f32 %v1154_v40, %v896_v45 }
  0xd9   :  { %v1032_v46 = vadd.f32 %v1031_v44, %v773_v43  ;;  %v1320_v6 = vmax.f32 %v1155_v59, 0.0 }
  0xdb   :  { %v1271_v54 = vmax.f32 %v1032_v46, 0.0 }
  0xdc   :  { %v897_v57 = vpop.f32.mrf.mxu2 }
  0xdd   :  { %v2166_v60 = vpack.c.bf16 %v1271_v54, %v1270_v53  ;;  %v898_v62 = vadd.f32 %v2752_v61, %v897_v57  ;;  %v1156_v63 = vpop.f32.mrf.mxu3  ;;  %v2061_v53 = vld [vmem:[%s3395_s0 + $0xe4] sm:$0xf0]  ;;  %v1882_v54 = vld [vmem:[%s3395_s0 + $0x270] sm:$0xf]  ;;  %v1684_v57 = vld [vmem:[%s3395_s0 + $0xe8] sm:$0xf0] }
  0xde   :  { %v775_v1 = vpop.f32.mrf.mxu0 }
  0xdf   :  { %2400 = vst [vmem:[%s3396_s3 + $0x18] sm:$0xff] %v2166_v60   ;;  %v1157_v4 = vadd.f32 %v1156_v63, %v898_v62  ;;  %v1034_v5 = vpop.f32.mrf.mxu1  ;;  %v776_v9 = vadd.f32 %v2752_v61, %v775_v1  ;;  %v2110_v60 = vld [vmem:[%s3395_s0 + $0x274] sm:$0xf]  ;;  %v1884_v62 = vld [vmem:[%s3395_s0 + $0x278] sm:$0xf0] }
  0xe1   :  { %v1321_v7 = vmax.f32 %v1157_v4, 0.0  ;;  %814 = vmatmul.bf16.gmra.mxu0 %v1667_v58  ;;  %939 = vmatmul.bf16.gmra.mxu2 %v1867_v0  ;;  %v1035_v13 = vadd.f32 %v1034_v5, %v776_v9  ;;  %v1683_v0 = vor.u32 %v2061_v53, %v1682_v52  ;;  %v1883_v5 = vor.u32 %v2111_v55, %v1882_v54 }
  0xe2   :  { %1073 = vmatmul.bf16.gmra.mxu1 %v1671_v2  ;;  %1198 = vmatmul.bf16.gmra.mxu3 %v1871_v3 }
  0xe3   :  { %v2291_v8 = vpack.c.bf16 %v1321_v7, %v1320_v6  ;;  %v1272_v24 = vmax.f32 %v1035_v13, 0.0  ;;  %v1687_v7 = vor.u32 %v2060_v56, %v1684_v57  ;;  %v1698_v57 = vld [vmem:[%s3395_s0 + $0x100] sm:$0xf] }
  0xe4   :  { %v900_v10 = vpop.f32.mrf.mxu2 }
  0xe5   :  { %2425 = vst [vmem:[%s3396_s3 + $0xe0] sm:$0xff] %v2291_v8   ;;  %v1159_v11 = vpop.f32.mrf.mxu3  ;;  %v901_v16 = vadd.f32 %v2752_v61, %v900_v10  ;;  %v1887_v8 = vor.u32 %v2110_v60, %v1884_v62  ;;  %v2115_v60 = vld [vmem:[%s3395_s0 + $0x294] sm:$0xf0]  ;;  %v2064_v62 = vld [vmem:[%s3395_s0 + $0x104] sm:$0xf] }
  0xe6   :  { %v777_v12 = vpop.f32.mrf.mxu0 }
  0xe7   :  { %v778_v14 = vadd.f32 %v2752_v61, %v777_v12  ;;  %v1036_v15 = vpop.f32.mrf.mxu1  ;;  %v1160_v30 = vadd.f32 %v1159_v11, %v901_v16 }
  0xe9   :  { %v1037_v17 = vadd.f32 %v1036_v15, %v778_v14  ;;  %v1322_v40 = vmax.f32 %v1160_v30, 0.0 }
  0xeb   :  { %v1273_v25 = vmax.f32 %v1037_v17, 0.0 }
  0xec   :  { %v902_v28 = vpop.f32.mrf.mxu2 }
  0xed   :  { %v2171_v31 = vpack.c.bf16 %v1273_v25, %v1272_v24  ;;  %v903_v32 = vadd.f32 %v2752_v61, %v902_v28  ;;  %v1161_v33 = vpop.f32.mrf.mxu3  ;;  %v2063_v24 = vld [vmem:[%s3395_s0 + $0xf4] sm:$0xf0]  ;;  %v1890_v25 = vld [vmem:[%s3395_s0 + $0x280] sm:$0xf]  ;;  %v1692_v28 = vld [vmem:[%s3395_s0 + $0xf8] sm:$0xf0] }
  0xee   :  { %v780_v35 = vpop.f32.mrf.mxu0 }
  0xef   :  { %2401 = vst [vmem:[%s3396_s3 + $0x20] sm:$0xff] %v2171_v31   ;;  %v1162_v38 = vadd.f32 %v1161_v33, %v903_v32  ;;  %v1039_v39 = vpop.f32.mrf.mxu1  ;;  %v781_v43 = vadd.f32 %v2752_v61, %v780_v35  ;;  %v2112_v31 = vld [vmem:[%s3395_s0 + $0x284] sm:$0xf]  ;;  %v1892_v32 = vld [vmem:[%s3395_s0 + $0x288] sm:$0xf0] }
  0xf1   :  { %v1323_v41 = vmax.f32 %v1162_v38, 0.0  ;;  %819 = vmatmul.bf16.gmra.mxu0 %v1675_v29  ;;  %944 = vmatmul.bf16.gmra.mxu2 %v1875_v34  ;;  %v1040_v47 = vadd.f32 %v1039_v39, %v781_v43  ;;  %v1691_v34 = vor.u32 %v2063_v24, %v1690_v23  ;;  %v1891_v39 = vor.u32 %v2113_v26, %v1890_v25 }
  0xf2   :  { %1078 = vmatmul.bf16.gmra.mxu1 %v1679_v36  ;;  %1203 = vmatmul.bf16.gmra.mxu3 %v1879_v37 }
  0xf3   :  { %v2296_v42 = vpack.c.bf16 %v1323_v41, %v1322_v40  ;;  %v1274_v58 = vmax.f32 %v1040_v47, 0.0  ;;  %v1695_v41 = vor.u32 %v2062_v27, %v1692_v28  ;;  %v1706_v28 = vld [vmem:[%s3395_s0 + $0x110] sm:$0xf] }
  0xf4   :  { %v905_v44 = vpop.f32.mrf.mxu2 }
  0xf5   :  { %2426 = vst [vmem:[%s3396_s3 + $0xe8] sm:$0xff] %v2296_v42   ;;  %v1164_v45 = vpop.f32.mrf.mxu3  ;;  %v906_v50 = vadd.f32 %v2752_v61, %v905_v44  ;;  %v1895_v42 = vor.u32 %v2112_v31, %v1892_v32  ;;  %v2117_v31 = vld [vmem:[%s3395_s0 + $0x2a4] sm:$0xf0]  ;;  %v2066_v32 = vld [vmem:[%s3395_s0 + $0x114] sm:$0xf] }
  0xf6   :  { %v782_v46 = vpop.f32.mrf.mxu0 }
  0xf7   :  { %v783_v48 = vadd.f32 %v2752_v61, %v782_v46  ;;  %v1041_v49 = vpop.f32.mrf.mxu1  ;;  %v1165_v1 = vadd.f32 %v1164_v45, %v906_v50 }
  0xf9   :  { %v1042_v51 = vadd.f32 %v1041_v49, %v783_v48  ;;  %v1324_v11 = vmax.f32 %v1165_v1, 0.0 }
  0xfb   :  { %v1275_v59 = vmax.f32 %v1042_v51, 0.0 }
  0xfc   :  { %v907_v63 = vpop.f32.mrf.mxu2 }
  0xfd   :  { %v2176_v2 = vpack.c.bf16 %v1275_v59, %v1274_v58  ;;  %v908_v3 = vadd.f32 %v2752_v61, %v907_v63  ;;  %v1166_v4 = vpop.f32.mrf.mxu3  ;;  %v2065_v58 = vld [vmem:[%s3395_s0 + $0x104] sm:$0xf0]  ;;  %v1898_v59 = vld [vmem:[%s3395_s0 + $0x290] sm:$0xf]  ;;  %v1700_v63 = vld [vmem:[%s3395_s0 + $0x108] sm:$0xf0] }
  0xfe   :  { %v785_v6 = vpop.f32.mrf.mxu0 }
  0xff   :  { %2402 = vst [vmem:[%s3396_s3 + $0x28] sm:$0xff] %v2176_v2   ;;  %v1167_v9 = vadd.f32 %v1166_v4, %v908_v3  ;;  %v1044_v10 = vpop.f32.mrf.mxu1  ;;  %v786_v14 = vadd.f32 %v2752_v61, %v785_v6  ;;  %v2114_v2 = vld [vmem:[%s3395_s0 + $0x294] sm:$0xf]  ;;  %v1900_v3 = vld [vmem:[%s3395_s0 + $0x298] sm:$0xf0] }
 0x101   :  { %v1325_v12 = vmax.f32 %v1167_v9, 0.0  ;;  %824 = vmatmul.bf16.gmra.mxu0 %v1683_v0  ;;  %949 = vmatmul.bf16.gmra.mxu2 %v1883_v5  ;;  %v1045_v18 = vadd.f32 %v1044_v10, %v786_v14  ;;  %v1699_v5 = vor.u32 %v2065_v58, %v1698_v57  ;;  %v1899_v10 = vor.u32 %v2115_v60, %v1898_v59 }
 0x102   :  { %1083 = vmatmul.bf16.gmra.mxu1 %v1687_v7  ;;  %1208 = vmatmul.bf16.gmra.mxu3 %v1887_v8 }
 0x103   :  { %v2301_v13 = vpack.c.bf16 %v1325_v12, %v1324_v11  ;;  %v1276_v29 = vmax.f32 %v1045_v18, 0.0  ;;  %v1703_v12 = vor.u32 %v2064_v62, %v1700_v63  ;;  %v1714_v63 = vld [vmem:[%s3395_s0 + $0x120] sm:$0xf] }
 0x104   :  { %v910_v15 = vpop.f32.mrf.mxu2 }
 0x105   :  { %2427 = vst [vmem:[%s3396_s3 + $0xf0] sm:$0xff] %v2301_v13   ;;  %v1169_v16 = vpop.f32.mrf.mxu3  ;;  %v911_v21 = vadd.f32 %v2752_v61, %v910_v15  ;;  %v1903_v13 = vor.u32 %v2114_v2, %v1900_v3  ;;  %v2119_v2 = vld [vmem:[%s3395_s0 + $0x2b4] sm:$0xf0]  ;;  %v2068_v3 = vld [vmem:[%s3395_s0 + $0x124] sm:$0xf] }
 0x106   :  { %v787_v17 = vpop.f32.mrf.mxu0 }
 0x107   :  { %v788_v19 = vadd.f32 %v2752_v61, %v787_v17  ;;  %v1046_v20 = vpop.f32.mrf.mxu1  ;;  %v1170_v35 = vadd.f32 %v1169_v16, %v911_v21 }
 0x109   :  { %v1047_v22 = vadd.f32 %v1046_v20, %v788_v19  ;;  %v1326_v45 = vmax.f32 %v1170_v35, 0.0 }
 0x10b   :  { %v1277_v30 = vmax.f32 %v1047_v22, 0.0 }
 0x10c   :  { %v912_v33 = vpop.f32.mrf.mxu2 }
 0x10d   :  { %v2181_v36 = vpack.c.bf16 %v1277_v30, %v1276_v29  ;;  %v913_v37 = vadd.f32 %v2752_v61, %v912_v33  ;;  %v1171_v38 = vpop.f32.mrf.mxu3  ;;  %v2067_v29 = vld [vmem:[%s3395_s0 + $0x114] sm:$0xf0]  ;;  %v1906_v30 = vld [vmem:[%s3395_s0 + $0x2a0] sm:$0xf]  ;;  %v1708_v33 = vld [vmem:[%s3395_s0 + $0x118] sm:$0xf0] }
 0x10e   :  { %v790_v40 = vpop.f32.mrf.mxu0 }
 0x10f   :  { %2403 = vst [vmem:[%s3396_s3 + $0x30] sm:$0xff] %v2181_v36   ;;  %v1172_v43 = vadd.f32 %v1171_v38, %v913_v37  ;;  %v1049_v44 = vpop.f32.mrf.mxu1  ;;  %v791_v48 = vadd.f32 %v2752_v61, %v790_v40  ;;  %v2116_v36 = vld [vmem:[%s3395_s0 + $0x2a4] sm:$0xf]  ;;  %v1908_v37 = vld [vmem:[%s3395_s0 + $0x2a8] sm:$0xf0] }
 0x111   :  { %v1327_v46 = vmax.f32 %v1172_v43, 0.0  ;;  %829 = vmatmul.bf16.gmra.mxu0 %v1691_v34  ;;  %954 = vmatmul.bf16.gmra.mxu2 %v1891_v39  ;;  %v1050_v52 = vadd.f32 %v1049_v44, %v791_v48  ;;  %v1707_v39 = vor.u32 %v2067_v29, %v1706_v28  ;;  %v1907_v44 = vor.u32 %v2117_v31, %v1906_v30 }
 0x112   :  { %1088 = vmatmul.bf16.gmra.mxu1 %v1695_v41  ;;  %1213 = vmatmul.bf16.gmra.mxu3 %v1895_v42 }
 0x113   :  { %v2306_v47 = vpack.c.bf16 %v1327_v46, %v1326_v45  ;;  %v1278_v0 = vmax.f32 %v1050_v52, 0.0  ;;  %v1711_v46 = vor.u32 %v2066_v32, %v1708_v33  ;;  %v1722_v33 = vld [vmem:[%s3395_s0 + $0x130] sm:$0xf] }
 0x114   :  { %v915_v49 = vpop.f32.mrf.mxu2 }
 0x115   :  { %2428 = vst [vmem:[%s3396_s3 + $0xf8] sm:$0xff] %v2306_v47   ;;  %v1174_v50 = vpop.f32.mrf.mxu3  ;;  %v916_v55 = vadd.f32 %v2752_v61, %v915_v49  ;;  %v1911_v47 = vor.u32 %v2116_v36, %v1908_v37  ;;  %v2121_v36 = vld [vmem:[%s3395_s0 + $0x2c4] sm:$0xf0]  ;;  %v2070_v37 = vld [vmem:[%s3395_s0 + $0x134] sm:$0xf] }
 0x116   :  { %v792_v51 = vpop.f32.mrf.mxu0 }
 0x117   :  { %v793_v53 = vadd.f32 %v2752_v61, %v792_v51  ;;  %v1051_v54 = vpop.f32.mrf.mxu1  ;;  %v1175_v6 = vadd.f32 %v1174_v50, %v916_v55 }
 0x119   :  { %v1052_v56 = vadd.f32 %v1051_v54, %v793_v53  ;;  %v1328_v16 = vmax.f32 %v1175_v6, 0.0 }
 0x11b   :  { %v1279_v1 = vmax.f32 %v1052_v56, 0.0 }
 0x11c   :  { %v917_v4 = vpop.f32.mrf.mxu2 }
 0x11d   :  { %v2186_v7 = vpack.c.bf16 %v1279_v1, %v1278_v0  ;;  %v918_v8 = vadd.f32 %v2752_v61, %v917_v4  ;;  %v1176_v9 = vpop.f32.mrf.mxu3  ;;  %v2069_v0 = vld [vmem:[%s3395_s0 + $0x124] sm:$0xf0]  ;;  %v1914_v1 = vld [vmem:[%s3395_s0 + $0x2b0] sm:$0xf]  ;;  %v1716_v4 = vld [vmem:[%s3395_s0 + $0x128] sm:$0xf0] }
 0x11e   :  { %v795_v11 = vpop.f32.mrf.mxu0 }
 0x11f   :  { %2404 = vst [vmem:[%s3396_s3 + $0x38] sm:$0xff] %v2186_v7   ;;  %v1177_v14 = vadd.f32 %v1176_v9, %v918_v8  ;;  %v1054_v15 = vpop.f32.mrf.mxu1  ;;  %v796_v19 = vadd.f32 %v2752_v61, %v795_v11  ;;  %v2118_v7 = vld [vmem:[%s3395_s0 + $0x2b4] sm:$0xf]  ;;  %v1916_v8 = vld [vmem:[%s3395_s0 + $0x2b8] sm:$0xf0] }
 0x121   :  { %v1329_v17 = vmax.f32 %v1177_v14, 0.0  ;;  %834 = vmatmul.bf16.gmra.mxu0 %v1699_v5  ;;  %959 = vmatmul.bf16.gmra.mxu2 %v1899_v10  ;;  %v1055_v23 = vadd.f32 %v1054_v15, %v796_v19  ;;  %v1715_v10 = vor.u32 %v2069_v0, %v1714_v63  ;;  %v1915_v15 = vor.u32 %v2119_v2, %v1914_v1 }
 0x122   :  { %1093 = vmatmul.bf16.gmra.mxu1 %v1703_v12  ;;  %1218 = vmatmul.bf16.gmra.mxu3 %v1903_v13 }
 0x123   :  { %v2311_v18 = vpack.c.bf16 %v1329_v17, %v1328_v16  ;;  %v1280_v34 = vmax.f32 %v1055_v23, 0.0  ;;  %v1719_v17 = vor.u32 %v2068_v3, %v1716_v4  ;;  %v1730_v4 = vld [vmem:[%s3395_s0 + $0x140] sm:$0xf] }
 0x124   :  { %v920_v20 = vpop.f32.mrf.mxu2 }
 0x125   :  { %2429 = vst [vmem:[%s3396_s3 + $0x100] sm:$0xff] %v2311_v18   ;;  %v1179_v21 = vpop.f32.mrf.mxu3  ;;  %v921_v26 = vadd.f32 %v2752_v61, %v920_v20  ;;  %v1919_v18 = vor.u32 %v2118_v7, %v1916_v8  ;;  %v2123_v7 = vld [vmem:[%s3395_s0 + $0x2d4] sm:$0xf0]  ;;  %v2072_v8 = vld [vmem:[%s3395_s0 + $0x144] sm:$0xf] }
 0x126   :  { %v797_v22 = vpop.f32.mrf.mxu0 }
 0x127   :  { %v798_v24 = vadd.f32 %v2752_v61, %v797_v22  ;;  %v1056_v25 = vpop.f32.mrf.mxu1  ;;  %v1180_v40 = vadd.f32 %v1179_v21, %v921_v26 }
 0x129   :  { %v1057_v27 = vadd.f32 %v1056_v25, %v798_v24  ;;  %v1330_v50 = vmax.f32 %v1180_v40, 0.0 }
 0x12b   :  { %v1281_v35 = vmax.f32 %v1057_v27, 0.0 }
 0x12c   :  { %v922_v38 = vpop.f32.mrf.mxu2 }
 0x12d   :  { %v2191_v41 = vpack.c.bf16 %v1281_v35, %v1280_v34  ;;  %v923_v42 = vadd.f32 %v2752_v61, %v922_v38  ;;  %v1181_v43 = vpop.f32.mrf.mxu3  ;;  %v2071_v34 = vld [vmem:[%s3395_s0 + $0x134] sm:$0xf0]  ;;  %v1922_v35 = vld [vmem:[%s3395_s0 + $0x2c0] sm:$0xf]  ;;  %v1724_v38 = vld [vmem:[%s3395_s0 + $0x138] sm:$0xf0] }
 0x12e   :  { %v800_v45 = vpop.f32.mrf.mxu0 }
 0x12f   :  { %2405 = vst [vmem:[%s3396_s3 + $0x40] sm:$0xff] %v2191_v41   ;;  %v1182_v48 = vadd.f32 %v1181_v43, %v923_v42  ;;  %v1059_v49 = vpop.f32.mrf.mxu1  ;;  %v801_v53 = vadd.f32 %v2752_v61, %v800_v45  ;;  %v2120_v41 = vld [vmem:[%s3395_s0 + $0x2c4] sm:$0xf]  ;;  %v1924_v42 = vld [vmem:[%s3395_s0 + $0x2c8] sm:$0xf0] }
 0x131   :  { %v1331_v51 = vmax.f32 %v1182_v48, 0.0  ;;  %839 = vmatmul.bf16.gmra.mxu0 %v1707_v39  ;;  %964 = vmatmul.bf16.gmra.mxu2 %v1907_v44  ;;  %v1060_v57 = vadd.f32 %v1059_v49, %v801_v53  ;;  %v1723_v44 = vor.u32 %v2071_v34, %v1722_v33  ;;  %v1923_v49 = vor.u32 %v2121_v36, %v1922_v35 }
 0x132   :  { %1098 = vmatmul.bf16.gmra.mxu1 %v1711_v46  ;;  %1223 = vmatmul.bf16.gmra.mxu3 %v1911_v47 }
 0x133   :  { %v2316_v52 = vpack.c.bf16 %v1331_v51, %v1330_v50  ;;  %v1282_v5 = vmax.f32 %v1060_v57, 0.0  ;;  %v1727_v51 = vor.u32 %v2070_v37, %v1724_v38  ;;  %v1738_v38 = vld [vmem:[%s3395_s0 + $0x150] sm:$0xf] }
 0x134   :  { %v925_v54 = vpop.f32.mrf.mxu2 }
 0x135   :  { %2430 = vst [vmem:[%s3396_s3 + $0x108] sm:$0xff] %v2316_v52   ;;  %v1184_v55 = vpop.f32.mrf.mxu3  ;;  %v926_v60 = vadd.f32 %v2752_v61, %v925_v54  ;;  %v1927_v52 = vor.u32 %v2120_v41, %v1924_v42  ;;  %v2125_v41 = vld [vmem:[%s3395_s0 + $0x2e4] sm:$0xf0]  ;;  %v2074_v42 = vld [vmem:[%s3395_s0 + $0x154] sm:$0xf] }
 0x136   :  { %v802_v56 = vpop.f32.mrf.mxu0 }
 0x137   :  { %v803_v58 = vadd.f32 %v2752_v61, %v802_v56  ;;  %v1061_v59 = vpop.f32.mrf.mxu1  ;;  %v1185_v11 = vadd.f32 %v1184_v55, %v926_v60 }
 0x139   :  { %v1062_v62 = vadd.f32 %v1061_v59, %v803_v58  ;;  %v1332_v21 = vmax.f32 %v1185_v11, 0.0 }
 0x13b   :  { %v1283_v6 = vmax.f32 %v1062_v62, 0.0 }
 0x13c   :  { %v927_v9 = vpop.f32.mrf.mxu2 }
 0x13d   :  { %v2196_v12 = vpack.c.bf16 %v1283_v6, %v1282_v5  ;;  %v928_v13 = vadd.f32 %v2752_v61, %v927_v9  ;;  %v1186_v14 = vpop.f32.mrf.mxu3  ;;  %v2073_v5 = vld [vmem:[%s3395_s0 + $0x144] sm:$0xf0]  ;;  %v1930_v6 = vld [vmem:[%s3395_s0 + $0x2d0] sm:$0xf]  ;;  %v1732_v9 = vld [vmem:[%s3395_s0 + $0x148] sm:$0xf0] }
 0x13e   :  { %v805_v16 = vpop.f32.mrf.mxu0 }
 0x13f   :  { %2406 = vst [vmem:[%s3396_s3 + $0x48] sm:$0xff] %v2196_v12   ;;  %v1187_v19 = vadd.f32 %v1186_v14, %v928_v13  ;;  %v1064_v20 = vpop.f32.mrf.mxu1  ;;  %v806_v24 = vadd.f32 %v2752_v61, %v805_v16  ;;  %v2122_v12 = vld [vmem:[%s3395_s0 + $0x2d4] sm:$0xf]  ;;  %v1932_v13 = vld [vmem:[%s3395_s0 + $0x2d8] sm:$0xf0] }
 0x141   :  { %v1333_v22 = vmax.f32 %v1187_v19, 0.0  ;;  %844 = vmatmul.bf16.gmra.mxu0 %v1715_v10  ;;  %969 = vmatmul.bf16.gmra.mxu2 %v1915_v15  ;;  %v1065_v28 = vadd.f32 %v1064_v20, %v806_v24  ;;  %v1731_v15 = vor.u32 %v2073_v5, %v1730_v4  ;;  %v1931_v20 = vor.u32 %v2123_v7, %v1930_v6 }
 0x142   :  { %1103 = vmatmul.bf16.gmra.mxu1 %v1719_v17  ;;  %1228 = vmatmul.bf16.gmra.mxu3 %v1919_v18 }
 0x143   :  { %v2321_v23 = vpack.c.bf16 %v1333_v22, %v1332_v21  ;;  %v1284_v39 = vmax.f32 %v1065_v28, 0.0  ;;  %v1735_v22 = vor.u32 %v2072_v8, %v1732_v9  ;;  %v1746_v9 = vld [vmem:[%s3395_s0 + $0x160] sm:$0xf] }
 0x144   :  { %v930_v25 = vpop.f32.mrf.mxu2 }
 0x145   :  { %2431 = vst [vmem:[%s3396_s3 + $0x110] sm:$0xff] %v2321_v23   ;;  %v1189_v26 = vpop.f32.mrf.mxu3  ;;  %v931_v31 = vadd.f32 %v2752_v61, %v930_v25  ;;  %v1935_v23 = vor.u32 %v2122_v12, %v1932_v13  ;;  %v2127_v12 = vld [vmem:[%s3395_s0 + $0x2f4] sm:$0xf0]  ;;  %v2076_v13 = vld [vmem:[%s3395_s0 + $0x164] sm:$0xf] }
 0x146   :  { %v807_v27 = vpop.f32.mrf.mxu0 }
 0x147   :  { %v808_v29 = vadd.f32 %v2752_v61, %v807_v27  ;;  %v1066_v30 = vpop.f32.mrf.mxu1  ;;  %v1190_v45 = vadd.f32 %v1189_v26, %v931_v31 }
 0x149   :  { %v1067_v32 = vadd.f32 %v1066_v30, %v808_v29  ;;  %v1334_v55 = vmax.f32 %v1190_v45, 0.0 }
 0x14b   :  { %v1285_v40 = vmax.f32 %v1067_v32, 0.0 }
 0x14c   :  { %v932_v43 = vpop.f32.mrf.mxu2 }
 0x14d   :  { %v2201_v46 = vpack.c.bf16 %v1285_v40, %v1284_v39  ;;  %v933_v47 = vadd.f32 %v2752_v61, %v932_v43  ;;  %v1191_v48 = vpop.f32.mrf.mxu3  ;;  %v2075_v39 = vld [vmem:[%s3395_s0 + $0x154] sm:$0xf0]  ;;  %v1938_v40 = vld [vmem:[%s3395_s0 + $0x2e0] sm:$0xf]  ;;  %v1740_v43 = vld [vmem:[%s3395_s0 + $0x158] sm:$0xf0] }
 0x14e   :  { %v810_v50 = vpop.f32.mrf.mxu0 }
 0x14f   :  { %2407 = vst [vmem:[%s3396_s3 + $0x50] sm:$0xff] %v2201_v46   ;;  %v1192_v53 = vadd.f32 %v1191_v48, %v933_v47  ;;  %v1069_v54 = vpop.f32.mrf.mxu1  ;;  %v811_v58 = vadd.f32 %v2752_v61, %v810_v50  ;;  %v2124_v46 = vld [vmem:[%s3395_s0 + $0x2e4] sm:$0xf]  ;;  %v1940_v47 = vld [vmem:[%s3395_s0 + $0x2e8] sm:$0xf0] }
 0x151   :  { %v1335_v56 = vmax.f32 %v1192_v53, 0.0  ;;  %849 = vmatmul.bf16.gmra.mxu0 %v1723_v44  ;;  %974 = vmatmul.bf16.gmra.mxu2 %v1923_v49  ;;  %v1070_v63 = vadd.f32 %v1069_v54, %v811_v58  ;;  %v1739_v49 = vor.u32 %v2075_v39, %v1738_v38  ;;  %v1939_v54 = vor.u32 %v2125_v41, %v1938_v40 }
 0x152   :  { %1108 = vmatmul.bf16.gmra.mxu1 %v1727_v51  ;;  %1233 = vmatmul.bf16.gmra.mxu3 %v1927_v52 }
 0x153   :  { %v2326_v57 = vpack.c.bf16 %v1335_v56, %v1334_v55  ;;  %v1286_v10 = vmax.f32 %v1070_v63, 0.0  ;;  %v1743_v56 = vor.u32 %v2074_v42, %v1740_v43  ;;  %v1754_v43 = vld [vmem:[%s3395_s0 + $0x170] sm:$0xf] }
 0x154   :  { %v935_v59 = vpop.f32.mrf.mxu2 }
 0x155   :  { %2432 = vst [vmem:[%s3396_s3 + $0x118] sm:$0xff] %v2326_v57   ;;  %v1194_v60 = vpop.f32.mrf.mxu3  ;;  %v936_v2 = vadd.f32 %v2752_v61, %v935_v59  ;;  %v1943_v57 = vor.u32 %v2124_v46, %v1940_v47  ;;  %v2129_v46 = vld [vmem:[%s3395_s0 + $0x304] sm:$0xf0]  ;;  %v2078_v47 = vld [vmem:[%s3395_s0 + $0x174] sm:$0xf] }
 0x156   :  { %v812_v62 = vpop.f32.mrf.mxu0 }
 0x157   :  { %v813_v0 = vadd.f32 %v2752_v61, %v812_v62  ;;  %v1071_v1 = vpop.f32.mrf.mxu1  ;;  %v1195_v16 = vadd.f32 %v1194_v60, %v936_v2 }
 0x159   :  { %v1072_v3 = vadd.f32 %v1071_v1, %v813_v0  ;;  %v1336_v26 = vmax.f32 %v1195_v16, 0.0 }
 0x15b   :  { %v1287_v11 = vmax.f32 %v1072_v3, 0.0 }
 0x15c   :  { %v937_v14 = vpop.f32.mrf.mxu2 }
 0x15d   :  { %v2206_v17 = vpack.c.bf16 %v1287_v11, %v1286_v10  ;;  %v938_v18 = vadd.f32 %v2752_v61, %v937_v14  ;;  %v1196_v19 = vpop.f32.mrf.mxu3  ;;  %v2077_v10 = vld [vmem:[%s3395_s0 + $0x164] sm:$0xf0]  ;;  %v1946_v11 = vld [vmem:[%s3395_s0 + $0x2f0] sm:$0xf]  ;;  %v1748_v14 = vld [vmem:[%s3395_s0 + $0x168] sm:$0xf0] }
 0x15e   :  { %v815_v21 = vpop.f32.mrf.mxu0 }
 0x15f   :  { %2408 = vst [vmem:[%s3396_s3 + $0x58] sm:$0xff] %v2206_v17   ;;  %v1197_v24 = vadd.f32 %v1196_v19, %v938_v18  ;;  %v1074_v25 = vpop.f32.mrf.mxu1  ;;  %v816_v29 = vadd.f32 %v2752_v61, %v815_v21  ;;  %v2126_v17 = vld [vmem:[%s3395_s0 + $0x2f4] sm:$0xf]  ;;  %v1948_v18 = vld [vmem:[%s3395_s0 + $0x2f8] sm:$0xf0] }
 0x161   :  { %v1337_v27 = vmax.f32 %v1197_v24, 0.0  ;;  %854 = vmatmul.bf16.gmra.mxu0 %v1731_v15  ;;  %979 = vmatmul.bf16.gmra.mxu2 %v1931_v20  ;;  %v1075_v33 = vadd.f32 %v1074_v25, %v816_v29  ;;  %v1747_v20 = vor.u32 %v2077_v10, %v1746_v9  ;;  %v1947_v25 = vor.u32 %v2127_v12, %v1946_v11 }
 0x162   :  { %1113 = vmatmul.bf16.gmra.mxu1 %v1735_v22  ;;  %1238 = vmatmul.bf16.gmra.mxu3 %v1935_v23 }
 0x163   :  { %v2331_v28 = vpack.c.bf16 %v1337_v27, %v1336_v26  ;;  %v1288_v44 = vmax.f32 %v1075_v33, 0.0  ;;  %v1751_v27 = vor.u32 %v2076_v13, %v1748_v14  ;;  %v1762_v14 = vld [vmem:[%s3395_s0 + $0x180] sm:$0xf] }
 0x164   :  { %v940_v30 = vpop.f32.mrf.mxu2 }
 0x165   :  { %2433 = vst [vmem:[%s3396_s3 + $0x120] sm:$0xff] %v2331_v28   ;;  %v1199_v31 = vpop.f32.mrf.mxu3  ;;  %v941_v36 = vadd.f32 %v2752_v61, %v940_v30  ;;  %v1951_v28 = vor.u32 %v2126_v17, %v1948_v18  ;;  %v2131_v17 = vld [vmem:[%s3395_s0 + $0x314] sm:$0xf0]  ;;  %v2080_v18 = vld [vmem:[%s3395_s0 + $0x184] sm:$0xf] }
 0x166   :  { %v817_v32 = vpop.f32.mrf.mxu0 }
 0x167   :  { %v818_v34 = vadd.f32 %v2752_v61, %v817_v32  ;;  %v1076_v35 = vpop.f32.mrf.mxu1  ;;  %v1200_v50 = vadd.f32 %v1199_v31, %v941_v36 }
 0x169   :  { %v1077_v37 = vadd.f32 %v1076_v35, %v818_v34  ;;  %v1338_v60 = vmax.f32 %v1200_v50, 0.0 }
 0x16b   :  { %v1289_v45 = vmax.f32 %v1077_v37, 0.0 }
 0x16c   :  { %v942_v48 = vpop.f32.mrf.mxu2 }
 0x16d   :  { %v2211_v51 = vpack.c.bf16 %v1289_v45, %v1288_v44  ;;  %v943_v52 = vadd.f32 %v2752_v61, %v942_v48  ;;  %v1201_v53 = vpop.f32.mrf.mxu3  ;;  %v3196_v61 = vld [vmem:[%s3394_s2] ss:$0 sm:$0xff]  ;;  %v2079_v44 = vld [vmem:[%s3395_s0 + $0x174] sm:$0xf0]  ;;  %v1756_v48 = vld [vmem:[%s3395_s0 + $0x178] sm:$0xf0] }
 0x16e   :  { %v820_v55 = vpop.f32.mrf.mxu0  ;;  %v1954_v45 = vld [vmem:[%s3395_s0 + $0x300] sm:$0xf] }
 0x16f   :  { %2409 = vst [vmem:[%s3396_s3 + $0x60] sm:$0xff] %v2211_v51   ;;  %v1202_v58 = vadd.f32 %v1201_v53, %v943_v52  ;;  %v1079_v59 = vpop.f32.mrf.mxu1  ;;  %v821_v0 = vadd.f32 %v3196_v61, %v820_v55  ;;  %v2128_v51 = vld [vmem:[%s3395_s0 + $0x304] sm:$0xf]  ;;  %v1956_v52 = vld [vmem:[%s3395_s0 + $0x308] sm:$0xf0] }
 0x171   :  { %v1339_v62 = vmax.f32 %v1202_v58, 0.0  ;;  %859 = vmatmul.bf16.gmra.mxu0 %v1739_v49  ;;  %984 = vmatmul.bf16.gmra.mxu2 %v1939_v54  ;;  %v1080_v4 = vadd.f32 %v1079_v59, %v821_v0  ;;  %v1755_v54 = vor.u32 %v2079_v44, %v1754_v43  ;;  %v1955_v59 = vor.u32 %v2129_v46, %v1954_v45 }
 0x172   :  { %1118 = vmatmul.bf16.gmra.mxu1 %v1743_v56  ;;  %1243 = vmatmul.bf16.gmra.mxu3 %v1943_v57 }
 0x173   :  { %v2336_v63 = vpack.c.bf16 %v1339_v62, %v1338_v60  ;;  %v1290_v15 = vmax.f32 %v1080_v4, 0.0  ;;  %v1759_v62 = vor.u32 %v2078_v47, %v1756_v48 }
 0x174   :  { %v945_v1 = vpop.f32.mrf.mxu2 }
 0x175   :  { %2434 = vst [vmem:[%s3396_s3 + $0x128] sm:$0xff] %v2336_v63   ;;  %v1204_v2 = vpop.f32.mrf.mxu3  ;;  %v946_v7 = vadd.f32 %v3196_v61, %v945_v1  ;;  %v1959_v63 = vor.u32 %v2128_v51, %v1956_v52 }
 0x176   :  { %v822_v3 = vpop.f32.mrf.mxu0 }
 0x177   :  { %v823_v5 = vadd.f32 %v3196_v61, %v822_v3  ;;  %v1081_v6 = vpop.f32.mrf.mxu1  ;;  %v1205_v21 = vadd.f32 %v1204_v2, %v946_v7 }
 0x179   :  { %v1082_v8 = vadd.f32 %v1081_v6, %v823_v5  ;;  %v1340_v31 = vmax.f32 %v1205_v21, 0.0 }
 0x17b   :  { %v1291_v16 = vmax.f32 %v1082_v8, 0.0 }
 0x17c   :  { %v947_v19 = vpop.f32.mrf.mxu2 }
 0x17d   :  { %v2216_v22 = vpack.c.bf16 %v1291_v16, %v1290_v15  ;;  %v948_v23 = vadd.f32 %v3196_v61, %v947_v19  ;;  %v1206_v24 = vpop.f32.mrf.mxu3  ;;  %v2081_v15 = vld [vmem:[%s3395_s0 + $0x184] sm:$0xf0]  ;;  %v1962_v16 = vld [vmem:[%s3395_s0 + $0x310] sm:$0xf]  ;;  %v1764_v19 = vld [vmem:[%s3395_s0 + $0x188] sm:$0xf0] }
 0x17e   :  { %v825_v26 = vpop.f32.mrf.mxu0 }
 0x17f   :  { %2410 = vst [vmem:[%s3396_s3 + $0x68] sm:$0xff] %v2216_v22   ;;  %v1207_v29 = vadd.f32 %v1206_v24, %v948_v23  ;;  %v1084_v30 = vpop.f32.mrf.mxu1  ;;  %v826_v34 = vadd.f32 %v3196_v61, %v825_v26  ;;  %v2130_v22 = vld [vmem:[%s3395_s0 + $0x314] sm:$0xf]  ;;  %v1964_v23 = vld [vmem:[%s3395_s0 + $0x318] sm:$0xf0] }
 0x181   :  { %v1341_v32 = vmax.f32 %v1207_v29, 0.0  ;;  %864 = vmatmul.bf16.gmra.mxu0 %v1747_v20  ;;  %989 = vmatmul.bf16.gmra.mxu2 %v1947_v25  ;;  %v1085_v38 = vadd.f32 %v1084_v30, %v826_v34  ;;  %v1763_v25 = vor.u32 %v2081_v15, %v1762_v14  ;;  %v1963_v30 = vor.u32 %v2131_v17, %v1962_v16 }
 0x182   :  { %1123 = vmatmul.bf16.gmra.mxu1 %v1751_v27  ;;  %1248 = vmatmul.bf16.gmra.mxu3 %v1951_v28 }
 0x183   :  { %v2341_v33 = vpack.c.bf16 %v1341_v32, %v1340_v31  ;;  %v1292_v49 = vmax.f32 %v1085_v38, 0.0  ;;  %v1767_v32 = vor.u32 %v2080_v18, %v1764_v19 }
 0x184   :  { %v950_v35 = vpop.f32.mrf.mxu2 }
 0x185   :  { %2435 = vst [vmem:[%s3396_s3 + $0x130] sm:$0xff] %v2341_v33   ;;  %v1209_v36 = vpop.f32.mrf.mxu3  ;;  %v951_v41 = vadd.f32 %v3196_v61, %v950_v35  ;;  %v1967_v33 = vor.u32 %v2130_v22, %v1964_v23 }
 0x186   :  { %v827_v37 = vpop.f32.mrf.mxu0 }
 0x187   :  { %v828_v39 = vadd.f32 %v3196_v61, %v827_v37  ;;  %v1086_v40 = vpop.f32.mrf.mxu1  ;;  %v1210_v55 = vadd.f32 %v1209_v36, %v951_v41 }
 0x189   :  { %v1087_v42 = vadd.f32 %v1086_v40, %v828_v39  ;;  %v1342_v2 = vmax.f32 %v1210_v55, 0.0 }
 0x18b   :  { %v1293_v50 = vmax.f32 %v1087_v42, 0.0 }
 0x18c   :  { %v952_v53 = vpop.f32.mrf.mxu2 }
 0x18d   :  { %v2221_v56 = vpack.c.bf16 %v1293_v50, %v1292_v49  ;;  %v953_v57 = vadd.f32 %v3196_v61, %v952_v53  ;;  %v1211_v58 = vpop.f32.mrf.mxu3 }
 0x18e   :  { %v830_v60 = vpop.f32.mrf.mxu0 }
 0x18f   :  { %2411 = vst [vmem:[%s3396_s3 + $0x70] sm:$0xff] %v2221_v56   ;;  %v1212_v0 = vadd.f32 %v1211_v58, %v953_v57  ;;  %v1089_v1 = vpop.f32.mrf.mxu1  ;;  %v831_v5 = vadd.f32 %v3196_v61, %v830_v60 }
 0x191   :  { %v1343_v3 = vmax.f32 %v1212_v0, 0.0  ;;  %869 = vmatmul.bf16.gmra.mxu0 %v1755_v54  ;;  %994 = vmatmul.bf16.gmra.mxu2 %v1955_v59  ;;  %v1090_v9 = vadd.f32 %v1089_v1, %v831_v5 }
 0x192   :  { %1128 = vmatmul.bf16.gmra.mxu1 %v1759_v62  ;;  %1253 = vmatmul.bf16.gmra.mxu3 %v1959_v63 }
 0x193   :  { %v2346_v4 = vpack.c.bf16 %v1343_v3, %v1342_v2  ;;  %v1294_v20 = vmax.f32 %v1090_v9, 0.0 }
 0x194   :  { %v955_v6 = vpop.f32.mrf.mxu2 }
 0x195   :  { %2436 = vst [vmem:[%s3396_s3 + $0x138] sm:$0xff] %v2346_v4   ;;  %v1214_v7 = vpop.f32.mrf.mxu3  ;;  %v956_v12 = vadd.f32 %v3196_v61, %v955_v6 }
 0x196   :  { %v832_v8 = vpop.f32.mrf.mxu0 }
 0x197   :  { %v833_v10 = vadd.f32 %v3196_v61, %v832_v8  ;;  %v1091_v11 = vpop.f32.mrf.mxu1  ;;  %v1215_v26 = vadd.f32 %v1214_v7, %v956_v12 }
 0x199   :  { %v1092_v13 = vadd.f32 %v1091_v11, %v833_v10  ;;  %v1344_v36 = vmax.f32 %v1215_v26, 0.0 }
 0x19b   :  { %v1295_v21 = vmax.f32 %v1092_v13, 0.0 }
 0x19c   :  { %v957_v24 = vpop.f32.mrf.mxu2 }
 0x19d   :  { %v2226_v27 = vpack.c.bf16 %v1295_v21, %v1294_v20  ;;  %v958_v28 = vadd.f32 %v3196_v61, %v957_v24  ;;  %v1216_v29 = vpop.f32.mrf.mxu3 }
 0x19e   :  { %v835_v31 = vpop.f32.mrf.mxu0 }
 0x19f   :  { %2412 = vst [vmem:[%s3396_s3 + $0x78] sm:$0xff] %v2226_v27   ;;  %v1217_v34 = vadd.f32 %v1216_v29, %v958_v28  ;;  %v1094_v35 = vpop.f32.mrf.mxu1  ;;  %v836_v39 = vadd.f32 %v3196_v61, %v835_v31 }
 0x1a1   :  { %v1345_v37 = vmax.f32 %v1217_v34, 0.0  ;;  %874 = vmatmul.bf16.gmra.mxu0 %v1763_v25  ;;  %999 = vmatmul.bf16.gmra.mxu2 %v1963_v30  ;;  %v1095_v43 = vadd.f32 %v1094_v35, %v836_v39 }
 0x1a2   :  { %1133 = vmatmul.bf16.gmra.mxu1 %v1767_v32  ;;  %1258 = vmatmul.bf16.gmra.mxu3 %v1967_v33 }
 0x1a3   :  { %v2351_v38 = vpack.c.bf16 %v1345_v37, %v1344_v36  ;;  %v1296_v48 = vmax.f32 %v1095_v43, 0.0 }
 0x1a4   :  { %v960_v40 = vpop.f32.mrf.mxu2 }
 0x1a5   :  { %2437 = vst [vmem:[%s3396_s3 + $0x140] sm:$0xff] %v2351_v38   ;;  %v1219_v41 = vpop.f32.mrf.mxu3  ;;  %v961_v46 = vadd.f32 %v3196_v61, %v960_v40 }
 0x1a6   :  { %v837_v42 = vpop.f32.mrf.mxu0 }
 0x1a7   :  { %v838_v44 = vadd.f32 %v3196_v61, %v837_v42  ;;  %v1096_v45 = vpop.f32.mrf.mxu1  ;;  %v1220_v51 = vadd.f32 %v1219_v41, %v961_v46 }
 0x1a9   :  { %v1097_v47 = vadd.f32 %v1096_v45, %v838_v44  ;;  %v1346_v58 = vmax.f32 %v1220_v51, 0.0 }
 0x1ab   :  { %v1297_v49 = vmax.f32 %v1097_v47, 0.0 }
 0x1ac   :  { %v962_v50 = vpop.f32.mrf.mxu2 }
 0x1ad   :  { %v2231_v52 = vpack.c.bf16 %v1297_v49, %v1296_v48  ;;  %v963_v53 = vadd.f32 %v3196_v61, %v962_v50  ;;  %v1221_v54 = vpop.f32.mrf.mxu3 }
 0x1ae   :  { %v840_v55 = vpop.f32.mrf.mxu0 }
 0x1af   :  { %2413 = vst [vmem:[%s3396_s3 + $0x80] sm:$0xff] %v2231_v52   ;;  %v1222_v56 = vadd.f32 %v1221_v54, %v963_v53  ;;  %v1099_v57 = vpop.f32.mrf.mxu1  ;;  %v841_v62 = vadd.f32 %v3196_v61, %v840_v55 }
 0x1b1   :  { %v1347_v59 = vmax.f32 %v1222_v56, 0.0  ;;  %v1100_v2 = vadd.f32 %v1099_v57, %v841_v62 }
 0x1b3   :  { %v2356_v60 = vpack.c.bf16 %v1347_v59, %v1346_v58  ;;  %v1298_v7 = vmax.f32 %v1100_v2, 0.0 }
 0x1b4   :  { %v965_v63 = vpop.f32.mrf.mxu2 }
 0x1b5   :  { %2438 = vst [vmem:[%s3396_s3 + $0x148] sm:$0xff] %v2356_v60   ;;  %v1224_v0 = vpop.f32.mrf.mxu3  ;;  %v966_v5 = vadd.f32 %v3196_v61, %v965_v63 }
 0x1b6   :  { %v842_v1 = vpop.f32.mrf.mxu0 }
 0x1b7   :  { %v843_v3 = vadd.f32 %v3196_v61, %v842_v1  ;;  %v1101_v4 = vpop.f32.mrf.mxu1  ;;  %v1225_v10 = vadd.f32 %v1224_v0, %v966_v5 }
 0x1b9   :  { %v1102_v6 = vadd.f32 %v1101_v4, %v843_v3  ;;  %v1348_v17 = vmax.f32 %v1225_v10, 0.0 }
 0x1bb   :  { %v1299_v8 = vmax.f32 %v1102_v6, 0.0 }
 0x1bc   :  { %v967_v9 = vpop.f32.mrf.mxu2 }
 0x1bd   :  { %v2236_v11 = vpack.c.bf16 %v1299_v8, %v1298_v7  ;;  %v968_v12 = vadd.f32 %v3196_v61, %v967_v9  ;;  %v1226_v13 = vpop.f32.mrf.mxu3 }
 0x1be   :  { %v845_v14 = vpop.f32.mrf.mxu0 }
 0x1bf   :  { %2414 = vst [vmem:[%s3396_s3 + $0x88] sm:$0xff] %v2236_v11   ;;  %v1227_v15 = vadd.f32 %v1226_v13, %v968_v12  ;;  %v1104_v16 = vpop.f32.mrf.mxu1  ;;  %v846_v20 = vadd.f32 %v3196_v61, %v845_v14 }
 0x1c1   :  { %v1349_v18 = vmax.f32 %v1227_v15, 0.0  ;;  %v1105_v24 = vadd.f32 %v1104_v16, %v846_v20 }
 0x1c3   :  { %v2361_v19 = vpack.c.bf16 %v1349_v18, %v1348_v17  ;;  %v1300_v29 = vmax.f32 %v1105_v24, 0.0 }
 0x1c4   :  { %v970_v21 = vpop.f32.mrf.mxu2 }
 0x1c5   :  { %2439 = vst [vmem:[%s3396_s3 + $0x150] sm:$0xff] %v2361_v19   ;;  %v1229_v22 = vpop.f32.mrf.mxu3  ;;  %v971_v27 = vadd.f32 %v3196_v61, %v970_v21 }
 0x1c6   :  { %v847_v23 = vpop.f32.mrf.mxu0 }
 0x1c7   :  { %v848_v25 = vadd.f32 %v3196_v61, %v847_v23  ;;  %v1106_v26 = vpop.f32.mrf.mxu1  ;;  %v1230_v32 = vadd.f32 %v1229_v22, %v971_v27 }
 0x1c9   :  { %v1107_v28 = vadd.f32 %v1106_v26, %v848_v25  ;;  %v1350_v39 = vmax.f32 %v1230_v32, 0.0 }
 0x1cb   :  { %v1301_v30 = vmax.f32 %v1107_v28, 0.0 }
 0x1cc   :  { %v972_v31 = vpop.f32.mrf.mxu2 }
 0x1cd   :  { %v2241_v33 = vpack.c.bf16 %v1301_v30, %v1300_v29  ;;  %v973_v34 = vadd.f32 %v3196_v61, %v972_v31  ;;  %v1231_v35 = vpop.f32.mrf.mxu3 }
 0x1ce   :  { %v850_v36 = vpop.f32.mrf.mxu0 }
 0x1cf   :  { %2415 = vst [vmem:[%s3396_s3 + $0x90] sm:$0xff] %v2241_v33   ;;  %v1232_v37 = vadd.f32 %v1231_v35, %v973_v34  ;;  %v1109_v38 = vpop.f32.mrf.mxu1  ;;  %v851_v42 = vadd.f32 %v3196_v61, %v850_v36 }
 0x1d1   :  { %v1351_v40 = vmax.f32 %v1232_v37, 0.0  ;;  %v1110_v46 = vadd.f32 %v1109_v38, %v851_v42 }
 0x1d3   :  { %v2366_v41 = vpack.c.bf16 %v1351_v40, %v1350_v39  ;;  %v1302_v51 = vmax.f32 %v1110_v46, 0.0 }
 0x1d4   :  { %v975_v43 = vpop.f32.mrf.mxu2 }
 0x1d5   :  { %2440 = vst [vmem:[%s3396_s3 + $0x158] sm:$0xff] %v2366_v41   ;;  %v1234_v44 = vpop.f32.mrf.mxu3  ;;  %v976_v49 = vadd.f32 %v3196_v61, %v975_v43 }
 0x1d6   :  { %v852_v45 = vpop.f32.mrf.mxu0 }
 0x1d7   :  { %v853_v47 = vadd.f32 %v3196_v61, %v852_v45  ;;  %v1111_v48 = vpop.f32.mrf.mxu1  ;;  %v1235_v54 = vadd.f32 %v1234_v44, %v976_v49 }
 0x1d9   :  { %v1112_v50 = vadd.f32 %v1111_v48, %v853_v47  ;;  %v1352_v62 = vmax.f32 %v1235_v54, 0.0 }
 0x1db   :  { %v1303_v52 = vmax.f32 %v1112_v50, 0.0 }
 0x1dc   :  { %v977_v53 = vpop.f32.mrf.mxu2 }
 0x1dd   :  { %v2246_v55 = vpack.c.bf16 %v1303_v52, %v1302_v51  ;;  %v978_v56 = vadd.f32 %v3196_v61, %v977_v53  ;;  %v1236_v57 = vpop.f32.mrf.mxu3 }
 0x1de   :  { %v855_v58 = vpop.f32.mrf.mxu0 }
 0x1df   :  { %2416 = vst [vmem:[%s3396_s3 + $0x98] sm:$0xff] %v2246_v55   ;;  %v1237_v59 = vadd.f32 %v1236_v57, %v978_v56  ;;  %v1114_v60 = vpop.f32.mrf.mxu1  ;;  %v856_v1 = vadd.f32 %v3196_v61, %v855_v58 }
 0x1e1   :  { %v1353_v63 = vmax.f32 %v1237_v59, 0.0  ;;  %v1115_v5 = vadd.f32 %v1114_v60, %v856_v1 }
 0x1e3   :  { %v2371_v0 = vpack.c.bf16 %v1353_v63, %v1352_v62  ;;  %v1304_v10 = vmax.f32 %v1115_v5, 0.0 }
 0x1e4   :  { %v980_v2 = vpop.f32.mrf.mxu2 }
 0x1e5   :  { %2441 = vst [vmem:[%s3396_s3 + $0x160] sm:$0xff] %v2371_v0   ;;  %v1239_v3 = vpop.f32.mrf.mxu3  ;;  %v981_v8 = vadd.f32 %v3196_v61, %v980_v2 }
 0x1e6   :  { %v857_v4 = vpop.f32.mrf.mxu0 }
 0x1e7   :  { %v858_v6 = vadd.f32 %v3196_v61, %v857_v4  ;;  %v1116_v7 = vpop.f32.mrf.mxu1  ;;  %v1240_v13 = vadd.f32 %v1239_v3, %v981_v8 }
 0x1e9   :  { %v1117_v9 = vadd.f32 %v1116_v7, %v858_v6  ;;  %v1354_v20 = vmax.f32 %v1240_v13, 0.0 }
 0x1eb   :  { %v1305_v11 = vmax.f32 %v1117_v9, 0.0 }
 0x1ec   :  { %v982_v12 = vpop.f32.mrf.mxu2 }
 0x1ed   :  { %v2251_v14 = vpack.c.bf16 %v1305_v11, %v1304_v10  ;;  %v983_v15 = vadd.f32 %v3196_v61, %v982_v12  ;;  %v1241_v16 = vpop.f32.mrf.mxu3 }
 0x1ee   :  { %v860_v17 = vpop.f32.mrf.mxu0 }
 0x1ef   :  { %2417 = vst [vmem:[%s3396_s3 + $0xa0] sm:$0xff] %v2251_v14   ;;  %v1242_v18 = vadd.f32 %v1241_v16, %v983_v15  ;;  %v1119_v19 = vpop.f32.mrf.mxu1  ;;  %v861_v23 = vadd.f32 %v3196_v61, %v860_v17 }
 0x1f1   :  { %v1355_v21 = vmax.f32 %v1242_v18, 0.0  ;;  %v1120_v27 = vadd.f32 %v1119_v19, %v861_v23 }
 0x1f3   :  { %v2376_v22 = vpack.c.bf16 %v1355_v21, %v1354_v20  ;;  %v1306_v32 = vmax.f32 %v1120_v27, 0.0 }
 0x1f4   :  { %v985_v24 = vpop.f32.mrf.mxu2 }
 0x1f5   :  { %2442 = vst [vmem:[%s3396_s3 + $0x168] sm:$0xff] %v2376_v22   ;;  %v1244_v25 = vpop.f32.mrf.mxu3  ;;  %v986_v30 = vadd.f32 %v3196_v61, %v985_v24 }
 0x1f6   :  { %v862_v26 = vpop.f32.mrf.mxu0 }
 0x1f7   :  { %v863_v28 = vadd.f32 %v3196_v61, %v862_v26  ;;  %v1121_v29 = vpop.f32.mrf.mxu1  ;;  %v1245_v35 = vadd.f32 %v1244_v25, %v986_v30 }
 0x1f9   :  { %v1122_v31 = vadd.f32 %v1121_v29, %v863_v28  ;;  %v1356_v42 = vmax.f32 %v1245_v35, 0.0 }
 0x1fb   :  { %v1307_v33 = vmax.f32 %v1122_v31, 0.0 }
 0x1fc   :  { %v987_v34 = vpop.f32.mrf.mxu2 }
 0x1fd   :  { %v2256_v36 = vpack.c.bf16 %v1307_v33, %v1306_v32  ;;  %v988_v37 = vadd.f32 %v3196_v61, %v987_v34  ;;  %v1246_v38 = vpop.f32.mrf.mxu3 }
 0x1fe   :  { %v865_v39 = vpop.f32.mrf.mxu0 }
 0x1ff   :  { %2418 = vst [vmem:[%s3396_s3 + $0xa8] sm:$0xff] %v2256_v36   ;;  %v1247_v40 = vadd.f32 %v1246_v38, %v988_v37  ;;  %v1124_v41 = vpop.f32.mrf.mxu1  ;;  %v866_v45 = vadd.f32 %v3196_v61, %v865_v39 }
 0x201   :  { %v1357_v43 = vmax.f32 %v1247_v40, 0.0  ;;  %v1125_v49 = vadd.f32 %v1124_v41, %v866_v45 }
 0x203   :  { %v2381_v44 = vpack.c.bf16 %v1357_v43, %v1356_v42  ;;  %v1308_v54 = vmax.f32 %v1125_v49, 0.0 }
 0x204   :  { %v990_v46 = vpop.f32.mrf.mxu2 }
 0x205   :  { %2443 = vst [vmem:[%s3396_s3 + $0x170] sm:$0xff] %v2381_v44   ;;  %v1249_v47 = vpop.f32.mrf.mxu3  ;;  %v991_v52 = vadd.f32 %v3196_v61, %v990_v46 }
 0x206   :  { %v867_v48 = vpop.f32.mrf.mxu0 }
 0x207   :  { %v868_v50 = vadd.f32 %v3196_v61, %v867_v48  ;;  %v1126_v51 = vpop.f32.mrf.mxu1  ;;  %v1250_v57 = vadd.f32 %v1249_v47, %v991_v52 }
 0x209   :  { %v1127_v53 = vadd.f32 %v1126_v51, %v868_v50  ;;  %v1358_v1 = vmax.f32 %v1250_v57, 0.0 }
 0x20b   :  { %v1309_v55 = vmax.f32 %v1127_v53, 0.0 }
 0x20c   :  { %v992_v56 = vpop.f32.mrf.mxu2 }
 0x20d   :  { %v2261_v58 = vpack.c.bf16 %v1309_v55, %v1308_v54  ;;  %v993_v59 = vadd.f32 %v3196_v61, %v992_v56  ;;  %v1251_v60 = vpop.f32.mrf.mxu3 }
 0x20e   :  { %v870_v62 = vpop.f32.mrf.mxu0 }
 0x20f   :  { %2419 = vst [vmem:[%s3396_s3 + $0xb0] sm:$0xff] %v2261_v58   ;;  %v1252_v63 = vadd.f32 %v1251_v60, %v993_v59  ;;  %v1129_v0 = vpop.f32.mrf.mxu1  ;;  %v871_v4 = vadd.f32 %v3196_v61, %v870_v62 }
 0x211   :  { %v1359_v2 = vmax.f32 %v1252_v63, 0.0  ;;  %v1130_v8 = vadd.f32 %v1129_v0, %v871_v4 }
 0x213   :  { %v2386_v3 = vpack.c.bf16 %v1359_v2, %v1358_v1  ;;  %v1310_v13 = vmax.f32 %v1130_v8, 0.0 }
 0x214   :  { %v995_v5 = vpop.f32.mrf.mxu2 }
 0x215   :  { %2444 = vst [vmem:[%s3396_s3 + $0x178] sm:$0xff] %v2386_v3   ;;  %v1254_v6 = vpop.f32.mrf.mxu3  ;;  %v996_v11 = vadd.f32 %v3196_v61, %v995_v5 }
 0x216   :  { %v872_v7 = vpop.f32.mrf.mxu0 }
 0x217   :  { %v873_v9 = vadd.f32 %v3196_v61, %v872_v7  ;;  %v1131_v10 = vpop.f32.mrf.mxu1  ;;  %v1255_v16 = vadd.f32 %v1254_v6, %v996_v11 }
 0x219   :  { %v1132_v12 = vadd.f32 %v1131_v10, %v873_v9  ;;  %v1360_v23 = vmax.f32 %v1255_v16, 0.0 }
 0x21b   :  { %v1311_v14 = vmax.f32 %v1132_v12, 0.0 }
 0x21c   :  { %v997_v15 = vpop.f32.mrf.mxu2 }
 0x21d   :  { %v2266_v17 = vpack.c.bf16 %v1311_v14, %v1310_v13  ;;  %v998_v18 = vadd.f32 %v3196_v61, %v997_v15  ;;  %v1256_v19 = vpop.f32.mrf.mxu3 }
 0x21e   :  { %v875_v20 = vpop.f32.mrf.mxu0 }
 0x21f   :  { %2420 = vst [vmem:[%s3396_s3 + $0xb8] sm:$0xff] %v2266_v17   ;;  %v1257_v21 = vadd.f32 %v1256_v19, %v998_v18  ;;  %v1134_v22 = vpop.f32.mrf.mxu1  ;;  %v876_v26 = vadd.f32 %v3196_v61, %v875_v20 }
 0x221   :  { %v1361_v24 = vmax.f32 %v1257_v21, 0.0  ;;  %v1135_v30 = vadd.f32 %v1134_v22, %v876_v26 }
 0x223   :  { %v2391_v25 = vpack.c.bf16 %v1361_v24, %v1360_v23  ;;  %v1312_v35 = vmax.f32 %v1135_v30, 0.0 }
 0x224   :  { %v1000_v27 = vpop.f32.mrf.mxu2 }
 0x225   :  { %2445 = vst [vmem:[%s3396_s3 + $0x180] sm:$0xff] %v2391_v25   ;;  %v1259_v28 = vpop.f32.mrf.mxu3  ;;  %v1001_v33 = vadd.f32 %v3196_v61, %v1000_v27 }
 0x226   :  { %v877_v29 = vpop.f32.mrf.mxu0 }
 0x227   :  { %v878_v31 = vadd.f32 %v3196_v61, %v877_v29  ;;  %v1136_v32 = vpop.f32.mrf.mxu1  ;;  %v1260_v38 = vadd.f32 %v1259_v28, %v1001_v33 }
 0x229   :  { %v1137_v34 = vadd.f32 %v1136_v32, %v878_v31  ;;  %v1362_v43 = vmax.f32 %v1260_v38, 0.0 }
 0x22b   :  { %v1313_v36 = vmax.f32 %v1137_v34, 0.0 }
 0x22c   :  { %v1002_v37 = vpop.f32.mrf.mxu2 }
 0x22d   :  { %v2271_v39 = vpack.c.bf16 %v1313_v36, %v1312_v35  ;;  %v1003_v40 = vadd.f32 %v3196_v61, %v1002_v37  ;;  %v1261_v41 = vpop.f32.mrf.mxu3 }
 0x22f   :  { %2421 = vst [vmem:[%s3396_s3 + $0xc0] sm:$0xff] %v2271_v39   ;;  %v1262_v42 = vadd.f32 %v1261_v41, %v1003_v40 }
 0x231   :  { %v1363_v44 = vmax.f32 %v1262_v42, 0.0 }
 0x233   :  { %v2396_v45 = vpack.c.bf16 %v1363_v44, %v1362_v43 }
 0x235   :  { %2446 = vst [vmem:[%s3396_s3 + $0x188] sm:$0xff] %v2396_v45  }

// kernel: dqn_forward.5
= control target key start
LH: loop header
LB: loop body
LE: loop exit
PB: predicated region body
PF: predicated region fallthrough
CT: control target
= control target key end

     0   :  { %s1750_s1 = inlined_call_operand.vmem [shape: bf16[512,128], index: 1, kind: input, shape index: {}]   ;;  %s1751_s2 = inlined_call_operand.vmem [shape: f32[1,128], index: 2, kind: input, shape index: {}]   ;;  %s1752_s0 = inlined_call_operand.vmem [shape: bf16[176,512], index: 0, kind: input, shape index: {}]   ;;  %s1753_s3 = inlined_call_operand.vmem [shape: bf16[176,128], index: 3, kind: output, shape index: {}]  }
   0x1   :  { %v1219_v0 = vld [vmem:[%s1750_s1 + $0x38] sm:$0xff]  ;;  %v1218_v4 = vld [vmem:[%s1750_s1 + $0x30] sm:$0xff]  ;;  %v1217_v8 = vld [vmem:[%s1750_s1 + $0x28] sm:$0xff] }
   0x2   :  { %v1227_v1 = vld [vmem:[%s1750_s1 + $0x78] sm:$0xff]  ;;  %538 = vmatpush.bf16.msra.mxu0 %v1219_v0  ;;  %v1226_v5 = vld [vmem:[%s1750_s1 + $0x70] sm:$0xff]  ;;  %v1225_v9 = vld [vmem:[%s1750_s1 + $0x68] sm:$0xff] }
   0x3   :  { %v1235_v2 = vld [vmem:[%s1750_s1 + $0xb8] sm:$0xff]  ;;  %602 = vmatpush.bf16.msra.mxu1 %v1227_v1  ;;  %v1234_v6 = vld [vmem:[%s1750_s1 + $0xb0] sm:$0xff]  ;;  %v1233_v10 = vld [vmem:[%s1750_s1 + $0xa8] sm:$0xff] }
   0x4   :  { %v1243_v3 = vld [vmem:[%s1750_s1 + $0xf8] sm:$0xff]  ;;  %666 = vmatpush.bf16.msra.mxu2 %v1235_v2  ;;  %v1242_v7 = vld [vmem:[%s1750_s1 + $0xf0] sm:$0xff]  ;;  %v1241_v11 = vld [vmem:[%s1750_s1 + $0xe8] sm:$0xff] }
   0x5   :  { %730 = vmatpush.bf16.msra.mxu3 %v1243_v3  ;;  %v1216_v12 = vld [vmem:[%s1750_s1 + $0x20] sm:$0xff]  ;;  %v1215_v16 = vld [vmem:[%s1750_s1 + $0x18] sm:$0xff]  ;;  %v1214_v20 = vld [vmem:[%s1750_s1 + $0x10] sm:$0xff] }
   0x6   :  { %539 = vmatpush.bf16.msra.mxu0 %v1218_v4  ;;  %v1224_v13 = vld [vmem:[%s1750_s1 + $0x60] sm:$0xff]  ;;  %v1223_v17 = vld [vmem:[%s1750_s1 + $0x58] sm:$0xff]  ;;  %v1222_v21 = vld [vmem:[%s1750_s1 + $0x50] sm:$0xff] }
   0x7   :  { %603 = vmatpush.bf16.msra.mxu1 %v1226_v5  ;;  %v1232_v14 = vld [vmem:[%s1750_s1 + $0xa0] sm:$0xff]  ;;  %v1231_v18 = vld [vmem:[%s1750_s1 + $0x98] sm:$0xff]  ;;  %v1230_v22 = vld [vmem:[%s1750_s1 + $0x90] sm:$0xff] }
   0x8   :  { %667 = vmatpush.bf16.msra.mxu2 %v1234_v6  ;;  %v1240_v15 = vld [vmem:[%s1750_s1 + $0xe0] sm:$0xff]  ;;  %v1239_v19 = vld [vmem:[%s1750_s1 + $0xd8] sm:$0xff]  ;;  %v1238_v23 = vld [vmem:[%s1750_s1 + $0xd0] sm:$0xff] }
   0x9   :  { %731 = vmatpush.bf16.msra.mxu3 %v1242_v7  ;;  %v1213_v24 = vld [vmem:[%s1750_s1 + $0x8] sm:$0xff]  ;;  %v1212_v28 = vld [vmem:[%s1750_s1] sm:$0xff]  ;;  %v1170_v33 = vld [vmem:[%s1752_s0 + $0xc] sm:$0xf0] }
   0xa   :  { %540 = vmatpush.bf16.msra.mxu0 %v1217_v8  ;;  %v1221_v25 = vld [vmem:[%s1750_s1 + $0x48] sm:$0xff]  ;;  %v1220_v29 = vld [vmem:[%s1750_s1 + $0x40] sm:$0xff]  ;;  %v868_v35 = vld [vmem:[%s1752_s0 + $0x10] sm:$0xf0] }
   0xb   :  { %604 = vmatpush.bf16.msra.mxu1 %v1225_v9  ;;  %v1229_v26 = vld [vmem:[%s1750_s1 + $0x88] sm:$0xff]  ;;  %v1228_v30 = vld [vmem:[%s1750_s1 + $0x80] sm:$0xff]  ;;  %v1171_v37 = vld [vmem:[%s1752_s0 + $0x14] sm:$0xf0] }
   0xc   :  { %668 = vmatpush.bf16.msra.mxu2 %v1233_v10  ;;  %v1237_v27 = vld [vmem:[%s1750_s1 + $0xc8] sm:$0xff]  ;;  %v1236_v31 = vld [vmem:[%s1750_s1 + $0xc0] sm:$0xff]  ;;  %v876_v39 = vld [vmem:[%s1752_s0 + $0x18] sm:$0xf0] }
   0xd   :  { %732 = vmatpush.bf16.msra.mxu3 %v1241_v11  ;;  %v866_v32 = vld [vmem:[%s1752_s0] sm:$0xf]  ;;  %v1168_v34 = vld [vmem:[%s1752_s0 + $0x4] sm:$0xf]  ;;  %v874_v36 = vld [vmem:[%s1752_s0 + $0x8] sm:$0xf] }
   0xe   :  { %541 = vmatpush.bf16.msra.mxu0 %v1216_v12  ;;  %v1169_v38 = vld [vmem:[%s1752_s0 + $0xc] sm:$0xf]  ;;  %v867_v40 = vor.u32 %v1170_v33, %v866_v32  ;;  %v871_v41 = vor.u32 %v1168_v34, %v868_v35  ;;  %v875_v42 = vor.u32 %v1171_v37, %v874_v36  ;;  %v882_v44 = vld [vmem:[%s1752_s0 + $0x20] sm:$0xf]  ;;  %v1174_v45 = vld [vmem:[%s1752_s0 + $0x2c] sm:$0xf0] }
   0xf   :  { %605 = vmatpush.bf16.msra.mxu1 %v1224_v13  ;;  %v879_v43 = vor.u32 %v1169_v38, %v876_v39  ;;  %v1172_v46 = vld [vmem:[%s1752_s0 + $0x24] sm:$0xf]  ;;  %v884_v47 = vld [vmem:[%s1752_s0 + $0x30] sm:$0xf0]  ;;  %v890_v48 = vld [vmem:[%s1752_s0 + $0x28] sm:$0xf]  ;;  %v883_v52 = vor.u32 %v1174_v45, %v882_v44 }
  0x10   :  { %669 = vmatpush.bf16.msra.mxu2 %v1232_v14  ;;  %v1175_v49 = vld [vmem:[%s1752_s0 + $0x34] sm:$0xf0]  ;;  %v1173_v50 = vld [vmem:[%s1752_s0 + $0x2c] sm:$0xf]  ;;  %v892_v51 = vld [vmem:[%s1752_s0 + $0x38] sm:$0xf0]  ;;  %v887_v53 = vor.u32 %v1172_v46, %v884_v47 }
  0x11   :  { %733 = vmatpush.bf16.msra.mxu3 %v1240_v15  ;;  %v891_v54 = vor.u32 %v1175_v49, %v890_v48  ;;  %v895_v55 = vor.u32 %v1173_v50, %v892_v51  ;;  %v898_v56 = vld [vmem:[%s1752_s0 + $0x40] sm:$0xf]  ;;  %v1178_v57 = vld [vmem:[%s1752_s0 + $0x4c] sm:$0xf0]  ;;  %v1176_v58 = vld [vmem:[%s1752_s0 + $0x44] sm:$0xf] }
  0x12   :  { %542 = vmatpush.bf16.msra.mxu0 %v1215_v16  ;;  %v900_v59 = vld [vmem:[%s1752_s0 + $0x50] sm:$0xf0]  ;;  %v906_v60 = vld [vmem:[%s1752_s0 + $0x48] sm:$0xf]  ;;  %v1179_v61 = vld [vmem:[%s1752_s0 + $0x54] sm:$0xf0]  ;;  %v899_v0 = vor.u32 %v1178_v57, %v898_v56 }
  0x13   :  { %606 = vmatpush.bf16.msra.mxu1 %v1223_v17  ;;  %v1177_v62 = vld [vmem:[%s1752_s0 + $0x4c] sm:$0xf]  ;;  %v908_v63 = vld [vmem:[%s1752_s0 + $0x58] sm:$0xf0]  ;;  %v903_v1 = vor.u32 %v1176_v58, %v900_v59  ;;  %v907_v2 = vor.u32 %v1179_v61, %v906_v60  ;;  %v914_v4 = vld [vmem:[%s1752_s0 + $0x60] sm:$0xf] }
  0x14   :  { %670 = vmatpush.bf16.msra.mxu2 %v1231_v18  ;;  %v911_v3 = vor.u32 %v1177_v62, %v908_v63  ;;  %v1182_v5 = vld [vmem:[%s1752_s0 + $0x6c] sm:$0xf0]  ;;  %v1180_v6 = vld [vmem:[%s1752_s0 + $0x64] sm:$0xf]  ;;  %v916_v7 = vld [vmem:[%s1752_s0 + $0x70] sm:$0xf0] }
  0x15   :  { %734 = vmatpush.bf16.msra.mxu3 %v1239_v19  ;;  %v922_v8 = vld [vmem:[%s1752_s0 + $0x68] sm:$0xf]  ;;  %v1183_v9 = vld [vmem:[%s1752_s0 + $0x74] sm:$0xf0]  ;;  %v1181_v10 = vld [vmem:[%s1752_s0 + $0x6c] sm:$0xf]  ;;  %v915_v12 = vor.u32 %v1182_v5, %v914_v4  ;;  %v919_v13 = vor.u32 %v1180_v6, %v916_v7 }
  0x16   :  { %543 = vmatpush.bf16.msra.mxu0 %v1214_v20  ;;  %v924_v11 = vld [vmem:[%s1752_s0 + $0x78] sm:$0xf0]  ;;  %v923_v14 = vor.u32 %v1183_v9, %v922_v8  ;;  %v930_v16 = vld [vmem:[%s1752_s0 + $0x80] sm:$0xf]  ;;  %v1186_v17 = vld [vmem:[%s1752_s0 + $0x8c] sm:$0xf0] }
  0x17   :  { %607 = vmatpush.bf16.msra.mxu1 %v1222_v21  ;;  %v927_v15 = vor.u32 %v1181_v10, %v924_v11  ;;  %v1184_v18 = vld [vmem:[%s1752_s0 + $0x84] sm:$0xf]  ;;  %v932_v19 = vld [vmem:[%s1752_s0 + $0x90] sm:$0xf0]  ;;  %v938_v20 = vld [vmem:[%s1752_s0 + $0x88] sm:$0xf] }
  0x18   :  { %671 = vmatpush.bf16.msra.mxu2 %v1230_v22  ;;  %v1187_v21 = vld [vmem:[%s1752_s0 + $0x94] sm:$0xf0]  ;;  %v1185_v22 = vld [vmem:[%s1752_s0 + $0x8c] sm:$0xf]  ;;  %v954_v32 = vld [vmem:[%s1752_s0 + $0xa8] sm:$0xf] }
  0x19   :  { %735 = vmatpush.bf16.msra.mxu3 %v1238_v23  ;;  %v940_v23 = vld [vmem:[%s1752_s0 + $0x98] sm:$0xf0]  ;;  %v1191_v33 = vld [vmem:[%s1752_s0 + $0xb4] sm:$0xf0]  ;;  %v1189_v34 = vld [vmem:[%s1752_s0 + $0xac] sm:$0xf] }
  0x1a   :  { %544 = vmatpush.bf16.msra.mxu0 %v1213_v24  ;;  %v931_v24 = vor.u32 %v1186_v17, %v930_v16  ;;  %v956_v35 = vld [vmem:[%s1752_s0 + $0xb8] sm:$0xf0]  ;;  %v955_v38 = vor.u32 %v1191_v33, %v954_v32  ;;  %v970_v44 = vld [vmem:[%s1752_s0 + $0xc8] sm:$0xf]  ;;  %v1195_v45 = vld [vmem:[%s1752_s0 + $0xd4] sm:$0xf0] }
  0x1b   :  { %608 = vmatpush.bf16.msra.mxu1 %v1221_v25  ;;  %v935_v25 = vor.u32 %v1184_v18, %v932_v19  ;;  %v959_v39 = vor.u32 %v1189_v34, %v956_v35  ;;  %v1193_v46 = vld [vmem:[%s1752_s0 + $0xcc] sm:$0xf]  ;;  %v972_v47 = vld [vmem:[%s1752_s0 + $0xd8] sm:$0xf0]  ;;  %v971_v50 = vor.u32 %v1195_v45, %v970_v44  ;;  %v986_v56 = vld [vmem:[%s1752_s0 + $0xe8] sm:$0xf] }
  0x1c   :  { %672 = vmatpush.bf16.msra.mxu2 %v1229_v26  ;;  %v939_v26 = vor.u32 %v1187_v21, %v938_v20  ;;  %v975_v51 = vor.u32 %v1193_v46, %v972_v47  ;;  %v1199_v57 = vld [vmem:[%s1752_s0 + $0xf4] sm:$0xf0]  ;;  %v1197_v58 = vld [vmem:[%s1752_s0 + $0xec] sm:$0xf]  ;;  %v988_v59 = vld [vmem:[%s1752_s0 + $0xf8] sm:$0xf0] }
  0x1d   :  { %736 = vmatpush.bf16.msra.mxu3 %v1237_v27  ;;  %v943_v27 = vor.u32 %v1185_v22, %v940_v23  ;;  %v987_v62 = vor.u32 %v1199_v57, %v986_v56  ;;  %v991_v63 = vor.u32 %v1197_v58, %v988_v59  ;;  %v1002_v4 = vld [vmem:[%s1752_s0 + $0x108] sm:$0xf]  ;;  %v1203_v5 = vld [vmem:[%s1752_s0 + $0x114] sm:$0xf0]  ;;  %v1201_v6 = vld [vmem:[%s1752_s0 + $0x10c] sm:$0xf] }
  0x1e   :  { %545 = vmatpush.bf16.msra.mxu0 %v1212_v28  ;;  %v946_v28 = vld [vmem:[%s1752_s0 + $0xa0] sm:$0xf]  ;;  %v1004_v7 = vld [vmem:[%s1752_s0 + $0x118] sm:$0xf0]  ;;  %v1206_v23 = vld [vmem:[%s1752_s0 + $0x12c] sm:$0xf0] }
  0x1f   :  { %609 = vmatpush.bf16.msra.mxu1 %v1220_v29  ;;  %v1190_v29 = vld [vmem:[%s1752_s0 + $0xac] sm:$0xf0]  ;;  %v1645_v10 = vld [vmem:[%s1751_s2] ss:$0 sm:$0xff]  ;;  %v1208_v56 = vld [vmem:[%s1752_s0 + $0x144] sm:$0xf] }
  0x20   :  { %673 = vmatpush.bf16.msra.mxu2 %v1228_v30  ;;  %v1188_v30 = vld [vmem:[%s1752_s0 + $0xa4] sm:$0xf]  ;;  %v947_v36 = vor.u32 %v1190_v29, %v946_v28  ;;  %v1010_v22 = vld [vmem:[%s1752_s0 + $0x120] sm:$0xf]  ;;  %v1207_v28 = vld [vmem:[%s1752_s0 + $0x134] sm:$0xf0] }
  0x21   :  { %737 = vmatpush.bf16.msra.mxu3 %v1236_v31  ;;  %546 = vmatmul.bf16.vlgmr.msra.gmra.mxu0 %v867_v40  ;;  %v948_v31 = vld [vmem:[%s1752_s0 + $0xb0] sm:$0xf0]  ;;  %v962_v40 = vld [vmem:[%s1752_s0 + $0xc0] sm:$0xf]  ;;  %v1205_v29 = vld [vmem:[%s1752_s0 + $0x12c] sm:$0xf]  ;;  %v1011_v34 = vor.u32 %v1206_v23, %v1010_v22 }
  0x22   :  { %610 = vmatmul.bf16.vlgmr.msra.gmra.mxu1 %v871_v41  ;;  %v951_v37 = vor.u32 %v1188_v30, %v948_v31  ;;  %v1194_v41 = vld [vmem:[%s1752_s0 + $0xcc] sm:$0xf0]  ;;  %v1020_v30 = vld [vmem:[%s1752_s0 + $0x138] sm:$0xf0]  ;;  %v1028_v57 = vld [vmem:[%s1752_s0 + $0x150] sm:$0xf0] }
  0x23   :  { %674 = vmatmul.bf16.vlgmr.msra.gmra.mxu2 %v875_v42  ;;  %v1192_v42 = vld [vmem:[%s1752_s0 + $0xc4] sm:$0xf]  ;;  %v963_v48 = vor.u32 %v1194_v41, %v962_v40  ;;  %v1023_v41 = vor.u32 %v1205_v29, %v1020_v30  ;;  %v1034_v58 = vld [vmem:[%s1752_s0 + $0x148] sm:$0xf]  ;;  %v1211_v59 = vld [vmem:[%s1752_s0 + $0x154] sm:$0xf0] }
  0x24   :  { %738 = vmatmul.bf16.vlgmr.msra.gmra.mxu3 %v879_v43  ;;  %v964_v43 = vld [vmem:[%s1752_s0 + $0xd0] sm:$0xf0] }
  0x25   :  { %v967_v49 = vor.u32 %v1192_v42, %v964_v43 }
  0x31   :  { %551 = vmatmul.bf16.gmra.mxu0 %v883_v52  ;;  %v978_v52 = vld [vmem:[%s1752_s0 + $0xe0] sm:$0xf] }
  0x32   :  { %615 = vmatmul.bf16.gmra.mxu1 %v887_v53  ;;  %v1198_v53 = vld [vmem:[%s1752_s0 + $0xec] sm:$0xf0] }
  0x33   :  { %679 = vmatmul.bf16.gmra.mxu2 %v891_v54  ;;  %v1196_v54 = vld [vmem:[%s1752_s0 + $0xe4] sm:$0xf]  ;;  %v979_v60 = vor.u32 %v1198_v53, %v978_v52  ;;  %v1026_v53 = vld [vmem:[%s1752_s0 + $0x140] sm:$0xf] }
  0x34   :  { %743 = vmatmul.bf16.gmra.mxu3 %v895_v55  ;;  %v980_v55 = vld [vmem:[%s1752_s0 + $0xf0] sm:$0xf0] }
  0x35   :  { %v983_v61 = vor.u32 %v1196_v54, %v980_v55  ;;  %v1210_v54 = vld [vmem:[%s1752_s0 + $0x14c] sm:$0xf0] }
  0x41   :  { %556 = vmatmul.bf16.gmra.mxu0 %v899_v0  ;;  %v994_v0 = vld [vmem:[%s1752_s0 + $0x100] sm:$0xf] }
  0x42   :  { %620 = vmatmul.bf16.gmra.mxu1 %v903_v1  ;;  %v1202_v1 = vld [vmem:[%s1752_s0 + $0x10c] sm:$0xf0] }
  0x43   :  { %684 = vmatmul.bf16.gmra.mxu2 %v907_v2  ;;  %v1200_v2 = vld [vmem:[%s1752_s0 + $0x104] sm:$0xf]  ;;  %v995_v8 = vor.u32 %v1202_v1, %v994_v0  ;;  %v1027_v1 = vor.u32 %v1210_v54, %v1026_v53 }
  0x44   :  { %748 = vmatmul.bf16.gmra.mxu3 %v911_v3  ;;  %v996_v3 = vld [vmem:[%s1752_s0 + $0x110] sm:$0xf0] }
  0x45   :  { %v999_v9 = vor.u32 %v1200_v2, %v996_v3  ;;  %v1031_v2 = vor.u32 %v1208_v56, %v1028_v57 }
  0x51   :  { %561 = vmatmul.bf16.gmra.mxu0 %v915_v12 }
  0x52   :  { %625 = vmatmul.bf16.gmra.mxu1 %v919_v13  ;;  %v1003_v13 = vor.u32 %v1203_v5, %v1002_v4 }
  0x53   :  { %689 = vmatmul.bf16.gmra.mxu2 %v923_v14  ;;  %v1007_v14 = vor.u32 %v1201_v6, %v1004_v7  ;;  %v1035_v7 = vor.u32 %v1211_v59, %v1034_v58 }
  0x54   :  { %753 = vmatmul.bf16.gmra.mxu3 %v927_v15 }
  0x61   :  { %566 = vmatmul.bf16.gmra.mxu0 %v931_v24 }
  0x62   :  { %630 = vmatmul.bf16.gmra.mxu1 %v935_v25  ;;  %v1204_v25 = vld [vmem:[%s1752_s0 + $0x124] sm:$0xf] }
  0x63   :  { %694 = vmatmul.bf16.gmra.mxu2 %v939_v26  ;;  %v1012_v26 = vld [vmem:[%s1752_s0 + $0x130] sm:$0xf0] }
  0x64   :  { %758 = vmatmul.bf16.gmra.mxu3 %v943_v27  ;;  %v1018_v27 = vld [vmem:[%s1752_s0 + $0x128] sm:$0xf]  ;;  %v1015_v35 = vor.u32 %v1204_v25, %v1012_v26 }
  0x65   :  { %v1019_v40 = vor.u32 %v1207_v28, %v1018_v27 }
  0x71   :  { %571 = vmatmul.bf16.gmra.mxu0 %v947_v36 }
  0x72   :  { %635 = vmatmul.bf16.gmra.mxu1 %v951_v37 }
  0x73   :  { %699 = vmatmul.bf16.gmra.mxu2 %v955_v38 }
  0x74   :  { %763 = vmatmul.bf16.gmra.mxu3 %v959_v39 }
  0x81   :  { %576 = vmatmul.bf16.gmra.mxu0 %v963_v48 }
  0x82   :  { %640 = vmatmul.bf16.gmra.mxu1 %v967_v49 }
  0x83   :  { %704 = vmatmul.bf16.gmra.mxu2 %v971_v50 }
  0x84   :  { %768 = vmatmul.bf16.gmra.mxu3 %v975_v51 }
  0x91   :  { %581 = vmatmul.bf16.gmra.mxu0 %v979_v60  ;;  %v1209_v60 = vld [vmem:[%s1752_s0 + $0x14c] sm:$0xf] }
  0x92   :  { %645 = vmatmul.bf16.gmra.mxu1 %v983_v61  ;;  %v1036_v61 = vld [vmem:[%s1752_s0 + $0x158] sm:$0xf0] }
  0x93   :  { %709 = vmatmul.bf16.gmra.mxu2 %v987_v62 }
  0x94   :  { %773 = vmatmul.bf16.gmra.mxu3 %v991_v63 }
  0x9e   :  { %v547_v11 = vpop.f32.mrf.mxu0 }
  0x9f   :  { %v611_v12 = vpop.f32.mrf.mxu1  ;;  %v548_v15 = vadd.f32 %v1645_v10, %v547_v11 }
  0xa1   :  { %586 = vmatmul.bf16.gmra.mxu0 %v995_v8  ;;  %v612_v18 = vadd.f32 %v611_v12, %v548_v15  ;;  %v1039_v8 = vor.u32 %v1209_v60, %v1036_v61 }
  0xa2   :  { %650 = vmatmul.bf16.gmra.mxu1 %v999_v9 }
  0xa3   :  { %714 = vmatmul.bf16.gmra.mxu2 %v1003_v13 }
  0xa4   :  { %778 = vmatmul.bf16.gmra.mxu3 %v1007_v14 }
  0xa6   :  { %v675_v16 = vpop.f32.mrf.mxu2  ;;  %v549_v19 = vpop.f32.mrf.mxu0 }
  0xa7   :  { %v739_v17 = vpop.f32.mrf.mxu3  ;;  %v613_v20 = vpop.f32.mrf.mxu1  ;;  %v550_v21 = vadd.f32 %v1645_v10, %v549_v19  ;;  %v676_v24 = vadd.f32 %v675_v16, %v612_v18 }
  0xa9   :  { %v614_v31 = vadd.f32 %v613_v20, %v550_v21  ;;  %v740_v36 = vadd.f32 %v739_v17, %v676_v24 }
  0xab   :  { %v794_v43 = vmax.f32 %v740_v36, 0.0 }
  0xae   :  { %v677_v32 = vpop.f32.mrf.mxu2  ;;  %v552_v38 = vpop.f32.mrf.mxu0 }
  0xaf   :  { %v741_v33 = vpop.f32.mrf.mxu3  ;;  %v678_v37 = vadd.f32 %v677_v32, %v614_v31  ;;  %v616_v39 = vpop.f32.mrf.mxu1  ;;  %v553_v45 = vadd.f32 %v1645_v10, %v552_v38 }
  0xb1   :  { %v742_v42 = vadd.f32 %v741_v33, %v678_v37  ;;  %591 = vmatmul.bf16.gmra.mxu0 %v1011_v34  ;;  %v617_v49 = vadd.f32 %v616_v39, %v553_v45 }
  0xb2   :  { %655 = vmatmul.bf16.gmra.mxu1 %v1015_v35 }
  0xb3   :  { %v795_v44 = vmax.f32 %v742_v42, 0.0  ;;  %719 = vmatmul.bf16.gmra.mxu2 %v1019_v40 }
  0xb4   :  { %783 = vmatmul.bf16.gmra.mxu3 %v1023_v41 }
  0xb5   :  { %v1247_v46 = vpack.c.bf16 %v795_v44, %v794_v43 }
  0xb6   :  { %v680_v47 = vpop.f32.mrf.mxu2  ;;  %v554_v50 = vpop.f32.mrf.mxu0 }
  0xb7   :  { %v744_v48 = vpop.f32.mrf.mxu3  ;;  %1248 = vst [vmem:[%s1753_s3] sm:$0xff] %v1247_v46   ;;  %v618_v51 = vpop.f32.mrf.mxu1  ;;  %v555_v52 = vadd.f32 %v1645_v10, %v554_v50  ;;  %v681_v55 = vadd.f32 %v680_v47, %v617_v49 }
  0xb9   :  { %v619_v62 = vadd.f32 %v618_v51, %v555_v52  ;;  %v745_v3 = vadd.f32 %v744_v48, %v681_v55 }
  0xbb   :  { %v796_v11 = vmax.f32 %v745_v3, 0.0 }
  0xbe   :  { %v682_v63 = vpop.f32.mrf.mxu2  ;;  %v557_v5 = vpop.f32.mrf.mxu0 }
  0xbf   :  { %v746_v0 = vpop.f32.mrf.mxu3  ;;  %v683_v4 = vadd.f32 %v682_v63, %v619_v62  ;;  %v621_v6 = vpop.f32.mrf.mxu1  ;;  %v558_v13 = vadd.f32 %v1645_v10, %v557_v5 }
  0xc1   :  { %v747_v9 = vadd.f32 %v746_v0, %v683_v4  ;;  %596 = vmatmul.bf16.gmra.mxu0 %v1027_v1  ;;  %v622_v17 = vadd.f32 %v621_v6, %v558_v13 }
  0xc2   :  { %660 = vmatmul.bf16.gmra.mxu1 %v1031_v2 }
  0xc3   :  { %v797_v12 = vmax.f32 %v747_v9, 0.0  ;;  %724 = vmatmul.bf16.gmra.mxu2 %v1035_v7 }
  0xc4   :  { %788 = vmatmul.bf16.gmra.mxu3 %v1039_v8 }
  0xc5   :  { %v1252_v14 = vpack.c.bf16 %v797_v12, %v796_v11 }
  0xc6   :  { %v685_v15 = vpop.f32.mrf.mxu2  ;;  %v559_v18 = vpop.f32.mrf.mxu0 }
  0xc7   :  { %v749_v16 = vpop.f32.mrf.mxu3  ;;  %1299 = vst [vmem:[%s1753_s3 + $0x8] sm:$0xff] %v1252_v14   ;;  %v623_v19 = vpop.f32.mrf.mxu1  ;;  %v560_v20 = vadd.f32 %v1645_v10, %v559_v18  ;;  %v686_v21 = vadd.f32 %v685_v15, %v622_v17 }
  0xc9   :  { %v624_v22 = vadd.f32 %v623_v19, %v560_v20  ;;  %v750_v25 = vadd.f32 %v749_v16, %v686_v21 }
  0xcb   :  { %v798_v30 = vmax.f32 %v750_v25, 0.0 }
  0xce   :  { %v687_v23 = vpop.f32.mrf.mxu2  ;;  %v562_v27 = vpop.f32.mrf.mxu0 }
  0xcf   :  { %v751_v24 = vpop.f32.mrf.mxu3  ;;  %v688_v26 = vadd.f32 %v687_v23, %v624_v22  ;;  %v626_v28 = vpop.f32.mrf.mxu1  ;;  %v563_v32 = vadd.f32 %v1645_v10, %v562_v27 }
  0xd1   :  { %v752_v29 = vadd.f32 %v751_v24, %v688_v26  ;;  %v627_v36 = vadd.f32 %v626_v28, %v563_v32 }
  0xd3   :  { %v799_v31 = vmax.f32 %v752_v29, 0.0 }
  0xd5   :  { %v1257_v33 = vpack.c.bf16 %v799_v31, %v798_v30 }
  0xd6   :  { %v690_v34 = vpop.f32.mrf.mxu2  ;;  %v564_v37 = vpop.f32.mrf.mxu0 }
  0xd7   :  { %v754_v35 = vpop.f32.mrf.mxu3  ;;  %1300 = vst [vmem:[%s1753_s3 + $0x10] sm:$0xff] %v1257_v33   ;;  %v628_v38 = vpop.f32.mrf.mxu1  ;;  %v565_v39 = vadd.f32 %v1645_v10, %v564_v37  ;;  %v691_v40 = vadd.f32 %v690_v34, %v627_v36 }
  0xd9   :  { %v629_v41 = vadd.f32 %v628_v38, %v565_v39  ;;  %v755_v44 = vadd.f32 %v754_v35, %v691_v40 }
  0xdb   :  { %v800_v49 = vmax.f32 %v755_v44, 0.0 }
  0xde   :  { %v692_v42 = vpop.f32.mrf.mxu2  ;;  %v567_v46 = vpop.f32.mrf.mxu0 }
  0xdf   :  { %v756_v43 = vpop.f32.mrf.mxu3  ;;  %v693_v45 = vadd.f32 %v692_v42, %v629_v41  ;;  %v631_v47 = vpop.f32.mrf.mxu1  ;;  %v568_v51 = vadd.f32 %v1645_v10, %v567_v46 }
  0xe1   :  { %v757_v48 = vadd.f32 %v756_v43, %v693_v45  ;;  %v632_v55 = vadd.f32 %v631_v47, %v568_v51 }
  0xe3   :  { %v801_v50 = vmax.f32 %v757_v48, 0.0 }
  0xe5   :  { %v1262_v52 = vpack.c.bf16 %v801_v50, %v800_v49 }
  0xe6   :  { %v695_v53 = vpop.f32.mrf.mxu2  ;;  %v569_v56 = vpop.f32.mrf.mxu0 }
  0xe7   :  { %v759_v54 = vpop.f32.mrf.mxu3  ;;  %1301 = vst [vmem:[%s1753_s3 + $0x18] sm:$0xff] %v1262_v52   ;;  %v633_v57 = vpop.f32.mrf.mxu1  ;;  %v570_v58 = vadd.f32 %v1645_v10, %v569_v56  ;;  %v696_v59 = vadd.f32 %v695_v53, %v632_v55 }
  0xe9   :  { %v634_v60 = vadd.f32 %v633_v57, %v570_v58  ;;  %v760_v63 = vadd.f32 %v759_v54, %v696_v59 }
  0xeb   :  { %v802_v4 = vmax.f32 %v760_v63, 0.0 }
  0xee   :  { %v697_v61 = vpop.f32.mrf.mxu2  ;;  %v572_v1 = vpop.f32.mrf.mxu0 }
  0xef   :  { %v761_v62 = vpop.f32.mrf.mxu3  ;;  %v698_v0 = vadd.f32 %v697_v61, %v634_v60  ;;  %v636_v2 = vpop.f32.mrf.mxu1  ;;  %v573_v6 = vadd.f32 %v1645_v10, %v572_v1 }
  0xf1   :  { %v762_v3 = vadd.f32 %v761_v62, %v698_v0  ;;  %v637_v11 = vadd.f32 %v636_v2, %v573_v6 }
  0xf3   :  { %v803_v5 = vmax.f32 %v762_v3, 0.0 }
  0xf5   :  { %v1267_v7 = vpack.c.bf16 %v803_v5, %v802_v4 }
  0xf6   :  { %v700_v8 = vpop.f32.mrf.mxu2  ;;  %v574_v12 = vpop.f32.mrf.mxu0 }
  0xf7   :  { %v764_v9 = vpop.f32.mrf.mxu3  ;;  %1302 = vst [vmem:[%s1753_s3 + $0x20] sm:$0xff] %v1267_v7   ;;  %v638_v13 = vpop.f32.mrf.mxu1  ;;  %v575_v14 = vadd.f32 %v1645_v10, %v574_v12  ;;  %v701_v15 = vadd.f32 %v700_v8, %v637_v11 }
  0xf9   :  { %v639_v16 = vadd.f32 %v638_v13, %v575_v14  ;;  %v765_v19 = vadd.f32 %v764_v9, %v701_v15 }
  0xfb   :  { %v804_v24 = vmax.f32 %v765_v19, 0.0 }
  0xfe   :  { %v702_v17 = vpop.f32.mrf.mxu2  ;;  %v577_v21 = vpop.f32.mrf.mxu0 }
  0xff   :  { %v766_v18 = vpop.f32.mrf.mxu3  ;;  %v703_v20 = vadd.f32 %v702_v17, %v639_v16  ;;  %v641_v22 = vpop.f32.mrf.mxu1  ;;  %v578_v26 = vadd.f32 %v1645_v10, %v577_v21 }
 0x101   :  { %v767_v23 = vadd.f32 %v766_v18, %v703_v20  ;;  %v642_v30 = vadd.f32 %v641_v22, %v578_v26 }
 0x103   :  { %v805_v25 = vmax.f32 %v767_v23, 0.0 }
 0x105   :  { %v1272_v27 = vpack.c.bf16 %v805_v25, %v804_v24 }
 0x106   :  { %v705_v28 = vpop.f32.mrf.mxu2  ;;  %v579_v31 = vpop.f32.mrf.mxu0 }
 0x107   :  { %v769_v29 = vpop.f32.mrf.mxu3  ;;  %1303 = vst [vmem:[%s1753_s3 + $0x28] sm:$0xff] %v1272_v27   ;;  %v643_v32 = vpop.f32.mrf.mxu1  ;;  %v580_v33 = vadd.f32 %v1645_v10, %v579_v31  ;;  %v706_v34 = vadd.f32 %v705_v28, %v642_v30 }
 0x109   :  { %v644_v35 = vadd.f32 %v643_v32, %v580_v33  ;;  %v770_v38 = vadd.f32 %v769_v29, %v706_v34 }
 0x10b   :  { %v806_v43 = vmax.f32 %v770_v38, 0.0 }
 0x10e   :  { %v707_v36 = vpop.f32.mrf.mxu2  ;;  %v582_v40 = vpop.f32.mrf.mxu0 }
 0x10f   :  { %v771_v37 = vpop.f32.mrf.mxu3  ;;  %v708_v39 = vadd.f32 %v707_v36, %v644_v35  ;;  %v646_v41 = vpop.f32.mrf.mxu1  ;;  %v583_v45 = vadd.f32 %v1645_v10, %v582_v40 }
 0x111   :  { %v772_v42 = vadd.f32 %v771_v37, %v708_v39  ;;  %v647_v49 = vadd.f32 %v646_v41, %v583_v45 }
 0x113   :  { %v807_v44 = vmax.f32 %v772_v42, 0.0 }
 0x115   :  { %v1277_v46 = vpack.c.bf16 %v807_v44, %v806_v43 }
 0x116   :  { %v710_v47 = vpop.f32.mrf.mxu2  ;;  %v584_v50 = vpop.f32.mrf.mxu0 }
 0x117   :  { %v774_v48 = vpop.f32.mrf.mxu3  ;;  %1304 = vst [vmem:[%s1753_s3 + $0x30] sm:$0xff] %v1277_v46   ;;  %v648_v51 = vpop.f32.mrf.mxu1  ;;  %v585_v52 = vadd.f32 %v1645_v10, %v584_v50  ;;  %v711_v53 = vadd.f32 %v710_v47, %v647_v49 }
 0x119   :  { %v649_v54 = vadd.f32 %v648_v51, %v585_v52  ;;  %v775_v57 = vadd.f32 %v774_v48, %v711_v53 }
 0x11b   :  { %v808_v62 = vmax.f32 %v775_v57, 0.0 }
 0x11e   :  { %v712_v55 = vpop.f32.mrf.mxu2  ;;  %v587_v59 = vpop.f32.mrf.mxu0 }
 0x11f   :  { %v776_v56 = vpop.f32.mrf.mxu3  ;;  %v713_v58 = vadd.f32 %v712_v55, %v649_v54  ;;  %v651_v60 = vpop.f32.mrf.mxu1  ;;  %v588_v0 = vadd.f32 %v1645_v10, %v587_v59 }
 0x121   :  { %v777_v61 = vadd.f32 %v776_v56, %v713_v58  ;;  %v652_v4 = vadd.f32 %v651_v60, %v588_v0 }
 0x123   :  { %v809_v63 = vmax.f32 %v777_v61, 0.0 }
 0x125   :  { %v1282_v1 = vpack.c.bf16 %v809_v63, %v808_v62 }
 0x126   :  { %v715_v2 = vpop.f32.mrf.mxu2  ;;  %v589_v5 = vpop.f32.mrf.mxu0 }
 0x127   :  { %v779_v3 = vpop.f32.mrf.mxu3  ;;  %1305 = vst [vmem:[%s1753_s3 + $0x38] sm:$0xff] %v1282_v1   ;;  %v653_v6 = vpop.f32.mrf.mxu1  ;;  %v590_v7 = vadd.f32 %v1645_v10, %v589_v5  ;;  %v716_v8 = vadd.f32 %v715_v2, %v652_v4 }
 0x129   :  { %v654_v9 = vadd.f32 %v653_v6, %v590_v7  ;;  %v780_v13 = vadd.f32 %v779_v3, %v716_v8 }
 0x12b   :  { %v810_v18 = vmax.f32 %v780_v13, 0.0 }
 0x12e   :  { %v717_v11 = vpop.f32.mrf.mxu2  ;;  %v592_v15 = vpop.f32.mrf.mxu0 }
 0x12f   :  { %v781_v12 = vpop.f32.mrf.mxu3  ;;  %v718_v14 = vadd.f32 %v717_v11, %v654_v9  ;;  %v656_v16 = vpop.f32.mrf.mxu1  ;;  %v593_v20 = vadd.f32 %v1645_v10, %v592_v15 }
 0x131   :  { %v782_v17 = vadd.f32 %v781_v12, %v718_v14  ;;  %v657_v24 = vadd.f32 %v656_v16, %v593_v20 }
 0x133   :  { %v811_v19 = vmax.f32 %v782_v17, 0.0 }
 0x135   :  { %v1287_v21 = vpack.c.bf16 %v811_v19, %v810_v18 }
 0x136   :  { %v720_v22 = vpop.f32.mrf.mxu2  ;;  %v594_v25 = vpop.f32.mrf.mxu0 }
 0x137   :  { %v784_v23 = vpop.f32.mrf.mxu3  ;;  %1306 = vst [vmem:[%s1753_s3 + $0x40] sm:$0xff] %v1287_v21   ;;  %v658_v26 = vpop.f32.mrf.mxu1  ;;  %v595_v27 = vadd.f32 %v1645_v10, %v594_v25  ;;  %v721_v28 = vadd.f32 %v720_v22, %v657_v24 }
 0x139   :  { %v659_v29 = vadd.f32 %v658_v26, %v595_v27  ;;  %v785_v32 = vadd.f32 %v784_v23, %v721_v28 }
 0x13b   :  { %v812_v37 = vmax.f32 %v785_v32, 0.0 }
 0x13e   :  { %v722_v30 = vpop.f32.mrf.mxu2  ;;  %v597_v34 = vpop.f32.mrf.mxu0 }
 0x13f   :  { %v786_v31 = vpop.f32.mrf.mxu3  ;;  %v723_v33 = vadd.f32 %v722_v30, %v659_v29  ;;  %v661_v36 = vpop.f32.mrf.mxu1  ;;  %v598_v39 = vadd.f32 %v1645_v10, %v597_v34 }
 0x141   :  { %v787_v35 = vadd.f32 %v786_v31, %v723_v33  ;;  %v662_v43 = vadd.f32 %v661_v36, %v598_v39 }
 0x143   :  { %v813_v38 = vmax.f32 %v787_v35, 0.0 }
 0x145   :  { %v1292_v40 = vpack.c.bf16 %v813_v38, %v812_v37 }
 0x146   :  { %v725_v41 = vpop.f32.mrf.mxu2  ;;  %v599_v44 = vpop.f32.mrf.mxu0 }
 0x147   :  { %v789_v42 = vpop.f32.mrf.mxu3  ;;  %1307 = vst [vmem:[%s1753_s3 + $0x48] sm:$0xff] %v1292_v40   ;;  %v600_v45 = vadd.f32 %v1645_v10, %v599_v44  ;;  %v726_v46 = vadd.f32 %v725_v41, %v662_v43  ;;  %v663_v47 = vpop.f32.mrf.mxu1 }
 0x149   :  { %v664_v48 = vadd.f32 %v663_v47, %v600_v45  ;;  %v790_v50 = vadd.f32 %v789_v42, %v726_v46 }
 0x14b   :  { %v814_v54 = vmax.f32 %v790_v50, 0.0 }
 0x14e   :  { %v727_v49 = vpop.f32.mrf.mxu2 }
 0x14f   :  { %v728_v51 = vadd.f32 %v727_v49, %v664_v48  ;;  %v791_v52 = vpop.f32.mrf.mxu3 }
 0x151   :  { %v792_v53 = vadd.f32 %v791_v52, %v728_v51 }
 0x153   :  { %v815_v55 = vmax.f32 %v792_v53, 0.0 }
 0x155   :  { %v1297_v56 = vpack.c.bf16 %v815_v55, %v814_v54 }
 0x157   :  { %1308 = vst [vmem:[%s1753_s3 + $0x50] sm:$0xff] %v1297_v56  }

// kernel: dqn_forward.6
= control target key start
LH: loop header
LB: loop body
LE: loop exit
PB: predicated region body
PF: predicated region fallthrough
CT: control target
= control target key end

     0   :  { %s1689_s1 = inlined_call_operand.vmem [shape: bf16[640,128], index: 1, kind: input, shape index: {}]   ;;  %s1690_s2 = inlined_call_operand.vmem [shape: f32[1,128], index: 2, kind: input, shape index: {}]   ;;  %s1691_s0 = inlined_call_operand.vmem [shape: bf16[112,640], index: 0, kind: input, shape index: {}]   ;;  %s1692_s3 = inlined_call_operand.vmem [shape: bf16[112,128], index: 3, kind: output, shape index: {}]  }
   0x1   :  { %v1170_v0 = vld [vmem:[%s1689_s1 + $0x38] sm:$0xff]  ;;  %v1169_v1 = vld [vmem:[%s1689_s1 + $0x30] sm:$0xff]  ;;  %v1168_v2 = vld [vmem:[%s1689_s1 + $0x28] sm:$0xff] }
   0x2   :  { %1244 = vmatpush.bf16.msra.mxu1 %v1170_v0  ;;  %1245 = vmatpush.bf16.msra.mxu2 %v1170_v0  ;;  %v1167_v3 = vld [vmem:[%s1689_s1 + $0x20] sm:$0xff]  ;;  %v1166_v4 = vld [vmem:[%s1689_s1 + $0x18] sm:$0xff]  ;;  %v1165_v5 = vld [vmem:[%s1689_s1 + $0x10] sm:$0xff] }
   0x3   :  { %1246 = vmatpush.bf16.msra.mxu3 %v1170_v0  ;;  %562 = vmatpush.bf16.msra.mxu0 %v1170_v0  ;;  %v1164_v6 = vld [vmem:[%s1689_s1 + $0x8] sm:$0xff]  ;;  %v1163_v7 = vld [vmem:[%s1689_s1] sm:$0xff]  ;;  %v870_v8 = vld [vmem:[%s1691_s0 + $0x50] sm:$0xf] }
   0x4   :  { %v1140_v9 = vld [vmem:[%s1691_s0 + $0x60] sm:$0xf0]  ;;  %v910_v10 = vld [vmem:[%s1691_s0 + $0xa0] sm:$0xf]  ;;  %v1150_v11 = vld [vmem:[%s1691_s0 + $0xb0] sm:$0xf0] }
   0x5   :  { %v1194_v12 = vld [vmem:[%s1689_s1 + $0xf8] sm:$0xff]  ;;  %v830_v13 = vld [vmem:[%s1691_s0] sm:$0xf]  ;;  %v1130_v14 = vld [vmem:[%s1691_s0 + $0x10] sm:$0xf0]  ;;  %v871_v18 = vor.u32 %v1140_v9, %v870_v8  ;;  %v911_v19 = vor.u32 %v1150_v11, %v910_v10 }
   0x6   :  { %1247 = vmatpush.bf16.msra.mxu1 %v1169_v1  ;;  %1248 = vmatpush.bf16.msra.mxu2 %v1169_v1  ;;  %v1186_v15 = vld [vmem:[%s1689_s1 + $0xb8] sm:$0xff]  ;;  %v950_v16 = vld [vmem:[%s1691_s0 + $0xf0] sm:$0xf]  ;;  %v1160_v17 = vld [vmem:[%s1691_s0 + $0x100] sm:$0xf0]  ;;  %v831_v21 = vor.u32 %v1130_v14, %v830_v13 }
   0x7   :  { %1249 = vmatpush.bf16.msra.mxu3 %v1169_v1  ;;  %563 = vmatpush.bf16.msra.mxu0 %v1169_v1  ;;  %v1178_v20 = vld [vmem:[%s1689_s1 + $0x78] sm:$0xff]  ;;  %v951_v23 = vor.u32 %v1160_v17, %v950_v16  ;;  %v1193_v24 = vld [vmem:[%s1689_s1 + $0xf0] sm:$0xff]  ;;  %v1192_v28 = vld [vmem:[%s1689_s1 + $0xe8] sm:$0xff] }
   0x8   :  { %v1202_v22 = vld [vmem:[%s1689_s1 + $0x138] sm:$0xff]  ;;  %v1185_v25 = vld [vmem:[%s1689_s1 + $0xb0] sm:$0xff]  ;;  %v1184_v29 = vld [vmem:[%s1689_s1 + $0xa8] sm:$0xff] }
   0x9   :  { %v1177_v26 = vld [vmem:[%s1689_s1 + $0x70] sm:$0xff]  ;;  %v1176_v30 = vld [vmem:[%s1689_s1 + $0x68] sm:$0xff]  ;;  %v1191_v32 = vld [vmem:[%s1689_s1 + $0xe0] sm:$0xff] }
   0xa   :  { %1250 = vmatpush.bf16.msra.mxu1 %v1168_v2  ;;  %1251 = vmatpush.bf16.msra.mxu2 %v1168_v2  ;;  %v1201_v27 = vld [vmem:[%s1689_s1 + $0x130] sm:$0xff]  ;;  %v1200_v31 = vld [vmem:[%s1689_s1 + $0x128] sm:$0xff]  ;;  %v1183_v33 = vld [vmem:[%s1689_s1 + $0xa0] sm:$0xff] }
   0xb   :  { %1252 = vmatpush.bf16.msra.mxu3 %v1168_v2  ;;  %564 = vmatpush.bf16.msra.mxu0 %v1168_v2  ;;  %v1175_v34 = vld [vmem:[%s1689_s1 + $0x60] sm:$0xff]  ;;  %v890_v35 = vld [vmem:[%s1691_s0 + $0x78] sm:$0xf]  ;;  %v1145_v36 = vld [vmem:[%s1691_s0 + $0x88] sm:$0xf0] }
   0xc   :  { %v930_v37 = vld [vmem:[%s1691_s0 + $0xc8] sm:$0xf]  ;;  %v1155_v38 = vld [vmem:[%s1691_s0 + $0xd8] sm:$0xf0]  ;;  %v1199_v39 = vld [vmem:[%s1689_s1 + $0x120] sm:$0xff]  ;;  %v891_v44 = vor.u32 %v1145_v36, %v890_v35 }
   0xd   :  { %v850_v40 = vld [vmem:[%s1691_s0 + $0x28] sm:$0xf]  ;;  %v1135_v41 = vld [vmem:[%s1691_s0 + $0x38] sm:$0xf0]  ;;  %v931_v45 = vor.u32 %v1155_v38, %v930_v37  ;;  %v1189_v49 = vld [vmem:[%s1689_s1 + $0xd0] sm:$0xff] }
   0xe   :  { %1253 = vmatpush.bf16.msra.mxu1 %v1167_v3  ;;  %1254 = vmatpush.bf16.msra.mxu2 %v1167_v3  ;;  %v1190_v42 = vld [vmem:[%s1689_s1 + $0xd8] sm:$0xff]  ;;  %v851_v47 = vor.u32 %v1135_v41, %v850_v40  ;;  %v1181_v50 = vld [vmem:[%s1689_s1 + $0x90] sm:$0xff]  ;;  %v1188_v53 = vld [vmem:[%s1689_s1 + $0xc8] sm:$0xff] }
   0xf   :  { %1255 = vmatpush.bf16.msra.mxu3 %v1167_v3  ;;  %565 = vmatpush.bf16.msra.mxu0 %v1167_v3  ;;  %v1182_v43 = vld [vmem:[%s1689_s1 + $0x98] sm:$0xff]  ;;  %v1173_v51 = vld [vmem:[%s1689_s1 + $0x50] sm:$0xff]  ;;  %v1180_v54 = vld [vmem:[%s1689_s1 + $0x88] sm:$0xff] }
  0x10   :  { %v1174_v46 = vld [vmem:[%s1689_s1 + $0x58] sm:$0xff]  ;;  %v1197_v52 = vld [vmem:[%s1689_s1 + $0x110] sm:$0xff]  ;;  %v1172_v55 = vld [vmem:[%s1689_s1 + $0x48] sm:$0xff] }
  0x11   :  { %v1198_v48 = vld [vmem:[%s1689_s1 + $0x118] sm:$0xff]  ;;  %v1187_v56 = vld [vmem:[%s1689_s1 + $0xc0] sm:$0xff]  ;;  %v1196_v57 = vld [vmem:[%s1689_s1 + $0x108] sm:$0xff] }
  0x12   :  { %1256 = vmatpush.bf16.msra.mxu1 %v1166_v4  ;;  %1257 = vmatpush.bf16.msra.mxu2 %v1166_v4  ;;  %v1179_v58 = vld [vmem:[%s1689_s1 + $0x80] sm:$0xff]  ;;  %v1129_v59 = vld [vmem:[%s1691_s0 + $0xc] sm:$0xf]  ;;  %v832_v63 = vld [vmem:[%s1691_s0 + $0x14] sm:$0xf0] }
  0x13   :  { %1258 = vmatpush.bf16.msra.mxu3 %v1166_v4  ;;  %566 = vmatpush.bf16.msra.mxu0 %v1166_v4  ;;  %v840_v60 = vld [vmem:[%s1691_s0 + $0x1c] sm:$0xf0]  ;;  %v1128_v62 = vld [vmem:[%s1691_s0 + $0x4] sm:$0xf]  ;;  %v838_v0 = vld [vmem:[%s1691_s0 + $0x8] sm:$0xf] }
  0x14   :  { %v1171_v61 = vld [vmem:[%s1689_s1 + $0x40] sm:$0xff]  ;;  %v1131_v1 = vld [vmem:[%s1691_s0 + $0x18] sm:$0xf0]  ;;  %v843_v2 = vor.u32 %v1129_v59, %v840_v60  ;;  %v846_v4 = vld [vmem:[%s1691_s0 + $0x10] sm:$0xf] }
  0x15   :  { %v1195_v3 = vld [vmem:[%s1689_s1 + $0x100] sm:$0xff]  ;;  %v1134_v9 = vld [vmem:[%s1691_s0 + $0x34] sm:$0xf]  ;;  %v860_v10 = vld [vmem:[%s1691_s0 + $0x44] sm:$0xf0] }
  0x16   :  { %1259 = vmatpush.bf16.msra.mxu1 %v1165_v5  ;;  %1260 = vmatpush.bf16.msra.mxu2 %v1165_v5  ;;  %v1133_v11 = vld [vmem:[%s1691_s0 + $0x2c] sm:$0xf]  ;;  %v858_v13 = vld [vmem:[%s1691_s0 + $0x30] sm:$0xf]  ;;  %v1136_v14 = vld [vmem:[%s1691_s0 + $0x40] sm:$0xf0] }
  0x17   :  { %1261 = vmatpush.bf16.msra.mxu3 %v1165_v5  ;;  %567 = vmatpush.bf16.msra.mxu0 %v1165_v5  ;;  %v1132_v5 = vld [vmem:[%s1691_s0 + $0x20] sm:$0xf0]  ;;  %v866_v16 = vld [vmem:[%s1691_s0 + $0x38] sm:$0xf]  ;;  %v1137_v17 = vld [vmem:[%s1691_s0 + $0x48] sm:$0xf0] }
  0x18   :  { %v847_v8 = vor.u32 %v1132_v5, %v846_v4  ;;  %v1143_v35 = vld [vmem:[%s1691_s0 + $0x7c] sm:$0xf]  ;;  %v892_v36 = vld [vmem:[%s1691_s0 + $0x8c] sm:$0xf0]  ;;  %v898_v37 = vld [vmem:[%s1691_s0 + $0x80] sm:$0xf] }
  0x19   :  { %v1146_v38 = vld [vmem:[%s1691_s0 + $0x90] sm:$0xf0]  ;;  %v906_v40 = vld [vmem:[%s1691_s0 + $0x88] sm:$0xf]  ;;  %v1147_v41 = vld [vmem:[%s1691_s0 + $0x98] sm:$0xf0] }
  0x1a   :  { %1262 = vmatpush.bf16.msra.mxu1 %v1164_v6  ;;  %1263 = vmatpush.bf16.msra.mxu2 %v1164_v6  ;;  %v1153_v59 = vld [vmem:[%s1691_s0 + $0xcc] sm:$0xf]  ;;  %v932_v60 = vld [vmem:[%s1691_s0 + $0xdc] sm:$0xf0]  ;;  %v1159_v5 = vld [vmem:[%s1691_s0 + $0xfc] sm:$0xf] }
  0x1b   :  { %1264 = vmatpush.bf16.msra.mxu3 %v1164_v6  ;;  %568 = vmatpush.bf16.msra.mxu0 %v1164_v6  ;;  %v835_v6 = vor.u32 %v1128_v62, %v832_v63  ;;  %v1156_v62 = vld [vmem:[%s1691_s0 + $0xe0] sm:$0xf0] }
  0x1e   :  { %1265 = vmatpush.bf16.msra.mxu1 %v1163_v7  ;;  %1266 = vmatpush.bf16.msra.mxu2 %v1163_v7 }
  0x1f   :  { %1267 = vmatpush.bf16.msra.mxu3 %v1163_v7  ;;  %569 = vmatpush.bf16.msra.mxu0 %v1163_v7  ;;  %v839_v7 = vor.u32 %v1131_v1, %v838_v0  ;;  %v946_v0 = vld [vmem:[%s1691_s0 + $0xd8] sm:$0xf]  ;;  %v1157_v1 = vld [vmem:[%s1691_s0 + $0xe8] sm:$0xf0] }
  0x20   :  { %v947_v4 = vor.u32 %v1157_v1, %v946_v0 }
  0x21   :  { %580 = vmatmul.bf16.vlgmr.msra.gmra.mxu1 %v871_v18  ;;  %590 = vmatmul.bf16.vlgmr.msra.gmra.mxu2 %v911_v19  ;;  %v859_v19 = vor.u32 %v1136_v14, %v858_v13  ;;  %v1162_v13 = vld [vmem:[%s1691_s0 + $0x110] sm:$0xf0] }
  0x22   :  { %650 = vmatpush.bf16.msrb.mxu2 %v1186_v15  ;;  %606 = vmatpush.bf16.msrb.mxu1 %v1178_v20  ;;  %v863_v15 = vor.u32 %v1134_v9, %v860_v10  ;;  %v867_v20 = vor.u32 %v1137_v17, %v866_v16  ;;  %v958_v9 = vld [vmem:[%s1691_s0 + $0xf8] sm:$0xf]  ;;  %v1161_v10 = vld [vmem:[%s1691_s0 + $0x108] sm:$0xf0] }
  0x23   :  { %694 = vmatpush.bf16.msrb.mxu3 %v1194_v12  ;;  %570 = vmatmul.bf16.vlgmr.msra.gmra.mxu0 %v831_v21  ;;  %v852_v12 = vld [vmem:[%s1691_s0 + $0x3c] sm:$0xf0]  ;;  %v1139_v21 = vld [vmem:[%s1691_s0 + $0x5c] sm:$0xf] }
  0x24   :  { %738 = vmatpush.bf16.msrb.mxu0 %v1202_v22  ;;  %600 = vmatmul.bf16.vlgmr.msra.gmra.mxu3 %v951_v23  ;;  %v855_v18 = vor.u32 %v1133_v11, %v852_v12  ;;  %v880_v22 = vld [vmem:[%s1691_s0 + $0x6c] sm:$0xf0]  ;;  %v1138_v23 = vld [vmem:[%s1691_s0 + $0x54] sm:$0xf]  ;;  %v966_v12 = vld [vmem:[%s1691_s0 + $0x100] sm:$0xf] }
  0x25   :  { %v967_v17 = vor.u32 %v1162_v13, %v966_v12 }
  0x26   :  { %651 = vmatpush.bf16.msrb.mxu2 %v1185_v25  ;;  %607 = vmatpush.bf16.msrb.mxu1 %v1177_v26  ;;  %v878_v25 = vld [vmem:[%s1691_s0 + $0x58] sm:$0xf]  ;;  %v1141_v26 = vld [vmem:[%s1691_s0 + $0x68] sm:$0xf0] }
  0x27   :  { %695 = vmatpush.bf16.msrb.mxu3 %v1193_v24  ;;  %v872_v24 = vld [vmem:[%s1691_s0 + $0x64] sm:$0xf0] }
  0x28   :  { %739 = vmatpush.bf16.msrb.mxu0 %v1201_v27  ;;  %v883_v27 = vor.u32 %v1139_v21, %v880_v22 }
  0x2a   :  { %652 = vmatpush.bf16.msrb.mxu2 %v1184_v29  ;;  %608 = vmatpush.bf16.msrb.mxu1 %v1176_v30  ;;  %v1142_v29 = vld [vmem:[%s1691_s0 + $0x70] sm:$0xf0]  ;;  %v875_v30 = vor.u32 %v1138_v23, %v872_v24 }
  0x2b   :  { %696 = vmatpush.bf16.msrb.mxu3 %v1192_v28  ;;  %v886_v28 = vld [vmem:[%s1691_s0 + $0x60] sm:$0xf] }
  0x2c   :  { %740 = vmatpush.bf16.msrb.mxu0 %v1200_v31  ;;  %v879_v31 = vor.u32 %v1141_v26, %v878_v25 }
  0x2e   :  { %653 = vmatpush.bf16.msrb.mxu2 %v1183_v33  ;;  %609 = vmatpush.bf16.msrb.mxu1 %v1175_v34  ;;  %v1144_v33 = vld [vmem:[%s1691_s0 + $0x84] sm:$0xf]  ;;  %v900_v34 = vld [vmem:[%s1691_s0 + $0x94] sm:$0xf0] }
  0x2f   :  { %697 = vmatpush.bf16.msrb.mxu3 %v1191_v32  ;;  %v887_v32 = vor.u32 %v1142_v29, %v886_v28 }
  0x30   :  { %741 = vmatpush.bf16.msrb.mxu0 %v1199_v39  ;;  %v903_v39 = vor.u32 %v1144_v33, %v900_v34 }
  0x31   :  { %585 = vmatmul.bf16.gmra.mxu1 %v891_v44  ;;  %595 = vmatmul.bf16.gmra.mxu2 %v931_v45  ;;  %v907_v44 = vor.u32 %v1147_v41, %v906_v40  ;;  %v1149_v45 = vld [vmem:[%s1691_s0 + $0xac] sm:$0xf] }
  0x32   :  { %654 = vmatpush.bf16.msrb.mxu2 %v1182_v43  ;;  %610 = vmatpush.bf16.msrb.mxu1 %v1174_v46  ;;  %v899_v43 = vor.u32 %v1146_v38, %v898_v37  ;;  %v920_v46 = vld [vmem:[%s1691_s0 + $0xbc] sm:$0xf0] }
  0x33   :  { %698 = vmatpush.bf16.msrb.mxu3 %v1190_v42  ;;  %575 = vmatmul.bf16.gmra.mxu0 %v851_v47  ;;  %v895_v42 = vor.u32 %v1143_v35, %v892_v36  ;;  %v1148_v47 = vld [vmem:[%s1691_s0 + $0xa4] sm:$0xf] }
  0x34   :  { %742 = vmatpush.bf16.msrb.mxu0 %v1198_v48  ;;  %v912_v48 = vld [vmem:[%s1691_s0 + $0xb4] sm:$0xf0] }
  0x36   :  { %655 = vmatpush.bf16.msrb.mxu2 %v1181_v50  ;;  %611 = vmatpush.bf16.msrb.mxu1 %v1173_v51  ;;  %v1151_v50 = vld [vmem:[%s1691_s0 + $0xb8] sm:$0xf0]  ;;  %v923_v51 = vor.u32 %v1149_v45, %v920_v46 }
  0x37   :  { %699 = vmatpush.bf16.msrb.mxu3 %v1189_v49  ;;  %v918_v49 = vld [vmem:[%s1691_s0 + $0xa8] sm:$0xf] }
  0x38   :  { %743 = vmatpush.bf16.msrb.mxu0 %v1197_v52  ;;  %v926_v52 = vld [vmem:[%s1691_s0 + $0xb0] sm:$0xf] }
  0x3a   :  { %656 = vmatpush.bf16.msrb.mxu2 %v1180_v54  ;;  %612 = vmatpush.bf16.msrb.mxu1 %v1172_v55  ;;  %v915_v54 = vor.u32 %v1148_v47, %v912_v48  ;;  %v919_v55 = vor.u32 %v1151_v50, %v918_v49 }
  0x3b   :  { %700 = vmatpush.bf16.msrb.mxu3 %v1188_v53  ;;  %v1152_v53 = vld [vmem:[%s1691_s0 + $0xc0] sm:$0xf0] }
  0x3c   :  { %744 = vmatpush.bf16.msrb.mxu0 %v1196_v57  ;;  %v1154_v57 = vld [vmem:[%s1691_s0 + $0xd4] sm:$0xf] }
  0x3e   :  { %657 = vmatpush.bf16.msrb.mxu2 %v1179_v58  ;;  %613 = vmatpush.bf16.msrb.mxu1 %v1171_v61  ;;  %v940_v58 = vld [vmem:[%s1691_s0 + $0xe4] sm:$0xf0]  ;;  %v938_v61 = vld [vmem:[%s1691_s0 + $0xd0] sm:$0xf] }
  0x3f   :  { %701 = vmatpush.bf16.msrb.mxu3 %v1187_v56  ;;  %v927_v56 = vor.u32 %v1152_v53, %v926_v52  ;;  %v943_v63 = vor.u32 %v1154_v57, %v940_v58 }
  0x40   :  { %745 = vmatpush.bf16.msrb.mxu0 %v1195_v3  ;;  %v939_v3 = vor.u32 %v1156_v62, %v938_v61 }
  0x41   :  { %614 = vmatmul.bf16.vlgmr.msrb.gmra.mxu1 %v835_v6  ;;  %658 = vmatmul.bf16.vlgmr.msrb.gmra.mxu2 %v839_v7  ;;  %v960_v6 = vld [vmem:[%s1691_s0 + $0x10c] sm:$0xf0]  ;;  %v1158_v7 = vld [vmem:[%s1691_s0 + $0xf4] sm:$0xf] }
  0x42   :  { %702 = vmatmul.bf16.vlgmr.msrb.gmra.mxu3 %v843_v2  ;;  %v935_v2 = vor.u32 %v1153_v59, %v932_v60  ;;  %v963_v11 = vor.u32 %v1159_v5, %v960_v6 }
  0x43   :  { %746 = vmatmul.bf16.vlgmr.msrb.gmra.mxu0 %v847_v8  ;;  %v952_v8 = vld [vmem:[%s1691_s0 + $0x104] sm:$0xf0] }
  0x44   :  { %v955_v14 = vor.u32 %v1158_v7, %v952_v8 }
  0x51   :  { %619 = vmatmul.bf16.gmra.mxu1 %v855_v18  ;;  %663 = vmatmul.bf16.gmra.mxu2 %v859_v19  ;;  %v1624_v19 = vld [vmem:[%s1690_s2] ss:$0 sm:$0xff] }
  0x52   :  { %707 = vmatmul.bf16.gmra.mxu3 %v863_v15  ;;  %v959_v15 = vor.u32 %v1161_v10, %v958_v9 }
  0x53   :  { %751 = vmatmul.bf16.gmra.mxu0 %v867_v20 }
  0x61   :  { %624 = vmatmul.bf16.gmra.mxu1 %v875_v30  ;;  %668 = vmatmul.bf16.gmra.mxu2 %v879_v31 }
  0x62   :  { %712 = vmatmul.bf16.gmra.mxu3 %v883_v27 }
  0x63   :  { %756 = vmatmul.bf16.gmra.mxu0 %v887_v32 }
  0x71   :  { %629 = vmatmul.bf16.gmra.mxu1 %v895_v42  ;;  %673 = vmatmul.bf16.gmra.mxu2 %v899_v43 }
  0x72   :  { %717 = vmatmul.bf16.gmra.mxu3 %v903_v39 }
  0x73   :  { %761 = vmatmul.bf16.gmra.mxu0 %v907_v44 }
  0x81   :  { %634 = vmatmul.bf16.gmra.mxu1 %v915_v54  ;;  %678 = vmatmul.bf16.gmra.mxu2 %v919_v55 }
  0x82   :  { %722 = vmatmul.bf16.gmra.mxu3 %v923_v51 }
  0x83   :  { %766 = vmatmul.bf16.gmra.mxu0 %v927_v56 }
  0x91   :  { %639 = vmatmul.bf16.gmra.mxu1 %v935_v2  ;;  %683 = vmatmul.bf16.gmra.mxu2 %v939_v3 }
  0x92   :  { %727 = vmatmul.bf16.gmra.mxu3 %v943_v63 }
  0x93   :  { %771 = vmatmul.bf16.gmra.mxu0 %v947_v4 }
  0x9e   :  { %v1619_v16 = vpop.f32.mrf.mxu1 }
  0xa0   :  { %v571_v18 = vpop.f32.mrf.mxu0 }
  0xa1   :  { %644 = vmatmul.bf16.gmra.mxu1 %v955_v14  ;;  %688 = vmatmul.bf16.gmra.mxu2 %v959_v15  ;;  %v572_v41 = vadd.f32 %v1624_v19, %v571_v18 }
  0xa2   :  { %732 = vmatmul.bf16.gmra.mxu3 %v963_v11 }
  0xa3   :  { %776 = vmatmul.bf16.gmra.mxu0 %v967_v17  ;;  %v582_v17 = vadd.f32 %v1624_v19, %v1619_v16 }
  0xa4   :  { %v591_v20 = vpop.f32.mrf.mxu2 }
  0xa5   :  { %v1627_v21 = vadd.f32 %v1624_v19, %v591_v20 }
  0xa6   :  { %v1629_v22 = vpop.f32.mrf.mxu1 }
  0xa7   :  { %v601_v23 = vpop.f32.mrf.mxu3 }
  0xa8   :  { %v573_v24 = vpop.f32.mrf.mxu0  ;;  %v1632_v25 = vadd.f32 %v1624_v19, %v601_v23 }
  0xa9   :  { %v574_v47 = vadd.f32 %v1624_v19, %v573_v24 }
  0xac   :  { %v593_v26 = vpop.f32.mrf.mxu2 }
  0xad   :  { %v1635_v27 = vadd.f32 %v1624_v19, %v593_v26 }
  0xae   :  { %v1637_v28 = vpop.f32.mrf.mxu1 }
  0xaf   :  { %v603_v29 = vpop.f32.mrf.mxu3 }
  0xb0   :  { %v576_v30 = vpop.f32.mrf.mxu0  ;;  %v1640_v31 = vadd.f32 %v1624_v19, %v603_v29 }
  0xb1   :  { %v577_v59 = vadd.f32 %v1624_v19, %v576_v30 }
  0xb4   :  { %v596_v32 = vpop.f32.mrf.mxu2 }
  0xb5   :  { %v1643_v33 = vadd.f32 %v1624_v19, %v596_v32 }
  0xb6   :  { %v1645_v34 = vpop.f32.mrf.mxu1 }
  0xb8   :  { %v578_v35 = vpop.f32.mrf.mxu0 }
  0xb9   :  { %v579_v4 = vadd.f32 %v1624_v19, %v578_v35  ;;  %v584_v35 = vadd.f32 %v1624_v19, %v1629_v22 }
  0xbc   :  { %v598_v36 = vpop.f32.mrf.mxu2 }
  0xbd   :  { %v1648_v37 = vadd.f32 %v1624_v19, %v598_v36 }
  0xbe   :  { %v615_v38 = vpop.f32.mrf.mxu1 }
  0xbf   :  { %v616_v43 = vadd.f32 %v615_v38, %v572_v41 }
  0xc0   :  { %v747_v39 = vpop.f32.mrf.mxu0 }
  0xc4   :  { %v659_v42 = vpop.f32.mrf.mxu2 }
  0xc5   :  { %v703_v40 = vpop.f32.mrf.mxu3  ;;  %v660_v45 = vadd.f32 %v659_v42, %v616_v43 }
  0xc6   :  { %v617_v44 = vpop.f32.mrf.mxu1 }
  0xc7   :  { %v704_v49 = vadd.f32 %v703_v40, %v660_v45  ;;  %v618_v50 = vadd.f32 %v617_v44, %v574_v47  ;;  %v587_v47 = vadd.f32 %v1624_v19, %v1637_v28 }
  0xc8   :  { %v749_v46 = vpop.f32.mrf.mxu0 }
  0xc9   :  { %v748_v54 = vadd.f32 %v747_v39, %v704_v49 }
  0xcb   :  { %v782_v60 = vmax.f32 %v748_v54, 0.0 }
  0xcc   :  { %v661_v51 = vpop.f32.mrf.mxu2 }
  0xcd   :  { %v705_v48 = vpop.f32.mrf.mxu3  ;;  %v662_v52 = vadd.f32 %v661_v51, %v618_v50 }
  0xce   :  { %v620_v53 = vpop.f32.mrf.mxu1 }
  0xcf   :  { %v706_v55 = vadd.f32 %v705_v48, %v662_v52  ;;  %v621_v0 = vadd.f32 %v620_v53, %v577_v59 }
  0xd0   :  { %v752_v56 = vpop.f32.mrf.mxu0 }
  0xd1   :  { %v750_v57 = vadd.f32 %v749_v46, %v706_v55  ;;  %v589_v55 = vadd.f32 %v1624_v19, %v1645_v34 }
  0xd3   :  { %v783_v61 = vmax.f32 %v750_v57, 0.0 }
  0xd4   :  { %v664_v62 = vpop.f32.mrf.mxu2 }
  0xd5   :  { %v708_v58 = vpop.f32.mrf.mxu3  ;;  %v1206_v63 = vpack.c.bf16 %v783_v61, %v782_v60  ;;  %v665_v2 = vadd.f32 %v664_v62, %v621_v0 }
  0xd6   :  { %v622_v1 = vpop.f32.mrf.mxu1 }
  0xd7   :  { %1207 = vst [vmem:[%s1692_s3] sm:$0xff] %v1206_v63   ;;  %v709_v6 = vadd.f32 %v708_v58, %v665_v2  ;;  %v623_v7 = vadd.f32 %v622_v1, %v579_v4 }
  0xd8   :  { %v754_v3 = vpop.f32.mrf.mxu0 }
  0xd9   :  { %v753_v11 = vadd.f32 %v752_v56, %v709_v6 }
  0xdb   :  { %v784_v18 = vmax.f32 %v753_v11, 0.0 }
  0xdc   :  { %v666_v8 = vpop.f32.mrf.mxu2 }
  0xdd   :  { %v710_v5 = vpop.f32.mrf.mxu3  ;;  %v667_v9 = vadd.f32 %v666_v8, %v623_v7 }
  0xde   :  { %v625_v10 = vpop.f32.mrf.mxu1 }
  0xdf   :  { %v711_v12 = vadd.f32 %v710_v5, %v667_v9  ;;  %v626_v26 = vadd.f32 %v625_v10, %v582_v17 }
  0xe0   :  { %v757_v13 = vpop.f32.mrf.mxu0 }
  0xe1   :  { %v755_v14 = vadd.f32 %v754_v3, %v711_v12 }
  0xe3   :  { %v785_v20 = vmax.f32 %v755_v14, 0.0 }
  0xe4   :  { %v669_v23 = vpop.f32.mrf.mxu2 }
  0xe5   :  { %v713_v15 = vpop.f32.mrf.mxu3  ;;  %v1211_v24 = vpack.c.bf16 %v785_v20, %v784_v18  ;;  %v670_v30 = vadd.f32 %v669_v23, %v626_v26 }
  0xe6   :  { %v627_v29 = vpop.f32.mrf.mxu1 }
  0xe7   :  { %1238 = vst [vmem:[%s1692_s3 + $0x8] sm:$0xff] %v1211_v24   ;;  %v714_v38 = vadd.f32 %v713_v15, %v670_v30  ;;  %v628_v39 = vadd.f32 %v627_v29, %v584_v35 }
  0xe8   :  { %v759_v32 = vpop.f32.mrf.mxu0 }
  0xe9   :  { %v758_v42 = vadd.f32 %v757_v13, %v714_v38 }
  0xeb   :  { %v786_v48 = vmax.f32 %v758_v42, 0.0 }
  0xec   :  { %v671_v40 = vpop.f32.mrf.mxu2 }
  0xed   :  { %v715_v36 = vpop.f32.mrf.mxu3  ;;  %v672_v16 = vadd.f32 %v671_v40, %v628_v39 }
  0xee   :  { %v630_v41 = vpop.f32.mrf.mxu1 }
  0xef   :  { %v716_v43 = vadd.f32 %v715_v36, %v672_v16  ;;  %v631_v52 = vadd.f32 %v630_v41, %v587_v47 }
  0xf0   :  { %v762_v44 = vpop.f32.mrf.mxu0 }
  0xf1   :  { %v760_v45 = vadd.f32 %v759_v32, %v716_v43 }
  0xf3   :  { %v787_v49 = vmax.f32 %v760_v45, 0.0 }
  0xf4   :  { %v674_v50 = vpop.f32.mrf.mxu2 }
  0xf5   :  { %v718_v46 = vpop.f32.mrf.mxu3  ;;  %v1216_v51 = vpack.c.bf16 %v787_v49, %v786_v48  ;;  %v675_v53 = vadd.f32 %v674_v50, %v631_v52 }
  0xf6   :  { %v632_v22 = vpop.f32.mrf.mxu1 }
  0xf7   :  { %1239 = vst [vmem:[%s1692_s3 + $0x10] sm:$0xff] %v1216_v51   ;;  %v719_v57 = vadd.f32 %v718_v46, %v675_v53  ;;  %v633_v58 = vadd.f32 %v632_v22, %v589_v55 }
  0xf8   :  { %v764_v54 = vpop.f32.mrf.mxu0 }
  0xf9   :  { %v763_v61 = vadd.f32 %v762_v44, %v719_v57 }
  0xfb   :  { %v788_v2 = vmax.f32 %v763_v61, 0.0 }
  0xfc   :  { %v676_v59 = vpop.f32.mrf.mxu2 }
  0xfd   :  { %v720_v56 = vpop.f32.mrf.mxu3  ;;  %v677_v28 = vadd.f32 %v676_v59, %v633_v58 }
  0xfe   :  { %v635_v60 = vpop.f32.mrf.mxu1 }
  0xff   :  { %v721_v62 = vadd.f32 %v720_v56, %v677_v28  ;;  %v636_v6 = vadd.f32 %v635_v60, %v1627_v21 }
 0x100   :  { %v767_v63 = vpop.f32.mrf.mxu0 }
 0x101   :  { %v765_v0 = vadd.f32 %v764_v54, %v721_v62 }
 0x103   :  { %v789_v3 = vmax.f32 %v765_v0, 0.0 }
 0x104   :  { %v679_v4 = vpop.f32.mrf.mxu2 }
 0x105   :  { %v723_v1 = vpop.f32.mrf.mxu3  ;;  %v1221_v5 = vpack.c.bf16 %v789_v3, %v788_v2  ;;  %v680_v19 = vadd.f32 %v679_v4, %v636_v6 }
 0x106   :  { %v637_v7 = vpop.f32.mrf.mxu1 }
 0x107   :  { %1240 = vst [vmem:[%s1692_s3 + $0x18] sm:$0xff] %v1221_v5   ;;  %v724_v9 = vadd.f32 %v723_v1, %v680_v19  ;;  %v638_v10 = vadd.f32 %v637_v7, %v1635_v27 }
 0x108   :  { %v769_v34 = vpop.f32.mrf.mxu0 }
 0x109   :  { %v768_v14 = vadd.f32 %v767_v63, %v724_v9 }
 0x10b   :  { %v790_v21 = vmax.f32 %v768_v14, 0.0 }
 0x10c   :  { %v681_v11 = vpop.f32.mrf.mxu2 }
 0x10d   :  { %v725_v8 = vpop.f32.mrf.mxu3  ;;  %v682_v12 = vadd.f32 %v681_v11, %v638_v10 }
 0x10e   :  { %v640_v13 = vpop.f32.mrf.mxu1 }
 0x10f   :  { %v726_v15 = vadd.f32 %v725_v8, %v682_v12  ;;  %v641_v29 = vadd.f32 %v640_v13, %v1643_v33 }
 0x110   :  { %v772_v18 = vpop.f32.mrf.mxu0 }
 0x111   :  { %v770_v17 = vadd.f32 %v769_v34, %v726_v15 }
 0x113   :  { %v791_v23 = vmax.f32 %v770_v17, 0.0 }
 0x114   :  { %v684_v24 = vpop.f32.mrf.mxu2 }
 0x115   :  { %v728_v20 = vpop.f32.mrf.mxu3  ;;  %v1226_v26 = vpack.c.bf16 %v791_v23, %v790_v21  ;;  %v685_v27 = vadd.f32 %v684_v24, %v641_v29 }
 0x116   :  { %v642_v30 = vpop.f32.mrf.mxu1 }
 0x117   :  { %1241 = vst [vmem:[%s1692_s3 + $0x20] sm:$0xff] %v1226_v26   ;;  %v729_v35 = vadd.f32 %v728_v20, %v685_v27  ;;  %v643_v36 = vadd.f32 %v642_v30, %v1648_v37 }
 0x118   :  { %v774_v38 = vpop.f32.mrf.mxu0 }
 0x119   :  { %v773_v41 = vadd.f32 %v772_v18, %v729_v35 }
 0x11b   :  { %v792_v44 = vmax.f32 %v773_v41, 0.0 }
 0x11c   :  { %v686_v39 = vpop.f32.mrf.mxu2 }
 0x11d   :  { %v730_v32 = vpop.f32.mrf.mxu3  ;;  %v687_v40 = vadd.f32 %v686_v39, %v643_v36 }
 0x11e   :  { %v645_v16 = vpop.f32.mrf.mxu1 }
 0x11f   :  { %v731_v42 = vadd.f32 %v730_v32, %v687_v40  ;;  %v646_v48 = vadd.f32 %v645_v16, %v1632_v25 }
 0x120   :  { %v777_v49 = vpop.f32.mrf.mxu0 }
 0x121   :  { %v775_v43 = vadd.f32 %v774_v38, %v731_v42 }
 0x123   :  { %v793_v45 = vmax.f32 %v775_v43, 0.0 }
 0x124   :  { %v689_v46 = vpop.f32.mrf.mxu2 }
 0x125   :  { %v733_v33 = vpop.f32.mrf.mxu3  ;;  %v1231_v47 = vpack.c.bf16 %v793_v45, %v792_v44  ;;  %v690_v37 = vadd.f32 %v689_v46, %v646_v48 }
 0x126   :  { %v647_v50 = vpop.f32.mrf.mxu1 }
 0x127   :  { %1242 = vst [vmem:[%s1692_s3 + $0x28] sm:$0xff] %v1231_v47   ;;  %v734_v51 = vadd.f32 %v733_v33, %v690_v37  ;;  %v648_v52 = vadd.f32 %v647_v50, %v1640_v31 }
 0x128   :  { %v779_v57 = vpop.f32.mrf.mxu0 }
 0x129   :  { %v778_v55 = vadd.f32 %v777_v49, %v734_v51 }
 0x12b   :  { %v794_v59 = vmax.f32 %v778_v55, 0.0 }
 0x12c   :  { %v691_v22 = vpop.f32.mrf.mxu2 }
 0x12d   :  { %v692_v53 = vadd.f32 %v691_v22, %v648_v52  ;;  %v735_v54 = vpop.f32.mrf.mxu3 }
 0x12f   :  { %v736_v56 = vadd.f32 %v735_v54, %v692_v53 }
 0x131   :  { %v780_v58 = vadd.f32 %v779_v57, %v736_v56 }
 0x133   :  { %v795_v28 = vmax.f32 %v780_v58, 0.0 }
 0x135   :  { %v1236_v25 = vpack.c.bf16 %v795_v28, %v794_v59 }
 0x137   :  { %1243 = vst [vmem:[%s1692_s3 + $0x30] sm:$0xff] %v1236_v25  }

// kernel: dqn_forward.7
= control target key start
LH: loop header
LB: loop body
LE: loop exit
PB: predicated region body
PF: predicated region fallthrough
CT: control target
= control target key end

     0   :  { %s3184_s18 = smov 0   ;;  %s3186_s19 = smov 0   ;;  %s3723_s0 = inlined_call_operand.vmem [shape: bf16[16,3200], index: 0, kind: input, shape index: {}]   ;;  %s3724_s1 = inlined_call_operand.vmem [shape: bf16[3200,512], index: 1, kind: input, shape index: {}]   ;;  %s3725_s2 = inlined_call_operand.vmem [shape: f32[1,512], index: 2, kind: input, shape index: {}]   ;;  %s3726_s3 = inlined_call_operand.vmem [shape: bf16[512,128], index: 3, kind: input, shape index: {}]   ;;  %s3727_s4 = inlined_call_operand.vmem [shape: f32[1,128], index: 4, kind: input, shape index: {}]   ;;  %s3728_s5 = inlined_call_operand.vmem [shape: f32[16,128], index: 5, kind: output, shape index: {}]  }
   0x1   :  { %s3188_s20 = smov 0   ;;  %s3190_s21 = smov 0  }
   0x2   :  { %s3192_s22 = smov 0  }
   0x3 LB: > { %s24_s23 = sadd.s32 1, %s3147_s21  ;;  %p43_p1 = scmp.ne.s32.totalorder %s3139_s19, %s3135_s18  ;;  %s3151_s22 = sphi %s3192_s22, %s15_s22   ;;  %s3147_s21 = sphi %s3190_s21, %s3732_s21   ;;  %s3143_s20 = sphi %s3188_s20, %s3731_s20   ;;  %s3139_s19 = sphi %s3186_s19, %s3730_s19   ;;  %s3135_s18 = sphi %s3184_s18, %s3729_s18  }
   0x4   : > { %p25_p0 = scmp.ge.s32.totalorder %s24_s23, 5  ;;  %p44_p2 = scmp.eq.s32.totalorder %s3151_s22, 0 }
   0x5   : > { %s36_s25 = sadd.s32 1, %s3139_s19  ;;  %p2067_p5 = scmp.ge.s32.totalorder %s3151_s22, 5 }
   0x6   : > { %s3734_s23 = smov (%p25_p0, %s24_s23), 0  ;;  %p45_p3 = por %p44_p2, %p43_p1 }
   0x7   : > { %s32_s24 = ssub.s32 %s3147_s21, %s3734_s23  ;;  %193 = sbr.rel (%p2067_p5) target bundleno = 23 (0x17), region = 28 }
   0x8   : > { %p34_p4 = scmp.eq.s32.totalorder %s32_s24, 0 }
   0xa   : > { %s3219_s26 = scalar_select %p34_p4, %s3139_s19, %s36_s25  }
   0xc   : > { %196 = sbr.rel (!%p45_p3) target bundleno = 23 (0x17), region = 32  ;;  %s198_s27 = sand.u32 (%p45_p3), 1, %s3139_s19  }
   0xd   : > { %s2870_s28 = smul.u32 (%p45_p3), 20, %s3147_s21 }
   0xe   : > { %s3069_s29 = smul.u32 (%p45_p3), 40, %s198_s27 }
   0xf   : > { %s206_s7 = scalar_lea.vmem (%p45_p3), %s3723_s0, %s2870_s28 }
  0x10   : > { %v221_v0 = vld [vmem:[%s206_s7] sm:$0xff] (%p45_p3)  ;;  %v223_v1 = vld [vmem:[%s206_s7 + $0x8] sm:$0xff] (%p45_p3)  ;;  %s200_s8 = scalar_lea.vmem (%p45_p3), [#allocation3], %s3069_s29  ;;  %v2069_v4 = vld [vmem:[%s206_s7 + $0x10] sm:$0xf] (%p45_p3) }
  0x11   : > { %v225_v2 = vld [vmem:[%s206_s7 + $0x64] sm:$0xff]  ;;  %222 = vst [vmem:[%s200_s8] sm:$0xff] %v221_v0  ;;  %v227_v3 = vld [vmem:[%s206_s7 + $0x6c] sm:$0xff]  ;;  %v2071_v5 = vld [vmem:[%s206_s7 + $0x74] sm:$0xf] }
  0x12   : > { %224 = vst [vmem:[%s200_s8 + $0x8] sm:$0xff] %v223_v1 }
  0x13   : > { %226 = vst [vmem:[%s200_s8 + $0x14] sm:$0xff] %v225_v2 }
  0x14   : > { %228 = vst [vmem:[%s200_s8 + $0x1c] sm:$0xff] %v227_v3 }
  0x15   : > { %2070 = vst [vmem:[%s200_s8 + $0x10] sm:$0xf] %v2069_v4 }
  0x16   : > { %2072 = vst [vmem:[%s200_s8 + $0x24] sm:$0xf] %v2071_v5 }
  0x17 PF: > { %p2073_p6 = scmp.ge.s32.totalorder %s3151_s22, 1  ;;  %p255_p7 = scmp.lt.s32.totalorder %s3151_s22, 6 }
  0x19   : > { %p256_p8 = pnand %p2073_p6, %p255_p7 }
  0x1a   : > { %s262_s9 = sand.u32 (!%p256_p8), 1, %s3135_s18   ;;  %s297_s10 = smul.u32 (!%p256_p8), 80, %s3143_s20 }
  0x1b   : > { %259 = sbr.rel (%p256_p8) target bundleno = 536 (0x218), region = 62  ;;  %p2076_p10 = scmp.ne.s32.totalorder (!%p256_p8), %s3143_s20, 0 }
  0x1c   : > { %s3070_s11 = smul.u32 (!%p256_p8), 40, %s262_s9  ;;  %p298_p9 = scmp.lt.s32.totalorder (!%p256_p8), %s297_s10, 399 }
  0x1e   : > { %s3236_s16 = scalar_lea.vmem (!%p256_p8), [#allocation3], %s3070_s11 }
  0x20   : > { %s3736_s10 = smov (!%p298_p9, %s297_s10), 399  ;;  %313 = sbr.rel (%p2076_p10) target bundleno = 46 (0x2e), region = 70 }
  0x21   : > { %s2871_s12 = sshll.u32 %s3736_s10, 4 }
  0x22   : > { %s3234_s15 = scalar_lea.vmem %s3724_s1, %s2871_s12 }
  0x25   : > { %v3153_v6 = vmov 0.0  }
  0x26   : > { %314 = vst [vmem:[#allocation2 + $0x30] sm:$0xff] %v3153_v6 }
  0x27   : > { %315 = vst [vmem:[#allocation2] sm:$0xff] %v3153_v6 }
  0x28   : > { %316 = vst [vmem:[#allocation2 + $0x18] sm:$0xff] %v3153_v6 }
  0x29   : > { %317 = vst [vmem:[#allocation2 + $0x10] sm:$0xff] %v3153_v6 }
  0x2a   : > { %318 = vst [vmem:[#allocation2 + $0x8] sm:$0xff] %v3153_v6 }
  0x2b   : > { %319 = vst [vmem:[#allocation2 + $0x20] sm:$0xff] %v3153_v6 }
  0x2c   : > { %320 = vst [vmem:[#allocation2 + $0x28] sm:$0xff] %v3153_v6 }
  0x2d   : > { %321 = vst [vmem:[#allocation2 + $0x38] sm:$0xff] %v3153_v6 }
  0x2e PF: > { %v2211_v7 = vld [vmem:[%s3234_s15 + $0xe0] sm:$0xf]  ;;  %v2907_v8 = vld [vmem:[%s3234_s15 + $0xec] sm:$0xf0]  ;;  %p2737_p11 = scmp.ne.s32.totalorder %s3143_s20, 4 }
  0x2f   : > { %v2339_v9 = vld [vmem:[%s3234_s15 + $0x1e0] sm:$0xf]  ;;  %v2212_v10 = vor.u32 %v2907_v8, %v2211_v7  ;;  %v2939_v11 = vld [vmem:[%s3234_s15 + $0x1ec] sm:$0xf0] }
  0x30   : > { %v2467_v12 = vld [vmem:[%s3234_s15 + $0x2e0] sm:$0xf]  ;;  %v2971_v13 = vld [vmem:[%s3234_s15 + $0x2ec] sm:$0xf0]  ;;  %v2340_v14 = vor.u32 %v2939_v11, %v2339_v9 }
  0x31   : > { %v2468_v15 = vor.u32 %v2971_v13, %v2467_v12  ;;  %v2595_v16 = vld [vmem:[%s3234_s15 + $0x3e0] sm:$0xf]  ;;  %v3003_v17 = vld [vmem:[%s3234_s15 + $0x3ec] sm:$0xf0]  ;;  %1322 = vmatpush.bf16.msra.mxu0 %v2212_v10 }
  0x32   : > { %v2195_v18 = vld [vmem:[%s3234_s15 + $0xc0] sm:$0xf]  ;;  %v2596_v19 = vor.u32 %v3003_v17, %v2595_v16  ;;  %v2903_v20 = vld [vmem:[%s3234_s15 + $0xcc] sm:$0xf0]  ;;  %1336 = vmatpush.bf16.msra.mxu1 %v2340_v14 }
  0x33   : > { %v2323_v21 = vld [vmem:[%s3234_s15 + $0x1c0] sm:$0xf]  ;;  %v2935_v22 = vld [vmem:[%s3234_s15 + $0x1cc] sm:$0xf0]  ;;  %1350 = vmatpush.bf16.msra.mxu2 %v2468_v15  ;;  %v2196_v23 = vor.u32 %v2903_v20, %v2195_v18 }
  0x34   : > { %v2324_v24 = vor.u32 %v2935_v22, %v2323_v21  ;;  %v2451_v25 = vld [vmem:[%s3234_s15 + $0x2c0] sm:$0xf]  ;;  %v2967_v26 = vld [vmem:[%s3234_s15 + $0x2cc] sm:$0xf0]  ;;  %1364 = vmatpush.bf16.msra.mxu3 %v2596_v19 }
  0x35   : > { %v2579_v27 = vld [vmem:[%s3234_s15 + $0x3c0] sm:$0xf]  ;;  %v2452_v28 = vor.u32 %v2967_v26, %v2451_v25  ;;  %v2999_v29 = vld [vmem:[%s3234_s15 + $0x3cc] sm:$0xf0]  ;;  %1323 = vmatpush.bf16.msra.mxu0 %v2196_v23 }
  0x36   : > { %v2179_v30 = vld [vmem:[%s3234_s15 + $0xa0] sm:$0xf]  ;;  %v2899_v31 = vld [vmem:[%s3234_s15 + $0xac] sm:$0xf0]  ;;  %v2580_v32 = vor.u32 %v2999_v29, %v2579_v27  ;;  %1337 = vmatpush.bf16.msra.mxu1 %v2324_v24 }
  0x37   : > { %v2307_v33 = vld [vmem:[%s3234_s15 + $0x1a0] sm:$0xf]  ;;  %v2931_v34 = vld [vmem:[%s3234_s15 + $0x1ac] sm:$0xf0]  ;;  %v2180_v36 = vor.u32 %v2899_v31, %v2179_v30  ;;  %1351 = vmatpush.bf16.msra.mxu2 %v2452_v28 }
  0x38   : > { %v2435_v35 = vld [vmem:[%s3234_s15 + $0x2a0] sm:$0xf]  ;;  %v2963_v37 = vld [vmem:[%s3234_s15 + $0x2ac] sm:$0xf0]  ;;  %v2308_v40 = vor.u32 %v2931_v34, %v2307_v33  ;;  %1365 = vmatpush.bf16.msra.mxu3 %v2580_v32 }
  0x39   : > { %v2563_v38 = vld [vmem:[%s3234_s15 + $0x3a0] sm:$0xf]  ;;  %v2995_v39 = vld [vmem:[%s3234_s15 + $0x3ac] sm:$0xf0]  ;;  %v2436_v41 = vor.u32 %v2963_v37, %v2435_v35  ;;  %1324 = vmatpush.bf16.msra.mxu0 %v2180_v36  ;;  %v2905_v37 = vld [vmem:[%s3234_s15 + $0xe4] sm:$0xf] }
  0x3a   : > { %v2163_v42 = vld [vmem:[%s3234_s15 + $0x80] sm:$0xf]  ;;  %v2895_v43 = vld [vmem:[%s3234_s15 + $0x8c] sm:$0xf0]  ;;  %v2564_v45 = vor.u32 %v2995_v39, %v2563_v38  ;;  %1338 = vmatpush.bf16.msra.mxu1 %v2308_v40  ;;  %v2213_v39 = vld [vmem:[%s3234_s15 + $0xf0] sm:$0xf0] }
  0x3b   : > { %v2291_v44 = vld [vmem:[%s3234_s15 + $0x180] sm:$0xf]  ;;  %v2927_v46 = vld [vmem:[%s3234_s15 + $0x18c] sm:$0xf0]  ;;  %v2164_v51 = vor.u32 %v2895_v43, %v2163_v42  ;;  %1352 = vmatpush.bf16.msra.mxu2 %v2436_v41  ;;  %v2937_v40 = vld [vmem:[%s3234_s15 + $0x1e4] sm:$0xf] }
  0x3c   : > { %v2419_v47 = vld [vmem:[%s3234_s15 + $0x280] sm:$0xf]  ;;  %v2959_v48 = vld [vmem:[%s3234_s15 + $0x28c] sm:$0xf0]  ;;  %v2292_v52 = vor.u32 %v2927_v46, %v2291_v44  ;;  %1366 = vmatpush.bf16.msra.mxu3 %v2564_v45  ;;  %v2341_v41 = vld [vmem:[%s3234_s15 + $0x1f0] sm:$0xf0] }
  0x3d   : > { %v2547_v49 = vld [vmem:[%s3234_s15 + $0x380] sm:$0xf]  ;;  %v2991_v50 = vld [vmem:[%s3234_s15 + $0x38c] sm:$0xf0]  ;;  %v2420_v53 = vor.u32 %v2959_v48, %v2419_v47  ;;  %1325 = vmatpush.bf16.msra.mxu0 %v2164_v51  ;;  %v2969_v44 = vld [vmem:[%s3234_s15 + $0x2e4] sm:$0xf] }
  0x3e   : > { %v2147_v54 = vld [vmem:[%s3234_s15 + $0x60] sm:$0xf]  ;;  %v2891_v55 = vld [vmem:[%s3234_s15 + $0x6c] sm:$0xf0]  ;;  %v2548_v57 = vor.u32 %v2991_v50, %v2547_v49  ;;  %1339 = vmatpush.bf16.msra.mxu1 %v2292_v52  ;;  %v2469_v45 = vld [vmem:[%s3234_s15 + $0x2f0] sm:$0xf0]  ;;  %v2216_v49 = vor.u32 %v2905_v37, %v2213_v39  ;;  %v2344_v50 = vor.u32 %v2937_v40, %v2341_v41 }
  0x3f   : > { %v2275_v56 = vld [vmem:[%s3234_s15 + $0x160] sm:$0xf]  ;;  %v2923_v58 = vld [vmem:[%s3234_s15 + $0x16c] sm:$0xf0]  ;;  %v2148_v63 = vor.u32 %v2891_v55, %v2147_v54  ;;  %1353 = vmatpush.bf16.msra.mxu2 %v2420_v53  ;;  %v2901_v52 = vld [vmem:[%s3234_s15 + $0xc4] sm:$0xf]  ;;  %v2472_v54 = vor.u32 %v2969_v44, %v2469_v45 }
  0x40   : > { %v2403_v59 = vld [vmem:[%s3234_s15 + $0x260] sm:$0xf]  ;;  %v2955_v60 = vld [vmem:[%s3234_s15 + $0x26c] sm:$0xf0]  ;;  %v2276_v0 = vor.u32 %v2923_v58, %v2275_v56  ;;  %1367 = vmatpush.bf16.msra.mxu3 %v2548_v57  ;;  %v2197_v53 = vld [vmem:[%s3234_s15 + $0xd0] sm:$0xf0] }
  0x41   : > { %v2531_v61 = vld [vmem:[%s3234_s15 + $0x360] sm:$0xf]  ;;  %v2987_v62 = vld [vmem:[%s3234_s15 + $0x36c] sm:$0xf0]  ;;  %v2404_v1 = vor.u32 %v2955_v60, %v2403_v59  ;;  %1326 = vmatpush.bf16.msra.mxu0 %v2148_v63  ;;  %v2933_v55 = vld [vmem:[%s3234_s15 + $0x1c4] sm:$0xf] }
  0x42   : > { %v2131_v2 = vld [vmem:[%s3234_s15 + $0x40] sm:$0xf]  ;;  %v2887_v3 = vld [vmem:[%s3234_s15 + $0x4c] sm:$0xf0]  ;;  %v2532_v5 = vor.u32 %v2987_v62, %v2531_v61  ;;  %1340 = vmatpush.bf16.msra.mxu1 %v2276_v0  ;;  %v2325_v56 = vld [vmem:[%s3234_s15 + $0x1d0] sm:$0xf0] }
  0x43   : > { %v2259_v4 = vld [vmem:[%s3234_s15 + $0x140] sm:$0xf]  ;;  %v2919_v6 = vld [vmem:[%s3234_s15 + $0x14c] sm:$0xf0]  ;;  %v2132_v11 = vor.u32 %v2887_v3, %v2131_v2  ;;  %1354 = vmatpush.bf16.msra.mxu2 %v2404_v1  ;;  %v2965_v57 = vld [vmem:[%s3234_s15 + $0x2c4] sm:$0xf]  ;;  %v2200_v1 = vor.u32 %v2901_v52, %v2197_v53  ;;  %v2328_v2 = vor.u32 %v2933_v55, %v2325_v56 }
  0x44   : > { %v2387_v7 = vld [vmem:[%s3234_s15 + $0x240] sm:$0xf]  ;;  %v2951_v8 = vld [vmem:[%s3234_s15 + $0x24c] sm:$0xf0]  ;;  %v2260_v12 = vor.u32 %v2919_v6, %v2259_v4  ;;  %1368 = vmatpush.bf16.msra.mxu3 %v2532_v5  ;;  %v2453_v58 = vld [vmem:[%s3234_s15 + $0x2d0] sm:$0xf0] }
  0x45   : > { %v2515_v9 = vld [vmem:[%s3234_s15 + $0x340] sm:$0xf]  ;;  %v2983_v10 = vld [vmem:[%s3234_s15 + $0x34c] sm:$0xf0]  ;;  %v2388_v13 = vor.u32 %v2951_v8, %v2387_v7  ;;  %1327 = vmatpush.bf16.msra.mxu0 %v2132_v11  ;;  %v2874_v60 = vld [vmem:[%s3236_s16 + $0x10] sm:$0xf0]  ;;  %v2456_v6 = vor.u32 %v2965_v57, %v2453_v58 }
  0x46   : > { %v2115_v14 = vld [vmem:[%s3234_s15 + $0x20] sm:$0xf]  ;;  %v2883_v15 = vld [vmem:[%s3234_s15 + $0x2c] sm:$0xf0]  ;;  %v2516_v17 = vor.u32 %v2983_v10, %v2515_v9  ;;  %1341 = vmatpush.bf16.msra.mxu1 %v2260_v12  ;;  %v2897_v3 = vld [vmem:[%s3234_s15 + $0xa4] sm:$0xf] }
  0x47   : > { %v2243_v16 = vld [vmem:[%s3234_s15 + $0x120] sm:$0xf]  ;;  %v2915_v18 = vld [vmem:[%s3234_s15 + $0x12c] sm:$0xf0]  ;;  %v2116_v23 = vor.u32 %v2883_v15, %v2115_v14  ;;  %1355 = vmatpush.bf16.msra.mxu2 %v2388_v13  ;;  %v2181_v4 = vld [vmem:[%s3234_s15 + $0xb0] sm:$0xf0] }
  0x48   : > { %v2371_v19 = vld [vmem:[%s3234_s15 + $0x220] sm:$0xf]  ;;  %v2947_v20 = vld [vmem:[%s3234_s15 + $0x22c] sm:$0xf0]  ;;  %v2244_v26 = vor.u32 %v2915_v18, %v2243_v16  ;;  %1369 = vmatpush.bf16.msra.mxu3 %v2516_v17  ;;  %v2929_v5 = vld [vmem:[%s3234_s15 + $0x1a4] sm:$0xf]  ;;  %v2184_v18 = vor.u32 %v2897_v3, %v2181_v4 }
  0x49   : > { %v2499_v21 = vld [vmem:[%s3234_s15 + $0x320] sm:$0xf]  ;;  %v2979_v22 = vld [vmem:[%s3234_s15 + $0x32c] sm:$0xf0]  ;;  %v2372_v27 = vor.u32 %v2947_v20, %v2371_v19  ;;  %1328 = vmatpush.bf16.msra.mxu0 %v2116_v23  ;;  %v2309_v7 = vld [vmem:[%s3234_s15 + $0x1b0] sm:$0xf0] }
  0x4a   : > { %v2099_v24 = vld [vmem:[%s3234_s15] sm:$0xf]  ;;  %v2879_v25 = vld [vmem:[%s3234_s15 + $0xc] sm:$0xf0]  ;;  %v2500_v31 = vor.u32 %v2979_v22, %v2499_v21  ;;  %1342 = vmatpush.bf16.msra.mxu1 %v2244_v26  ;;  %v2875_v9 = vld [vmem:[%s3236_s16 + $0x18] sm:$0xf0]  ;;  %v2312_v19 = vor.u32 %v2929_v5, %v2309_v7 }
  0x4b   : > { %v2227_v28 = vld [vmem:[%s3234_s15 + $0x100] sm:$0xf]  ;;  %v2911_v29 = vld [vmem:[%s3234_s15 + $0x10c] sm:$0xf0]  ;;  %v2100_v38 = vor.u32 %v2879_v25, %v2099_v24  ;;  %1356 = vmatpush.bf16.msra.mxu2 %v2372_v27  ;;  %v2961_v10 = vld [vmem:[%s3234_s15 + $0x2a4] sm:$0xf] }
  0x4c   : > { %v2355_v30 = vld [vmem:[%s3234_s15 + $0x200] sm:$0xf]  ;;  %v2943_v32 = vld [vmem:[%s3234_s15 + $0x20c] sm:$0xf0]  ;;  %v2228_v42 = vor.u32 %v2911_v29, %v2227_v28  ;;  %1370 = vmatpush.bf16.msra.mxu3 %v2500_v31  ;;  %v2437_v11 = vld [vmem:[%s3234_s15 + $0x2b0] sm:$0xf0] }
  0x4d   : > { %v2483_v33 = vld [vmem:[%s3234_s15 + $0x300] sm:$0xf]  ;;  %v2975_v34 = vld [vmem:[%s3234_s15 + $0x30c] sm:$0xf0]  ;;  %v2356_v43 = vor.u32 %v2943_v32, %v2355_v30  ;;  %1329 = vmatpush.bf16.msra.mxu0 %v2100_v38  ;;  %v2893_v16 = vld [vmem:[%s3234_s15 + $0x84] sm:$0xf]  ;;  %v2440_v23 = vor.u32 %v2961_v10, %v2437_v11 }
  0x4e   : > { %v2723_v35 = vld [vmem:[%s3234_s15 + $0x4e0] sm:$0xf]  ;;  %v3035_v36 = vld [vmem:[%s3234_s15 + $0x4ec] sm:$0xf0]  ;;  %v2484_v46 = vor.u32 %v2975_v34, %v2483_v33  ;;  %1343 = vmatpush.bf16.msra.mxu1 %v2228_v42  ;;  %v2165_v17 = vld [vmem:[%s3234_s15 + $0x90] sm:$0xf0] }
  0x4f   : > { %v2724_v47 = vor.u32 %v3035_v36, %v2723_v35  ;;  %v2707_v48 = vld [vmem:[%s3234_s15 + $0x4c0] sm:$0xf]  ;;  %v3031_v51 = vld [vmem:[%s3234_s15 + $0x4cc] sm:$0xf0]  ;;  %1357 = vmatpush.bf16.msra.mxu2 %v2356_v43  ;;  %v2925_v20 = vld [vmem:[%s3234_s15 + $0x184] sm:$0xf]  ;;  %v2168_v32 = vor.u32 %v2893_v16, %v2165_v17 }
  0x50   : > { %v2079_v59 = vld [vmem:[%s3236_s16] sm:$0xf]  ;;  %1371 = vmatpush.bf16.msra.mxu3 %v2484_v46  ;;  %v2708_v61 = vor.u32 %v3031_v51, %v2707_v48  ;;  %v3027_v63 = vld [vmem:[%s3234_s15 + $0x4ac] sm:$0xf0]  ;;  %v2293_v21 = vld [vmem:[%s3234_s15 + $0x190] sm:$0xf0] }
  0x51   : > { %1378 = vmatpush.bf16.msrb.mxu0 %v2724_v47  ;;  %v2691_v62 = vld [vmem:[%s3234_s15 + $0x4a0] sm:$0xf]  ;;  %v3323_v0 = vor.u32 %v2874_v60, %v2079_v59  ;;  %v2087_v8 = vld [vmem:[%s3236_s16 + $0x8] sm:$0xf]  ;;  %v2873_v22 = vld [vmem:[%s3236_s16 + $0xc] sm:$0xf]  ;;  %v2296_v33 = vor.u32 %v2925_v20, %v2293_v21 }
  0x52   : > { %1392 = vmatpush.bf16.msrb.mxu1 %v2216_v49  ;;  %v2675_v12 = vld [vmem:[%s3234_s15 + $0x480] sm:$0xf]  ;;  %v3335_v13 = vor.u32 %v2875_v9, %v2087_v8  ;;  %v2692_v14 = vor.u32 %v3027_v63, %v2691_v62  ;;  %v3023_v15 = vld [vmem:[%s3234_s15 + $0x48c] sm:$0xf0]  ;;  %v2872_v25 = vld [vmem:[%s3236_s16 + $0x4] sm:$0xf] }
  0x53   : > { %1406 = vmatpush.bf16.msrb.mxu2 %v2344_v50  ;;  %1330 = vmatmul.bf16.vlgmr.msra.gmra.mxu0 %v3323_v0  ;;  %v2089_v24 = vld [vmem:[%s3236_s16 + $0x1c] sm:$0xf0]  ;;  %v2081_v26 = vld [vmem:[%s3236_s16 + $0x14] sm:$0xf0]  ;;  %v2957_v27 = vld [vmem:[%s3234_s15 + $0x284] sm:$0xf]  ;;  %v2676_v31 = vor.u32 %v3023_v15, %v2675_v12 }
  0x54   : > { %1420 = vmatpush.bf16.msrb.mxu3 %v2472_v54  ;;  %1358 = vmatmul.bf16.vlgmr.msra.gmra.mxu2 %v3335_v13  ;;  %v2421_v28 = vld [vmem:[%s3234_s15 + $0x290] sm:$0xf0]  ;;  %v3349_v29 = vor.u32 %v2873_v22, %v2089_v24  ;;  %v3351_v30 = vor.u32 %v2872_v25, %v2081_v26  ;;  %v2659_v34 = vld [vmem:[%s3234_s15 + $0x460] sm:$0xf]  ;;  %v3019_v35 = vld [vmem:[%s3234_s15 + $0x46c] sm:$0xf0] }
  0x55   : > { %1379 = vmatpush.bf16.msrb.mxu0 %v2708_v61  ;;  %v2889_v36 = vld [vmem:[%s3234_s15 + $0x64] sm:$0xf]  ;;  %v2424_v37 = vor.u32 %v2957_v27, %v2421_v28  ;;  %v2149_v38 = vld [vmem:[%s3234_s15 + $0x70] sm:$0xf0]  ;;  %v2660_v43 = vor.u32 %v3019_v35, %v2659_v34  ;;  %v2643_v46 = vld [vmem:[%s3234_s15 + $0x440] sm:$0xf] }
  0x56   : > { %1393 = vmatpush.bf16.msrb.mxu1 %v2200_v1  ;;  %v2921_v39 = vld [vmem:[%s3234_s15 + $0x164] sm:$0xf]  ;;  %v2277_v40 = vld [vmem:[%s3234_s15 + $0x170] sm:$0xf0]  ;;  %1372 = vmatmul.bf16.vlgmr.msra.gmra.mxu3 %v3349_v29  ;;  %v2152_v44 = vor.u32 %v2889_v36, %v2149_v38  ;;  %v3015_v47 = vld [vmem:[%s3234_s15 + $0x44c] sm:$0xf0] }
  0x57   : > { %1407 = vmatpush.bf16.msrb.mxu2 %v2328_v2  ;;  %1344 = vmatmul.bf16.vlgmr.msra.gmra.mxu1 %v3351_v30  ;;  %v2953_v41 = vld [vmem:[%s3234_s15 + $0x264] sm:$0xf]  ;;  %v2405_v42 = vld [vmem:[%s3234_s15 + $0x270] sm:$0xf0]  ;;  %v2280_v45 = vor.u32 %v2921_v39, %v2277_v40  ;;  %v2644_v55 = vor.u32 %v3015_v47, %v2643_v46  ;;  %v2627_v58 = vld [vmem:[%s3234_s15 + $0x420] sm:$0xf] }
  0x58   : > { %1421 = vmatpush.bf16.msrb.mxu3 %v2456_v6  ;;  %v2885_v48 = vld [vmem:[%s3234_s15 + $0x44] sm:$0xf]  ;;  %v2408_v49 = vor.u32 %v2953_v41, %v2405_v42  ;;  %v2133_v50 = vld [vmem:[%s3234_s15 + $0x50] sm:$0xf0]  ;;  %v3011_v59 = vld [vmem:[%s3234_s15 + $0x42c] sm:$0xf0] }
  0x59   : > { %1380 = vmatpush.bf16.msrb.mxu0 %v2692_v14  ;;  %v2917_v51 = vld [vmem:[%s3234_s15 + $0x144] sm:$0xf]  ;;  %v2261_v52 = vld [vmem:[%s3234_s15 + $0x150] sm:$0xf0]  ;;  %v2136_v56 = vor.u32 %v2885_v48, %v2133_v50  ;;  %v2628_v4 = vor.u32 %v3011_v59, %v2627_v58  ;;  %v2611_v5 = vld [vmem:[%s3234_s15 + $0x400] sm:$0xf] }
  0x5a   : > { %1394 = vmatpush.bf16.msrb.mxu1 %v2184_v18  ;;  %v2949_v53 = vld [vmem:[%s3234_s15 + $0x244] sm:$0xf]  ;;  %v2389_v54 = vld [vmem:[%s3234_s15 + $0x250] sm:$0xf0]  ;;  %v2264_v57 = vor.u32 %v2917_v51, %v2261_v52  ;;  %v3007_v6 = vld [vmem:[%s3234_s15 + $0x40c] sm:$0xf0] }
  0x5b   : > { %1408 = vmatpush.bf16.msrb.mxu2 %v2312_v19  ;;  %v2881_v60 = vld [vmem:[%s3234_s15 + $0x24] sm:$0xf]  ;;  %v2392_v61 = vor.u32 %v2949_v53, %v2389_v54  ;;  %v2117_v62 = vld [vmem:[%s3234_s15 + $0x30] sm:$0xf0]  ;;  %v2612_v21 = vor.u32 %v3007_v6, %v2611_v5  ;;  %v2219_v22 = vld [vmem:[%s3234_s15 + $0xe8] sm:$0xf] }
  0x5c   : > { %1422 = vmatpush.bf16.msrb.mxu3 %v2440_v23  ;;  %v2913_v63 = vld [vmem:[%s3234_s15 + $0x124] sm:$0xf]  ;;  %v2245_v1 = vld [vmem:[%s3234_s15 + $0x130] sm:$0xf0]  ;;  %v2120_v8 = vor.u32 %v2881_v60, %v2117_v62  ;;  %v2908_v23 = vld [vmem:[%s3234_s15 + $0xf4] sm:$0xf0] }
  0x5d   : > { %1381 = vmatpush.bf16.msrb.mxu0 %v2676_v31  ;;  %v2945_v2 = vld [vmem:[%s3234_s15 + $0x224] sm:$0xf]  ;;  %v2373_v3 = vld [vmem:[%s3234_s15 + $0x230] sm:$0xf0]  ;;  %v2248_v9 = vor.u32 %v2913_v63, %v2245_v1  ;;  %v2347_v24 = vld [vmem:[%s3234_s15 + $0x1e8] sm:$0xf]  ;;  %v2220_v35 = vor.u32 %v2908_v23, %v2219_v22 }
  0x5e   : > { %1395 = vmatpush.bf16.msrb.mxu1 %v2168_v32  ;;  %v2877_v7 = vld [vmem:[%s3234_s15 + $0x4] sm:$0xf]  ;;  %v2101_v10 = vld [vmem:[%s3234_s15 + $0x10] sm:$0xf0]  ;;  %v2376_v14 = vor.u32 %v2945_v2, %v2373_v3  ;;  %v2940_v27 = vld [vmem:[%s3234_s15 + $0x1f4] sm:$0xf0] }
  0x5f   : > { %1409 = vmatpush.bf16.msrb.mxu2 %v2296_v33  ;;  %v2909_v11 = vld [vmem:[%s3234_s15 + $0x104] sm:$0xf]  ;;  %v2229_v12 = vld [vmem:[%s3234_s15 + $0x110] sm:$0xf0]  ;;  %v2104_v25 = vor.u32 %v2877_v7, %v2101_v10  ;;  %v2095_v28 = vld [vmem:[%s3236_s16 + $0x10] sm:$0xf]  ;;  %v2348_v39 = vor.u32 %v2940_v27, %v2347_v24 }
  0x60   : > { %1423 = vmatpush.bf16.msrb.mxu3 %v2424_v37  ;;  %v2941_v15 = vld [vmem:[%s3234_s15 + $0x204] sm:$0xf]  ;;  %v2357_v16 = vld [vmem:[%s3234_s15 + $0x210] sm:$0xf0]  ;;  %v2232_v26 = vor.u32 %v2909_v11, %v2229_v12  ;;  %v2203_v42 = vld [vmem:[%s3234_s15 + $0xc8] sm:$0xf] }
  0x61   : > { %1382 = vmatpush.bf16.msrb.mxu0 %v2660_v43  ;;  %v3001_v17 = vld [vmem:[%s3234_s15 + $0x3e4] sm:$0xf]  ;;  %v2597_v18 = vld [vmem:[%s3234_s15 + $0x3f0] sm:$0xf0]  ;;  %v2360_v32 = vor.u32 %v2941_v15, %v2357_v16  ;;  %v2904_v43 = vld [vmem:[%s3234_s15 + $0xd4] sm:$0xf0] }
  0x62   : > { %1396 = vmatpush.bf16.msrb.mxu1 %v2152_v44  ;;  %v3033_v19 = vld [vmem:[%s3234_s15 + $0x4e4] sm:$0xf]  ;;  %v2725_v20 = vld [vmem:[%s3234_s15 + $0x4f0] sm:$0xf0]  ;;  %v2600_v33 = vor.u32 %v3001_v17, %v2597_v18  ;;  %v2331_v44 = vld [vmem:[%s3234_s15 + $0x1c8] sm:$0xf]  ;;  %v2204_v48 = vor.u32 %v2904_v43, %v2203_v42 }
  0x63   : > { %1410 = vmatpush.bf16.msrb.mxu2 %v2280_v45  ;;  %v2876_v31 = vld [vmem:[%s3236_s16 + $0x20] sm:$0xf0]  ;;  %v2728_v34 = vor.u32 %v3033_v19, %v2725_v20  ;;  %v2581_v37 = vld [vmem:[%s3234_s15 + $0x3d0] sm:$0xf0]  ;;  %v2936_v45 = vld [vmem:[%s3234_s15 + $0x1d4] sm:$0xf0] }
  0x64   : > { %1424 = vmatpush.bf16.msrb.mxu3 %v2408_v49  ;;  %v2997_v36 = vld [vmem:[%s3234_s15 + $0x3c4] sm:$0xf]  ;;  %v3400_v40 = vor.u32 %v2876_v31, %v2095_v28  ;;  %v2709_v41 = vld [vmem:[%s3234_s15 + $0x4d0] sm:$0xf0]  ;;  %v2332_v52 = vor.u32 %v2936_v45, %v2331_v44  ;;  %v2187_v54 = vld [vmem:[%s3234_s15 + $0xa8] sm:$0xf] }
  0x65   : > { %1383 = vmatpush.bf16.msrb.mxu0 %v2644_v55  ;;  %v3029_v38 = vld [vmem:[%s3234_s15 + $0x4c4] sm:$0xf]  ;;  %v2584_v46 = vor.u32 %v2997_v36, %v2581_v37  ;;  %v2565_v50 = vld [vmem:[%s3234_s15 + $0x3b0] sm:$0xf0]  ;;  %v2900_v55 = vld [vmem:[%s3234_s15 + $0xb4] sm:$0xf0] }
  0x66   : > { %1397 = vmatpush.bf16.msrb.mxu1 %v2136_v56  ;;  %v2712_v47 = vor.u32 %v3029_v38, %v2709_v41  ;;  %v2993_v49 = vld [vmem:[%s3234_s15 + $0x3a4] sm:$0xf]  ;;  %v2693_v53 = vld [vmem:[%s3234_s15 + $0x4b0] sm:$0xf0]  ;;  %v2315_v56 = vld [vmem:[%s3234_s15 + $0x1a8] sm:$0xf]  ;;  %v2188_v60 = vor.u32 %v2900_v55, %v2187_v54 }
  0x67   : > { %1411 = vmatpush.bf16.msrb.mxu2 %v2264_v57  ;;  %v3025_v51 = vld [vmem:[%s3234_s15 + $0x4a4] sm:$0xf]  ;;  %v2932_v57 = vld [vmem:[%s3234_s15 + $0x1b4] sm:$0xf0]  ;;  %v2568_v58 = vor.u32 %v2993_v49, %v2565_v50  ;;  %v2549_v62 = vld [vmem:[%s3234_s15 + $0x390] sm:$0xf0] }
  0x68   : > { %1425 = vmatpush.bf16.msrb.mxu3 %v2392_v61  ;;  %v2696_v59 = vor.u32 %v3025_v51, %v2693_v53  ;;  %v2989_v61 = vld [vmem:[%s3234_s15 + $0x384] sm:$0xf]  ;;  %v2316_v1 = vor.u32 %v2932_v57, %v2315_v56  ;;  %v2677_v2 = vld [vmem:[%s3234_s15 + $0x490] sm:$0xf0]  ;;  %v2171_v3 = vld [vmem:[%s3234_s15 + $0x88] sm:$0xf] }
  0x69   : > { %1384 = vmatpush.bf16.msrb.mxu0 %v2628_v4  ;;  %v3021_v63 = vld [vmem:[%s3234_s15 + $0x484] sm:$0xf]  ;;  %v2896_v4 = vld [vmem:[%s3234_s15 + $0x94] sm:$0xf0]  ;;  %v2299_v5 = vld [vmem:[%s3234_s15 + $0x188] sm:$0xf]  ;;  %v2552_v7 = vor.u32 %v2989_v61, %v2549_v62 }
  0x6a   : > { %1398 = vmatpush.bf16.msrb.mxu1 %v2120_v8  ;;  %v2928_v6 = vld [vmem:[%s3234_s15 + $0x194] sm:$0xf0]  ;;  %v2680_v8 = vor.u32 %v3021_v63, %v2677_v2  ;;  %v2985_v10 = vld [vmem:[%s3234_s15 + $0x364] sm:$0xf]  ;;  %v2533_v11 = vld [vmem:[%s3234_s15 + $0x370] sm:$0xf0] }
  0x6b   : > { %1412 = vmatpush.bf16.msrb.mxu2 %v2248_v9  ;;  %v2172_v9 = vor.u32 %v2896_v4, %v2171_v3  ;;  %v3017_v12 = vld [vmem:[%s3234_s15 + $0x464] sm:$0xf]  ;;  %v2661_v15 = vld [vmem:[%s3234_s15 + $0x470] sm:$0xf0]  ;;  %v2155_v16 = vld [vmem:[%s3234_s15 + $0x68] sm:$0xf]  ;;  %v2536_v20 = vor.u32 %v2985_v10, %v2533_v11 }
  0x6c   : > { %1426 = vmatpush.bf16.msrb.mxu3 %v2376_v14  ;;  %v2300_v14 = vor.u32 %v2928_v6, %v2299_v5  ;;  %v2892_v17 = vld [vmem:[%s3234_s15 + $0x74] sm:$0xf0]  ;;  %v2283_v18 = vld [vmem:[%s3234_s15 + $0x168] sm:$0xf]  ;;  %v2981_v23 = vld [vmem:[%s3234_s15 + $0x344] sm:$0xf] }
  0x6d   : > { %1385 = vmatpush.bf16.msrb.mxu0 %v2612_v21  ;;  %v2924_v19 = vld [vmem:[%s3234_s15 + $0x174] sm:$0xf0]  ;;  %v2664_v21 = vor.u32 %v3017_v12, %v2661_v15  ;;  %v2156_v22 = vor.u32 %v2892_v17, %v2155_v16  ;;  %v2517_v24 = vld [vmem:[%s3234_s15 + $0x350] sm:$0xf0]  ;;  %v2139_v28 = vld [vmem:[%s3234_s15 + $0x48] sm:$0xf] }
  0x6e   : > { %1399 = vmatpush.bf16.msrb.mxu1 %v2104_v25  ;;  %v3013_v25 = vld [vmem:[%s3234_s15 + $0x444] sm:$0xf]  ;;  %v2645_v27 = vld [vmem:[%s3234_s15 + $0x450] sm:$0xf0]  ;;  %v2888_v31 = vld [vmem:[%s3234_s15 + $0x54] sm:$0xf0] }
  0x6f   : > { %1413 = vmatpush.bf16.msrb.mxu2 %v2232_v26  ;;  %v2284_v26 = vor.u32 %v2924_v19, %v2283_v18  ;;  %v2140_v36 = vor.u32 %v2888_v31, %v2139_v28  ;;  %v2977_v37 = vld [vmem:[%s3234_s15 + $0x324] sm:$0xf]  ;;  %v2501_v38 = vld [vmem:[%s3234_s15 + $0x330] sm:$0xf0]  ;;  %v2123_v43 = vld [vmem:[%s3234_s15 + $0x28] sm:$0xf] }
  0x70   : > { %1427 = vmatpush.bf16.msrb.mxu3 %v2360_v32  ;;  %1386 = vmatmul.bf16.vlgmr.msrb.gmra.mxu0 %v3400_v40  ;;  %v2267_v32 = vld [vmem:[%s3234_s15 + $0x148] sm:$0xf]  ;;  %v2629_v42 = vld [vmem:[%s3234_s15 + $0x430] sm:$0xf0]  ;;  %v2884_v44 = vld [vmem:[%s3234_s15 + $0x34] sm:$0xf0] }
  0x71   : > { %1434 = vmatpush.bf16.msra.mxu0 %v2600_v33  ;;  %1400 = vmatmul.bf16.vlgmr.msrb.gmra.mxu1 %v3323_v0  ;;  %v2920_v33 = vld [vmem:[%s3234_s15 + $0x154] sm:$0xf0]  ;;  %v2251_v45 = vld [vmem:[%s3234_s15 + $0x128] sm:$0xf]  ;;  %v2485_v49 = vld [vmem:[%s3234_s15 + $0x310] sm:$0xf0]  ;;  %v2124_v51 = vor.u32 %v2884_v44, %v2123_v43 }
  0x72   : > { %1448 = vmatpush.bf16.msra.mxu1 %v2728_v34  ;;  %1414 = vmatmul.bf16.vlgmr.msrb.gmra.mxu2 %v3351_v30  ;;  %v2520_v34 = vor.u32 %v2981_v23, %v2517_v24  ;;  %v2268_v41 = vor.u32 %v2920_v33, %v2267_v32  ;;  %v2613_v53 = vld [vmem:[%s3234_s15 + $0x410] sm:$0xf0]  ;;  %v2107_v54 = vld [vmem:[%s3234_s15 + $0x8] sm:$0xf]  ;;  %v2880_v56 = vld [vmem:[%s3234_s15 + $0x14] sm:$0xf0] }
  0x73   : > { %1462 = vmatpush.bf16.msra.mxu2 %v2220_v35  ;;  %1428 = vmatmul.bf16.vlgmr.msrb.gmra.mxu3 %v3335_v13  ;;  %v2648_v35 = vor.u32 %v3013_v25, %v2645_v27  ;;  %v2235_v57 = vld [vmem:[%s3234_s15 + $0x108] sm:$0xf]  ;;  %v3004_v63 = vld [vmem:[%s3234_s15 + $0x3f4] sm:$0xf0]  ;;  %v2108_v4 = vor.u32 %v2880_v56, %v2107_v54  ;;  %v2906_v5 = vld [vmem:[%s3234_s15 + $0xec] sm:$0xf] }
  0x74   : > { %1476 = vmatpush.bf16.msra.mxu3 %v2348_v39  ;;  %v3009_v39 = vld [vmem:[%s3234_s15 + $0x424] sm:$0xf]  ;;  %v2603_v61 = vld [vmem:[%s3234_s15 + $0x3e8] sm:$0xf]  ;;  %v3036_v2 = vld [vmem:[%s3234_s15 + $0x4f4] sm:$0xf0] }
  0x75   : > { %1435 = vmatpush.bf16.msra.mxu0 %v2584_v46  ;;  %v2916_v46 = vld [vmem:[%s3234_s15 + $0x134] sm:$0xf0]  ;;  %v2632_v50 = vor.u32 %v3009_v39, %v2629_v42  ;;  %v2221_v6 = vld [vmem:[%s3234_s15 + $0xf8] sm:$0xf0]  ;;  %v2459_v11 = vld [vmem:[%s3234_s15 + $0x2c8] sm:$0xf] }
  0x76   : > { %1449 = vmatpush.bf16.msra.mxu1 %v2712_v47  ;;  %v2504_v47 = vor.u32 %v2977_v37, %v2501_v38  ;;  %v2252_v55 = vor.u32 %v2916_v46, %v2251_v45  ;;  %v2968_v12 = vld [vmem:[%s3234_s15 + $0x2d4] sm:$0xf0]  ;;  %v2224_v15 = vor.u32 %v2906_v5, %v2221_v6  ;;  %v2715_v17 = vld [vmem:[%s3234_s15 + $0x4c8] sm:$0xf]  ;;  %v2902_v19 = vld [vmem:[%s3234_s15 + $0xcc] sm:$0xf] }
  0x77   : > { %1463 = vmatpush.bf16.msra.mxu2 %v2204_v48  ;;  %v2973_v48 = vld [vmem:[%s3234_s15 + $0x304] sm:$0xf]  ;;  %v3000_v16 = vld [vmem:[%s3234_s15 + $0x3d4] sm:$0xf0]  ;;  %v2443_v24 = vld [vmem:[%s3234_s15 + $0x2a8] sm:$0xf] }
  0x78   : > { %1477 = vmatpush.bf16.msra.mxu3 %v2332_v52  ;;  %v3005_v52 = vld [vmem:[%s3234_s15 + $0x404] sm:$0xf]  ;;  %v2488_v62 = vor.u32 %v2973_v48, %v2485_v49  ;;  %v3032_v18 = vld [vmem:[%s3234_s15 + $0x4d4] sm:$0xf0]  ;;  %v2699_v31 = vld [vmem:[%s3234_s15 + $0x4a8] sm:$0xf] }
  0x79   : > { %1436 = vmatpush.bf16.msra.mxu0 %v2568_v58  ;;  %v2912_v58 = vld [vmem:[%s3234_s15 + $0x114] sm:$0xf0]  ;;  %v2616_v3 = vor.u32 %v3005_v52, %v2613_v53  ;;  %v2716_v23 = vor.u32 %v3032_v18, %v2715_v17  ;;  %v2898_v33 = vld [vmem:[%s3234_s15 + $0xac] sm:$0xf]  ;;  %v2427_v38 = vld [vmem:[%s3234_s15 + $0x288] sm:$0xf] }
  0x7a   : > { %1450 = vmatpush.bf16.msra.mxu1 %v2696_v59  ;;  %v2475_v59 = vld [vmem:[%s3234_s15 + $0x2e8] sm:$0xf]  ;;  %v2964_v25 = vld [vmem:[%s3234_s15 + $0x2b4] sm:$0xf0]  ;;  %v2894_v46 = vld [vmem:[%s3234_s15 + $0x8c] sm:$0xf] }
  0x7b   : > { %1464 = vmatpush.bf16.msra.mxu2 %v2188_v60  ;;  %v2972_v60 = vld [vmem:[%s3234_s15 + $0x2f4] sm:$0xf0]  ;;  %v2683_v44 = vld [vmem:[%s3234_s15 + $0x488] sm:$0xf] }
  0x7c   : > { %1478 = vmatpush.bf16.msra.mxu3 %v2316_v1  ;;  %v2731_v1 = vld [vmem:[%s3234_s15 + $0x4e8] sm:$0xf]  ;;  %v2996_v28 = vld [vmem:[%s3234_s15 + $0x3b4] sm:$0xf0] }
  0x7d   : > { %1437 = vmatpush.bf16.msra.mxu0 %v2552_v7  ;;  %v2236_v7 = vor.u32 %v2912_v58, %v2235_v57  ;;  %v2732_v10 = vor.u32 %v3036_v2, %v2731_v1  ;;  %v3028_v32 = vld [vmem:[%s3234_s15 + $0x4b4] sm:$0xf0]  ;;  %v2539_v53 = vld [vmem:[%s3234_s15 + $0x368] sm:$0xf]  ;;  %v2890_v58 = vld [vmem:[%s3234_s15 + $0x6c] sm:$0xf] }
  0x7e   : > { %1451 = vmatpush.bf16.msra.mxu1 %v2680_v8  ;;  %v2476_v8 = vor.u32 %v2972_v60, %v2475_v59  ;;  %v2700_v37 = vor.u32 %v3028_v32, %v2699_v31  ;;  %v2960_v39 = vld [vmem:[%s3234_s15 + $0x294] sm:$0xf0]  ;;  %v2667_v56 = vld [vmem:[%s3234_s15 + $0x468] sm:$0xf]  ;;  %v2157_v59 = vld [vmem:[%s3234_s15 + $0x78] sm:$0xf0] }
  0x7f   : > { %1465 = vmatpush.bf16.msra.mxu2 %v2172_v9  ;;  %v2604_v9 = vor.u32 %v3004_v63, %v2603_v61  ;;  %v2992_v43 = vld [vmem:[%s3234_s15 + $0x394] sm:$0xf0]  ;;  %v2428_v48 = vor.u32 %v2960_v39, %v2427_v38  ;;  %v2395_v63 = vld [vmem:[%s3234_s15 + $0x248] sm:$0xf]  ;;  %v2970_v38 = vld [vmem:[%s3234_s15 + $0x2ec] sm:$0xf] }
  0x80   : > { %1479 = vmatpush.bf16.msra.mxu3 %v2300_v14  ;;  %v2587_v14 = vld [vmem:[%s3234_s15 + $0x3c8] sm:$0xf]  ;;  %v3024_v45 = vld [vmem:[%s3234_s15 + $0x494] sm:$0xf0] }
  0x81   : > { %1438 = vmatpush.bf16.msra.mxu0 %v2536_v20  ;;  %v2205_v20 = vld [vmem:[%s3234_s15 + $0xd8] sm:$0xf0]  ;;  %v2956_v52 = vld [vmem:[%s3234_s15 + $0x274] sm:$0xf0]  ;;  %v2523_v2 = vld [vmem:[%s3234_s15 + $0x348] sm:$0xf] }
  0x82   : > { %1452 = vmatpush.bf16.msra.mxu1 %v2664_v21  ;;  %v2460_v21 = vor.u32 %v2968_v12, %v2459_v11  ;;  %v2208_v27 = vor.u32 %v2902_v19, %v2205_v20  ;;  %v3020_v57 = vld [vmem:[%s3234_s15 + $0x474] sm:$0xf0]  ;;  %v2651_v5 = vld [vmem:[%s3234_s15 + $0x448] sm:$0xf]  ;;  %v2882_v20 = vld [vmem:[%s3234_s15 + $0x2c] sm:$0xf] }
  0x83   : > { %1466 = vmatpush.bf16.msra.mxu2 %v2156_v22  ;;  %v2588_v22 = vor.u32 %v3000_v16, %v2587_v14  ;;  %v2952_v1 = vld [vmem:[%s3234_s15 + $0x254] sm:$0xf0]  ;;  %v2379_v12 = vld [vmem:[%s3234_s15 + $0x228] sm:$0xf] }
  0x84   : > { %1480 = vmatpush.bf16.msra.mxu3 %v2284_v26  ;;  %v2571_v26 = vld [vmem:[%s3234_s15 + $0x3a8] sm:$0xf]  ;;  %v3016_v6 = vld [vmem:[%s3234_s15 + $0x454] sm:$0xf0] }
  0x85   : > { %1439 = vmatpush.bf16.msra.mxu0 %v2520_v34  ;;  %v2189_v34 = vld [vmem:[%s3234_s15 + $0xb8] sm:$0xf0]  ;;  %v2652_v11 = vor.u32 %v3016_v6, %v2651_v5  ;;  %v2948_v14 = vld [vmem:[%s3234_s15 + $0x234] sm:$0xf0]  ;;  %v2635_v18 = vld [vmem:[%s3234_s15 + $0x428] sm:$0xf] }
  0x86   : > { %1453 = vmatpush.bf16.msra.mxu1 %v2648_v35  ;;  %v2444_v35 = vor.u32 %v2964_v25, %v2443_v24  ;;  %v2192_v42 = vor.u32 %v2898_v33, %v2189_v34  ;;  %v2980_v17 = vld [vmem:[%s3234_s15 + $0x334] sm:$0xf0]  ;;  %v2619_v31 = vld [vmem:[%s3234_s15 + $0x408] sm:$0xf]  ;;  %v2878_v34 = vld [vmem:[%s3234_s15 + $0xc] sm:$0xf] }
  0x87   : > { %1467 = vmatpush.bf16.msra.mxu2 %v2140_v36  ;;  %v2572_v36 = vor.u32 %v2996_v28, %v2571_v26  ;;  %v3012_v19 = vld [vmem:[%s3234_s15 + $0x434] sm:$0xf0]  ;;  %v2445_v5 = vld [vmem:[%s3234_s15 + $0x2b8] sm:$0xf0]  ;;  %v2994_v6 = vld [vmem:[%s3234_s15 + $0x3ac] sm:$0xf] }
  0x88   : > { %1481 = vmatpush.bf16.msra.mxu3 %v2268_v41  ;;  %v2555_v41 = vld [vmem:[%s3234_s15 + $0x388] sm:$0xf]  ;;  %v2944_v24 = vld [vmem:[%s3234_s15 + $0x214] sm:$0xf0]  ;;  %v2636_v26 = vor.u32 %v3012_v19, %v2635_v18  ;;  %v2429_v18 = vld [vmem:[%s3234_s15 + $0x298] sm:$0xf0] }
  0x89   : > { %1440 = vmatpush.bf16.msra.mxu0 %v2504_v47  ;;  %v2173_v47 = vld [vmem:[%s3234_s15 + $0x98] sm:$0xf0]  ;;  %v2556_v49 = vor.u32 %v2992_v43, %v2555_v41  ;;  %v2976_v28 = vld [vmem:[%s3234_s15 + $0x314] sm:$0xf0]  ;;  %v2990_v19 = vld [vmem:[%s3234_s15 + $0x38c] sm:$0xf] }
  0x8a   : > { %1454 = vmatpush.bf16.msra.mxu1 %v2632_v50  ;;  %v2684_v50 = vor.u32 %v3024_v45, %v2683_v44  ;;  %v2176_v54 = vor.u32 %v2894_v46, %v2173_v47  ;;  %v3008_v33 = vld [vmem:[%s3234_s15 + $0x414] sm:$0xf0]  ;;  %v2477_v41 = vld [vmem:[%s3234_s15 + $0x2f8] sm:$0xf0]  ;;  %v3034_v46 = vld [vmem:[%s3234_s15 + $0x4ec] sm:$0xf] }
  0x8b   : > { %1468 = vmatpush.bf16.msra.mxu2 %v2124_v51  ;;  %v2411_v51 = vld [vmem:[%s3234_s15 + $0x268] sm:$0xf]  ;;  %v2605_v43 = vld [vmem:[%s3234_s15 + $0x3f8] sm:$0xf0]  ;;  %v2620_v45 = vor.u32 %v3008_v33, %v2619_v31 }
  0x8c   : > { %1482 = vmatpush.bf16.msra.mxu3 %v2252_v55  ;;  %v2988_v55 = vld [vmem:[%s3234_s15 + $0x374] sm:$0xf0]  ;;  %v2412_v60 = vor.u32 %v2956_v52, %v2411_v51  ;;  %v2733_v47 = vld [vmem:[%s3234_s15 + $0x4f8] sm:$0xf0]  ;;  %v2934_v52 = vld [vmem:[%s3234_s15 + $0x1cc] sm:$0xf] }
  0x8d   : > { %1441 = vmatpush.bf16.msra.mxu0 %v2488_v62  ;;  %v2540_v61 = vor.u32 %v2988_v55, %v2539_v53  ;;  %v2668_v62 = vor.u32 %v3020_v57, %v2667_v56  ;;  %v2333_v53 = vld [vmem:[%s3234_s15 + $0x1d8] sm:$0xf0]  ;;  %v2736_v55 = vor.u32 %v3034_v46, %v2733_v47  ;;  %v2998_v57 = vld [vmem:[%s3234_s15 + $0x3cc] sm:$0xf] }
  0x8e   : > { %1455 = vmatpush.bf16.msra.mxu1 %v2616_v3  ;;  %v2160_v3 = vor.u32 %v2890_v58, %v2157_v59  ;;  %v2461_v56 = vld [vmem:[%s3234_s15 + $0x2d8] sm:$0xf0]  ;;  %v3030_v59 = vld [vmem:[%s3234_s15 + $0x4cc] sm:$0xf] }
  0x8f   : > { %1469 = vmatpush.bf16.msra.mxu2 %v2108_v4  ;;  %v2984_v4 = vld [vmem:[%s3234_s15 + $0x354] sm:$0xf0]  ;;  %v2589_v58 = vld [vmem:[%s3234_s15 + $0x3d8] sm:$0xf0]  ;;  %v3014_v47 = vld [vmem:[%s3234_s15 + $0x44c] sm:$0xf] }
  0x90   : > { %1483 = vmatpush.bf16.msra.mxu3 %v2236_v7  ;;  %1442 = vmatmul.bf16.vlgmr.msra.gmra.mxu0 %v3349_v29  ;;  %v2886_v7 = vld [vmem:[%s3234_s15 + $0x4c] sm:$0xf]  ;;  %v2413_v31 = vld [vmem:[%s3234_s15 + $0x278] sm:$0xf0] }
  0x91   : > { %1490 = vmatpush.bf16.msrb.mxu0 %v2476_v8  ;;  %1456 = vmatmul.bf16.vlgmr.msra.gmra.mxu1 %v3400_v40  ;;  %v2141_v8 = vld [vmem:[%s3234_s15 + $0x58] sm:$0xf0] }
  0x92   : > { %1504 = vmatpush.bf16.msrb.mxu1 %v2604_v9  ;;  %1470 = vmatmul.bf16.vlgmr.msra.gmra.mxu2 %v3323_v0  ;;  %v2396_v9 = vor.u32 %v2952_v1, %v2395_v63  ;;  %v2144_v16 = vor.u32 %v2886_v7, %v2141_v8  ;;  %v2592_v63 = vor.u32 %v2998_v57, %v2589_v58  ;;  %v2930_v1 = vld [vmem:[%s3234_s15 + $0x1ac] sm:$0xf]  ;;  %v2573_v7 = vld [vmem:[%s3234_s15 + $0x3b8] sm:$0xf0] }
  0x93   : > { %1518 = vmatpush.bf16.msrb.mxu2 %v2732_v10  ;;  %1484 = vmatmul.bf16.vlgmr.msra.gmra.mxu3 %v3351_v30  ;;  %v2524_v10 = vor.u32 %v2984_v4, %v2523_v2  ;;  %v2317_v2 = vld [vmem:[%s3234_s15 + $0x1b8] sm:$0xf0]  ;;  %v3026_v8 = vld [vmem:[%s3234_s15 + $0x4ac] sm:$0xf] }
  0x94   : > { %1532 = vmatpush.bf16.msrb.mxu3 %v2224_v15  ;;  %v2507_v15 = vld [vmem:[%s3234_s15 + $0x328] sm:$0xf]  ;;  %v2541_v33 = vld [vmem:[%s3234_s15 + $0x378] sm:$0xf0]  ;;  %v2978_v57 = vld [vmem:[%s3234_s15 + $0x32c] sm:$0xf] }
  0x95   : > { %1491 = vmatpush.bf16.msrb.mxu0 %v2460_v21  ;;  %v2125_v21 = vld [vmem:[%s3234_s15 + $0x38] sm:$0xf0]  ;;  %v2508_v25 = vor.u32 %v2980_v17, %v2507_v15 }
  0x96   : > { %1505 = vmatpush.bf16.msrb.mxu1 %v2588_v22  ;;  %v2380_v22 = vor.u32 %v2948_v14, %v2379_v12  ;;  %v2128_v32 = vor.u32 %v2882_v20, %v2125_v21  ;;  %v2576_v12 = vor.u32 %v2994_v6, %v2573_v7  ;;  %v2926_v14 = vld [vmem:[%s3234_s15 + $0x18c] sm:$0xf]  ;;  %v2301_v15 = vld [vmem:[%s3234_s15 + $0x198] sm:$0xf0] }
  0x97   : > { %1519 = vmatpush.bf16.msrb.mxu2 %v2716_v23  ;;  %v2363_v23 = vld [vmem:[%s3234_s15 + $0x208] sm:$0xf]  ;;  %v2557_v20 = vld [vmem:[%s3234_s15 + $0x398] sm:$0xf0]  ;;  %v3022_v21 = vld [vmem:[%s3234_s15 + $0x48c] sm:$0xf] }
  0x98   : > { %1533 = vmatpush.bf16.msrb.mxu3 %v2208_v27  ;;  %v2491_v27 = vld [vmem:[%s3234_s15 + $0x308] sm:$0xf]  ;;  %v2364_v39 = vor.u32 %v2944_v24, %v2363_v23  ;;  %v2560_v24 = vor.u32 %v2990_v19, %v2557_v20  ;;  %v2525_v46 = vld [vmem:[%s3234_s15 + $0x358] sm:$0xf0]  ;;  %v2974_v6 = vld [vmem:[%s3234_s15 + $0x30c] sm:$0xf] }
  0x99   : > { %1492 = vmatpush.bf16.msrb.mxu0 %v2444_v35  ;;  %v2109_v35 = vld [vmem:[%s3234_s15 + $0x18] sm:$0xf0]  ;;  %v2492_v44 = vor.u32 %v2976_v28, %v2491_v27  ;;  %v2954_v27 = vld [vmem:[%s3234_s15 + $0x26c] sm:$0xf] }
  0x9a   : > { %1506 = vmatpush.bf16.msrb.mxu1 %v2572_v36  ;;  %v2938_v36 = vld [vmem:[%s3234_s15 + $0x1ec] sm:$0xf]  ;;  %v2509_v58 = vld [vmem:[%s3234_s15 + $0x338] sm:$0xf0] }
  0x9b   : > { %1520 = vmatpush.bf16.msrb.mxu2 %v2700_v37  ;;  %v2349_v37 = vld [vmem:[%s3234_s15 + $0x1f8] sm:$0xf0] }
  0x9c   : > { %1534 = vmatpush.bf16.msrb.mxu3 %v2192_v42  ;;  %v3002_v42 = vld [vmem:[%s3234_s15 + $0x3ec] sm:$0xf]  ;;  %v2493_v7 = vld [vmem:[%s3234_s15 + $0x318] sm:$0xf0] }
  0x9d   : > { %1493 = vmatpush.bf16.msrb.mxu0 %v2428_v48  ;;  %v2112_v48 = vor.u32 %v2878_v34, %v2109_v35  ;;  %v2608_v51 = vor.u32 %v3002_v42, %v2605_v43  ;;  %v3018_v34 = vld [vmem:[%s3234_s15 + $0x46c] sm:$0xf]  ;;  %v2669_v35 = vld [vmem:[%s3234_s15 + $0x478] sm:$0xf0] }
  0x9e   : > { %1507 = vmatpush.bf16.msrb.mxu1 %v2556_v49  ;;  %v2352_v49 = vor.u32 %v2938_v36, %v2349_v37  ;;  %v2416_v37 = vor.u32 %v2954_v27, %v2413_v31  ;;  %v2950_v42 = vld [vmem:[%s3234_s15 + $0x24c] sm:$0xf]  ;;  %v2672_v43 = vor.u32 %v3018_v34, %v2669_v35 }
  0x9f   : > { %1521 = vmatpush.bf16.msrb.mxu2 %v2684_v50  ;;  %v2480_v50 = vor.u32 %v2970_v38, %v2477_v41  ;;  %v2269_v41 = vld [vmem:[%s3234_s15 + $0x158] sm:$0xf0] }
  0xa0   : > { %1535 = vmatpush.bf16.msrb.mxu3 %v2176_v54  ;;  %v2966_v54 = vld [vmem:[%s3234_s15 + $0x2cc] sm:$0xf] }
  0xa1   : > { %1494 = vmatpush.bf16.msrb.mxu0 %v2412_v60  ;;  %v2717_v60 = vld [vmem:[%s3234_s15 + $0x4d8] sm:$0xf0] }
  0xa2   : > { %1508 = vmatpush.bf16.msrb.mxu1 %v2540_v61  ;;  %v2336_v61 = vor.u32 %v2934_v52, %v2333_v53  ;;  %v2720_v4 = vor.u32 %v3030_v59, %v2717_v60  ;;  %v2914_v52 = vld [vmem:[%s3234_s15 + $0x12c] sm:$0xf]  ;;  %v2253_v53 = vld [vmem:[%s3234_s15 + $0x138] sm:$0xf0] }
  0xa3   : > { %1522 = vmatpush.bf16.msrb.mxu2 %v2668_v62  ;;  %v2464_v62 = vor.u32 %v2966_v54, %v2461_v56  ;;  %v2946_v54 = vld [vmem:[%s3234_s15 + $0x22c] sm:$0xf]  ;;  %v2381_v56 = vld [vmem:[%s3234_s15 + $0x238] sm:$0xf0] }
  0xa4   : > { %1536 = vmatpush.bf16.msrb.mxu3 %v2160_v3  ;;  %v2962_v3 = vld [vmem:[%s3234_s15 + $0x2ac] sm:$0xf]  ;;  %v2637_v60 = vld [vmem:[%s3234_s15 + $0x438] sm:$0xf0] }
  0xa5   : > { %1495 = vmatpush.bf16.msrb.mxu0 %v2396_v9  ;;  %v2701_v9 = vld [vmem:[%s3234_s15 + $0x4b8] sm:$0xf0]  ;;  %v3010_v59 = vld [vmem:[%s3234_s15 + $0x42c] sm:$0xf] }
  0xa6   : > { %1509 = vmatpush.bf16.msrb.mxu1 %v2524_v10  ;;  %v2320_v10 = vor.u32 %v2930_v1, %v2317_v2  ;;  %v2704_v17 = vor.u32 %v3026_v8, %v2701_v9  ;;  %v2910_v1 = vld [vmem:[%s3234_s15 + $0x10c] sm:$0xf]  ;;  %v2237_v2 = vld [vmem:[%s3234_s15 + $0x118] sm:$0xf0] }
  0xa7   : > { %1523 = vmatpush.bf16.msrb.mxu2 %v2652_v11  ;;  %v2448_v11 = vor.u32 %v2962_v3, %v2445_v5  ;;  %v2942_v3 = vld [vmem:[%s3234_s15 + $0x20c] sm:$0xf]  ;;  %v2365_v5 = vld [vmem:[%s3234_s15 + $0x218] sm:$0xf0] }
  0xa8   : > { %1537 = vmatpush.bf16.msrb.mxu3 %v2144_v16  ;;  %v2958_v16 = vld [vmem:[%s3234_s15 + $0x28c] sm:$0xf]  ;;  %v2621_v9 = vld [vmem:[%s3234_s15 + $0x418] sm:$0xf0] }
  0xa9   : > { %1496 = vmatpush.bf16.msrb.mxu0 %v2380_v22  ;;  %v2304_v22 = vor.u32 %v2926_v14, %v2301_v15  ;;  %v2432_v23 = vor.u32 %v2958_v16, %v2429_v18  ;;  %v3006_v8 = vld [vmem:[%s3234_s15 + $0x40c] sm:$0xf] }
  0xaa   : > { %1510 = vmatpush.bf16.msrb.mxu1 %v2508_v25  ;;  %v2922_v25 = vld [vmem:[%s3234_s15 + $0x16c] sm:$0xf]  ;;  %v2624_v14 = vor.u32 %v3006_v8, %v2621_v9 }
  0xab   : > { %1524 = vmatpush.bf16.msrb.mxu2 %v2636_v26  ;;  %v2285_v26 = vld [vmem:[%s3234_s15 + $0x178] sm:$0xf0] }
  0xac   : > { %1538 = vmatpush.bf16.msrb.mxu3 %v2128_v32  ;;  %v2986_v32 = vld [vmem:[%s3234_s15 + $0x36c] sm:$0xf]  ;;  %v2288_v36 = vor.u32 %v2922_v25, %v2285_v26 }
  0xad   : > { %1497 = vmatpush.bf16.msrb.mxu0 %v2364_v39  ;;  %v2544_v38 = vor.u32 %v2986_v32, %v2541_v33  ;;  %v2918_v39 = vld [vmem:[%s3234_s15 + $0x14c] sm:$0xf] }
  0xae   : > { %1511 = vmatpush.bf16.msrb.mxu1 %v2492_v44  ;;  %v2397_v44 = vld [vmem:[%s3234_s15 + $0x258] sm:$0xf0] }
  0xaf   : > { %1525 = vmatpush.bf16.msrb.mxu2 %v2620_v45  ;;  %v2982_v45 = vld [vmem:[%s3234_s15 + $0x34c] sm:$0xf] }
  0xb0   : > { %1539 = vmatpush.bf16.msrb.mxu3 %v2112_v48  ;;  %1498 = vmatmul.bf16.vlgmr.msrb.gmra.mxu0 %v3335_v13  ;;  %v2653_v48 = vld [vmem:[%s3234_s15 + $0x458] sm:$0xf0] }
  0xb1   : > { %1546 = vmatpush.bf16.msra.mxu0 %v2352_v49  ;;  %1512 = vmatmul.bf16.vlgmr.msrb.gmra.mxu1 %v3349_v29  ;;  %v2272_v49 = vor.u32 %v2918_v39, %v2269_v41 }
  0xb2   : > { %1560 = vmatpush.bf16.msra.mxu1 %v2480_v50  ;;  %1526 = vmatmul.bf16.vlgmr.msrb.gmra.mxu2 %v3400_v40  ;;  %v2400_v50 = vor.u32 %v2950_v42, %v2397_v44 }
  0xb3   : > { %1574 = vmatpush.bf16.msra.mxu2 %v2608_v51  ;;  %1540 = vmatmul.bf16.vlgmr.msrb.gmra.mxu3 %v3323_v0  ;;  %v2685_v0 = vld [vmem:[%s3234_s15 + $0x498] sm:$0xf0]  ;;  %v2528_v51 = vor.u32 %v2982_v45, %v2525_v46  ;;  %v323_v45 = vld [vmem:[#allocation2] sm:$0xff] }
  0xb4   : > { %1588 = vmatpush.bf16.msra.mxu3 %v2736_v55  ;;  %v2688_v28 = vor.u32 %v3022_v21, %v2685_v0  ;;  %v2656_v55 = vor.u32 %v3014_v47, %v2653_v48 }
  0xb5   : > { %1547 = vmatpush.bf16.msra.mxu0 %v2336_v61  ;;  %v2256_v61 = vor.u32 %v2914_v52, %v2253_v53 }
  0xb6   : > { %1561 = vmatpush.bf16.msra.mxu1 %v2464_v62  ;;  %v2384_v62 = vor.u32 %v2946_v54, %v2381_v56  ;;  %v327_v54 = vld [vmem:[#allocation2 + $0x20] sm:$0xff] }
  0xb7   : > { %1575 = vmatpush.bf16.msra.mxu2 %v2592_v63  ;;  %v2512_v63 = vor.u32 %v2978_v57, %v2509_v58 }
  0xb8   : > { %1589 = vmatpush.bf16.msra.mxu3 %v2720_v4  ;;  %v2640_v4 = vor.u32 %v3010_v59, %v2637_v60 }
  0xb9   : > { %1548 = vmatpush.bf16.msra.mxu0 %v2320_v10  ;;  %v2240_v10 = vor.u32 %v2910_v1, %v2237_v2 }
  0xba   : > { %1562 = vmatpush.bf16.msra.mxu1 %v2448_v11  ;;  %v2368_v11 = vor.u32 %v2942_v3, %v2365_v5  ;;  %v324_v3 = vld [vmem:[#allocation2 + $0x18] sm:$0xff] }
  0xbb   : > { %1576 = vmatpush.bf16.msra.mxu2 %v2576_v12  ;;  %v2496_v12 = vor.u32 %v2974_v6, %v2493_v7 }
  0xbc   : > { %1590 = vmatpush.bf16.msra.mxu3 %v2704_v17 }
  0xbd   : > { %1549 = vmatpush.bf16.msra.mxu0 %v2304_v22 }
  0xbe   : > { %1563 = vmatpush.bf16.msra.mxu1 %v2432_v23 }
  0xbf   : > { %1577 = vmatpush.bf16.msra.mxu2 %v2560_v24  ;;  %v322_v24 = vld [vmem:[#allocation2 + $0x30] sm:$0xff] }
  0xc0   : > { %1591 = vmatpush.bf16.msra.mxu3 %v2688_v28 }
  0xc1   : > { %1550 = vmatpush.bf16.msra.mxu0 %v2288_v36 }
  0xc2   : > { %1564 = vmatpush.bf16.msra.mxu1 %v2416_v37 }
  0xc3   : > { %1578 = vmatpush.bf16.msra.mxu2 %v2544_v38 }
  0xc4   : > { %1592 = vmatpush.bf16.msra.mxu3 %v2672_v43 }
  0xc5   : > { %1551 = vmatpush.bf16.msra.mxu0 %v2272_v49 }
  0xc6   : > { %1565 = vmatpush.bf16.msra.mxu1 %v2400_v50 }
  0xc7   : > { %1579 = vmatpush.bf16.msra.mxu2 %v2528_v51 }
  0xc8   : > { %1593 = vmatpush.bf16.msra.mxu3 %v2656_v55 }
  0xc9   : > { %1552 = vmatpush.bf16.msra.mxu0 %v2256_v61 }
  0xca   : > { %1566 = vmatpush.bf16.msra.mxu1 %v2384_v62 }
  0xcb   : > { %1580 = vmatpush.bf16.msra.mxu2 %v2512_v63 }
  0xcc   : > { %1594 = vmatpush.bf16.msra.mxu3 %v2640_v4 }
  0xcd   : > { %1553 = vmatpush.bf16.msra.mxu0 %v2240_v10 }
  0xce   : > { %1567 = vmatpush.bf16.msra.mxu1 %v2368_v11 }
  0xcf   : > { %1581 = vmatpush.bf16.msra.mxu2 %v2496_v12  ;;  %v328_v12 = vld [vmem:[#allocation2 + $0x28] sm:$0xff] }
  0xd0   : > { %1595 = vmatpush.bf16.msra.mxu3 %v2624_v14  ;;  %1554 = vmatmul.bf16.vlgmr.msra.gmra.mxu0 %v3351_v30  ;;  %v1331_v15 = vpop.f32.mrf.mxu0 }
  0xd1   : > { %1568 = vmatmul.bf16.vlgmr.msra.gmra.mxu1 %v3335_v13 }
  0xd2   : > { %1582 = vmatmul.bf16.vlgmr.msra.gmra.mxu2 %v3349_v29 }
  0xd3   : > { %1596 = vmatmul.bf16.vlgmr.msra.gmra.mxu3 %v3400_v40  ;;  %v326_v40 = vld [vmem:[#allocation2 + $0x8] sm:$0xff] }
  0xd4   : > { %v1345_v16 = vpop.f32.mrf.mxu1 }
  0xd5   : > { %v1346_v17 = vadd.f32 %v1345_v16, %v1331_v15 }
  0xd7   : > { %v1359_v19 = vpop.f32.mrf.mxu2 }
  0xd8   : > { %v1333_v18 = vpop.f32.mrf.mxu0  ;;  %v1360_v20 = vadd.f32 %v1359_v19, %v1346_v17 }
  0xd9   : > { %v1373_v21 = vpop.f32.mrf.mxu3 }
  0xda   : > { %v1374_v22 = vadd.f32 %v1373_v21, %v1360_v20 }
  0xdc   : > { %v1347_v0 = vpop.f32.mrf.mxu1 }
  0xdd   : > { %v1348_v23 = vadd.f32 %v1347_v0, %v1333_v18 }
  0xdf   : > { %v1361_v26 = vpop.f32.mrf.mxu2 }
  0xe0   : > { %v1362_v13 = vadd.f32 %v1361_v26, %v1348_v23  ;;  %v325_v26 = vld [vmem:[#allocation2 + $0x10] sm:$0xff] }
  0xe1   : > { %v1375_v28 = vpop.f32.mrf.mxu3 }
  0xe2   : > { %v1376_v29 = vadd.f32 %v1375_v28, %v1362_v13 }
  0xed   : > { %v1387_v25 = vpop.f32.mrf.mxu0 }
  0xee   : > { %v1388_v30 = vadd.f32 %v1387_v25, %v1374_v22  ;;  %v1401_v34 = vpop.f32.mrf.mxu1 }
  0xf0   : > { %v1602_v27 = vadd.f32 %v1388_v30, %v322_v24 }
  0xf2   : > { %1610 = vst [vmem:[#allocation2 + $0x30] sm:$0xff] %v1602_v27 }
  0xf5   : > { %v1389_v31 = vpop.f32.mrf.mxu0  ;;  %v1415_v35 = vpop.f32.mrf.mxu2 }
  0xf6   : > { %v1390_v32 = vadd.f32 %v1389_v31, %v1376_v29  ;;  %v1403_v36 = vpop.f32.mrf.mxu1  ;;  %v1416_v37 = vadd.f32 %v1415_v35, %v1401_v34  ;;  %v1429_v38 = vpop.f32.mrf.mxu3 }
  0xf8   : > { %v1606_v33 = vadd.f32 %v1390_v32, %v326_v40  ;;  %v1430_v39 = vadd.f32 %v1429_v38, %v1416_v37  ;;  %v329_v32 = vld [vmem:[#allocation2 + $0x38] sm:$0xff] }
  0xfa   : > { %1614 = vst [vmem:[#allocation2 + $0x8] sm:$0xff] %v1606_v33 }
  0xfd   : > { %v1417_v42 = vpop.f32.mrf.mxu2 }
  0xfe   : > { %v1418_v46 = vadd.f32 %v1417_v42, %v1403_v36  ;;  %v1431_v48 = vpop.f32.mrf.mxu3 }
 0x100   : > { %v1432_v50 = vadd.f32 %v1431_v48, %v1418_v46 }
 0x10d   : > { %v1443_v41 = vpop.f32.mrf.mxu0 }
 0x10e   : > { %v1444_v43 = vadd.f32 %v1443_v41, %v1430_v39  ;;  %v1457_v44 = vpop.f32.mrf.mxu1 }
 0x110   : > { %v1458_v47 = vadd.f32 %v1457_v44, %v1444_v43 }
 0x112   : > { %v1603_v49 = vadd.f32 %v1458_v47, %v323_v45 }
 0x114   : > { %1611 = vst [vmem:[#allocation2] sm:$0xff] %v1603_v49 }
 0x115   : > { %v1445_v51 = vpop.f32.mrf.mxu0  ;;  %v1471_v57 = vpop.f32.mrf.mxu2 }
 0x116   : > { %v1446_v52 = vadd.f32 %v1445_v51, %v1432_v50  ;;  %v1459_v53 = vpop.f32.mrf.mxu1  ;;  %v1485_v58 = vpop.f32.mrf.mxu3 }
 0x117   : > { %v1486_v59 = vadd.f32 %v1485_v58, %v1471_v57 }
 0x118   : > { %v1460_v55 = vadd.f32 %v1459_v53, %v1446_v52 }
 0x11a   : > { %v1607_v56 = vadd.f32 %v1460_v55, %v327_v54 }
 0x11c   : > { %1615 = vst [vmem:[#allocation2 + $0x20] sm:$0xff] %v1607_v56 }
 0x11d   : > { %v1473_v60 = vpop.f32.mrf.mxu2 }
 0x11e   : > { %v1487_v2 = vpop.f32.mrf.mxu3 }
 0x11f   : > { %v1488_v5 = vadd.f32 %v1487_v2, %v1473_v60 }
 0x12d   : > { %v1499_v61 = vpop.f32.mrf.mxu0 }
 0x12e   : > { %v1500_v62 = vadd.f32 %v1499_v61, %v1486_v59  ;;  %v1513_v63 = vpop.f32.mrf.mxu1 }
 0x130   : > { %v1514_v1 = vadd.f32 %v1513_v63, %v1500_v62 }
 0x135   : > { %v1527_v4 = vpop.f32.mrf.mxu2  ;;  %v1501_v7 = vpop.f32.mrf.mxu0 }
 0x136   : > { %v1528_v6 = vadd.f32 %v1527_v4, %v1514_v1  ;;  %v1502_v9 = vadd.f32 %v1501_v7, %v1488_v5  ;;  %v1515_v10 = vpop.f32.mrf.mxu1  ;;  %v1541_v17 = vpop.f32.mrf.mxu3 }
 0x138   : > { %v1604_v8 = vadd.f32 %v1528_v6, %v324_v3  ;;  %v1516_v11 = vadd.f32 %v1515_v10, %v1502_v9 }
 0x13a   : > { %1612 = vst [vmem:[#allocation2 + $0x18] sm:$0xff] %v1604_v8 }
 0x13d   : > { %v1529_v14 = vpop.f32.mrf.mxu2 }
 0x13e   : > { %v1530_v15 = vadd.f32 %v1529_v14, %v1516_v11  ;;  %v1543_v18 = vpop.f32.mrf.mxu3 }
 0x140   : > { %v1608_v16 = vadd.f32 %v1530_v15, %v328_v12 }
 0x142   : > { %1616 = vst [vmem:[#allocation2 + $0x28] sm:$0xff] %v1608_v16 }
 0x14d   : > { %v1555_v19 = vpop.f32.mrf.mxu0 }
 0x14e   : > { %v1556_v20 = vadd.f32 %v1555_v19, %v1541_v17  ;;  %v1569_v21 = vpop.f32.mrf.mxu1 }
 0x150   : > { %v1570_v0 = vadd.f32 %v1569_v21, %v1556_v20 }
 0x155   : > { %v1583_v22 = vpop.f32.mrf.mxu2  ;;  %v1557_v25 = vpop.f32.mrf.mxu0 }
 0x156   : > { %v1584_v23 = vadd.f32 %v1583_v22, %v1570_v0  ;;  %v1597_v24 = vpop.f32.mrf.mxu3  ;;  %v1558_v27 = vadd.f32 %v1557_v25, %v1543_v18  ;;  %v1571_v28 = vpop.f32.mrf.mxu1 }
 0x158   : > { %v1598_v30 = vadd.f32 %v1597_v24, %v1584_v23  ;;  %v1572_v29 = vadd.f32 %v1571_v28, %v1558_v27 }
 0x15a   : > { %v1605_v13 = vadd.f32 %v1598_v30, %v325_v26 }
 0x15c   : > { %1613 = vst [vmem:[#allocation2 + $0x10] sm:$0xff] %v1605_v13 }
 0x15d   : > { %v1585_v40 = vpop.f32.mrf.mxu2 }
 0x15e   : > { %v1586_v31 = vadd.f32 %v1585_v40, %v1572_v29  ;;  %v1599_v33 = vpop.f32.mrf.mxu3 }
 0x160   : > { %v1600_v34 = vadd.f32 %v1599_v33, %v1586_v31  ;;  %1621 = sbr.rel (%p2737_p11) target bundleno = 536 (0x218), region = 74 }
 0x162   : > { %v1609_v35 = vadd.f32 %v1600_v34, %v329_v32 }
 0x164   : > { %1617 = vst [vmem:[#allocation2 + $0x38] sm:$0xff] %v1609_v35 }
 0x165   : > { %v3044_v36 = vld [vmem:[%s3726_s3 + $0x38] sm:$0xff]  ;;  %v3043_v41 = vld [vmem:[%s3726_s3 + $0x30] sm:$0xff]  ;;  %v3042_v45 = vld [vmem:[%s3726_s3 + $0x28] sm:$0xff] }
 0x166   : > { %v3052_v37 = vld [vmem:[%s3726_s3 + $0x78] sm:$0xff]  ;;  %1920 = vmatpush.bf16.msra.mxu0 %v3044_v36  ;;  %v3051_v42 = vld [vmem:[%s3726_s3 + $0x70] sm:$0xff]  ;;  %v3050_v46 = vld [vmem:[%s3726_s3 + $0x68] sm:$0xff] }
 0x167   : > { %v3060_v38 = vld [vmem:[%s3726_s3 + $0xb8] sm:$0xff]  ;;  %1934 = vmatpush.bf16.msra.mxu1 %v3052_v37  ;;  %v3059_v43 = vld [vmem:[%s3726_s3 + $0xb0] sm:$0xff]  ;;  %v3058_v47 = vld [vmem:[%s3726_s3 + $0xa8] sm:$0xff] }
 0x168   : > { %v3068_v39 = vld [vmem:[%s3726_s3 + $0xf8] sm:$0xff]  ;;  %1948 = vmatpush.bf16.msra.mxu2 %v3060_v38  ;;  %v3067_v44 = vld [vmem:[%s3726_s3 + $0xf0] sm:$0xff]  ;;  %v3066_v48 = vld [vmem:[%s3726_s3 + $0xe8] sm:$0xff] }
 0x169   : > { %1962 = vmatpush.bf16.msra.mxu3 %v3068_v39  ;;  %v3041_v49 = vld [vmem:[%s3726_s3 + $0x20] sm:$0xff]  ;;  %v3040_v54 = vld [vmem:[%s3726_s3 + $0x18] sm:$0xff]  ;;  %v3039_v58 = vld [vmem:[%s3726_s3 + $0x10] sm:$0xff] }
 0x16a   : > { %1921 = vmatpush.bf16.msra.mxu0 %v3043_v41  ;;  %v3049_v50 = vld [vmem:[%s3726_s3 + $0x60] sm:$0xff]  ;;  %v3048_v55 = vld [vmem:[%s3726_s3 + $0x58] sm:$0xff]  ;;  %v3047_v59 = vld [vmem:[%s3726_s3 + $0x50] sm:$0xff] }
 0x16b   : > { %1935 = vmatpush.bf16.msra.mxu1 %v3051_v42  ;;  %v3057_v51 = vld [vmem:[%s3726_s3 + $0xa0] sm:$0xff]  ;;  %v3056_v56 = vld [vmem:[%s3726_s3 + $0x98] sm:$0xff]  ;;  %v3055_v61 = vld [vmem:[%s3726_s3 + $0x90] sm:$0xff] }
 0x16c   : > { %1949 = vmatpush.bf16.msra.mxu2 %v3059_v43  ;;  %v3065_v52 = vld [vmem:[%s3726_s3 + $0xe0] sm:$0xff]  ;;  %v3064_v57 = vld [vmem:[%s3726_s3 + $0xd8] sm:$0xff]  ;;  %v3063_v62 = vld [vmem:[%s3726_s3 + $0xd0] sm:$0xff] }
 0x16d   : > { %1963 = vmatpush.bf16.msra.mxu3 %v3067_v44  ;;  %v1630_v53 = vld [vmem:[%s3725_s2] sm:$0xf]  ;;  %v1622_v63 = vld [vmem:[#allocation2 + $0x30] sm:$0xff]  ;;  %v1626_v1 = vld [vmem:[#allocation2 + $0x8] sm:$0xff] }
 0x16e   : > { %1922 = vmatpush.bf16.msra.mxu0 %v3042_v45  ;;  %v1632_v60 = vperm.slane %v1630_v53, 0  ;;  %v1633_v2 = vperm.slane %v1630_v53, 1  ;;  %v1634_v3 = vperm.slane %v1630_v53, 2  ;;  %v1623_v4 = vld [vmem:[#allocation2] sm:$0xff]  ;;  %v1624_v6 = vld [vmem:[#allocation2 + $0x18] sm:$0xff]  ;;  %v1635_v7 = vperm.slane %v1630_v53, 3 }
 0x16f   : > { %1936 = vmatpush.bf16.msra.mxu1 %v3050_v46  ;;  %v1627_v5 = vld [vmem:[#allocation2 + $0x20] sm:$0xff]  ;;  %v1628_v8 = vld [vmem:[#allocation2 + $0x28] sm:$0xff]  ;;  %v1625_v9 = vld [vmem:[#allocation2 + $0x10] sm:$0xff] }
 0x170   : > { %1950 = vmatpush.bf16.msra.mxu2 %v3058_v47  ;;  %v1629_v10 = vld [vmem:[#allocation2 + $0x38] sm:$0xff]  ;;  %v1640_v11 = vadd.f32 %v1632_v60, %v1622_v63  ;;  %v1644_v12 = vadd.f32 %v1632_v60, %v1626_v1  ;;  %v1641_v14 = vadd.f32 %v1633_v2, %v1623_v4  ;;  %v1645_v15 = vadd.f32 %v1633_v2, %v1627_v5  ;;  %v3038_v17 = vld [vmem:[%s3726_s3 + $0x8] sm:$0xff]  ;;  %v3037_v30 = vld [vmem:[%s3726_s3] sm:$0xff] }
 0x171   : > { %1964 = vmatpush.bf16.msra.mxu3 %v3066_v48  ;;  %v1642_v16 = vadd.f32 %v1634_v3, %v1624_v6  ;;  %v3046_v18 = vld [vmem:[%s3726_s3 + $0x48] sm:$0xff]  ;;  %v1646_v19 = vadd.f32 %v1634_v3, %v1628_v8  ;;  %v1643_v20 = vadd.f32 %v1635_v7, %v1625_v9  ;;  %v1647_v21 = vadd.f32 %v1635_v7, %v1629_v10  ;;  %v3045_v27 = vld [vmem:[%s3726_s3 + $0x40] sm:$0xff] }
 0x172   : > { %1923 = vmatpush.bf16.msra.mxu0 %v3041_v49  ;;  %v3054_v0 = vld [vmem:[%s3726_s3 + $0x88] sm:$0xff]  ;;  %v1648_v23 = vmax.f32 %v1640_v11, 0.0  ;;  %v1652_v24 = vmax.f32 %v1644_v12, 0.0  ;;  %v1649_v25 = vmax.f32 %v1641_v14, 0.0  ;;  %v1653_v26 = vmax.f32 %v1645_v15, 0.0  ;;  %v3053_v31 = vld [vmem:[%s3726_s3 + $0x80] sm:$0xff] }
 0x173   : > { %1937 = vmatpush.bf16.msra.mxu1 %v3049_v50  ;;  %v3062_v22 = vld [vmem:[%s3726_s3 + $0xc8] sm:$0xff]  ;;  %v1650_v13 = vmax.f32 %v1642_v16, 0.0  ;;  %v1654_v28 = vmax.f32 %v1646_v19, 0.0  ;;  %v1651_v29 = vmax.f32 %v1643_v20, 0.0  ;;  %v1655_v40 = vmax.f32 %v1647_v21, 0.0  ;;  %v3061_v32 = vld [vmem:[%s3726_s3 + $0xc0] sm:$0xff] }
 0x174   : > { %1951 = vmatpush.bf16.msra.mxu2 %v3057_v51  ;;  %v1656_v33 = vpack.c.bf16 %v1652_v24, %v1648_v23  ;;  %v1657_v34 = vpack.c.bf16 %v1653_v26, %v1649_v25  ;;  %v3112_v37 = vld [vmem:[%s3727_s4] ss:$0 sm:$0xff] }
 0x175   : > { %1965 = vmatpush.bf16.msra.mxu3 %v3065_v52  ;;  %v1658_v35 = vpack.c.bf16 %v1654_v28, %v1650_v13  ;;  %v1659_v36 = vpack.c.bf16 %v1655_v40, %v1651_v29 }
 0x176   : > { %1924 = vmatpush.bf16.msra.mxu0 %v3040_v54 }
 0x177   : > { %1938 = vmatpush.bf16.msra.mxu1 %v3048_v55 }
 0x178   : > { %1952 = vmatpush.bf16.msra.mxu2 %v3056_v56 }
 0x179   : > { %1966 = vmatpush.bf16.msra.mxu3 %v3064_v57 }
 0x17a   : > { %1925 = vmatpush.bf16.msra.mxu0 %v3039_v58 }
 0x17b   : > { %1939 = vmatpush.bf16.msra.mxu1 %v3047_v59 }
 0x17c   : > { %1953 = vmatpush.bf16.msra.mxu2 %v3055_v61 }
 0x17d   : > { %1967 = vmatpush.bf16.msra.mxu3 %v3063_v62 }
 0x17e   : > { %1926 = vmatpush.bf16.msra.mxu0 %v3038_v17 }
 0x17f   : > { %1940 = vmatpush.bf16.msra.mxu1 %v3046_v18 }
 0x180   : > { %1954 = vmatpush.bf16.msra.mxu2 %v3054_v0 }
 0x181   : > { %1968 = vmatpush.bf16.msra.mxu3 %v3062_v22 }
 0x182   : > { %1927 = vmatpush.bf16.msra.mxu0 %v3037_v30 }
 0x183   : > { %1941 = vmatpush.bf16.msra.mxu1 %v3045_v27 }
 0x184   : > { %1955 = vmatpush.bf16.msra.mxu2 %v3053_v31 }
 0x185   : > { %1969 = vmatpush.bf16.msra.mxu3 %v3061_v32  ;;  %1928 = vmatmul.bf16.vlgmr.msra.gmra.mxu0 %v1656_v33 }
 0x186   : > { %1942 = vmatmul.bf16.vlgmr.msra.gmra.mxu1 %v1657_v34 }
 0x187   : > { %1956 = vmatmul.bf16.vlgmr.msra.gmra.mxu2 %v1658_v35 }
 0x188   : > { %1970 = vmatmul.bf16.vlgmr.msra.gmra.mxu3 %v1659_v36 }
 0x202   : > { %v1929_v38 = vpop.f32.mrf.mxu0 }
 0x203   : > { %v1930_v39 = vadd.f32 %v3112_v37, %v1929_v38  ;;  %v1943_v41 = vpop.f32.mrf.mxu1 }
 0x205   : > { %v1944_v42 = vadd.f32 %v1943_v41, %v1930_v39 }
 0x20a   : > { %v1957_v43 = vpop.f32.mrf.mxu2  ;;  %v1931_v46 = vpop.f32.mrf.mxu0 }
 0x20b   : > { %v1971_v44 = vpop.f32.mrf.mxu3  ;;  %v1958_v45 = vadd.f32 %v1957_v43, %v1944_v42  ;;  %v1932_v48 = vadd.f32 %v3112_v37, %v1931_v46  ;;  %v1945_v49 = vpop.f32.mrf.mxu1 }
 0x20d   : > { %v1972_v47 = vadd.f32 %v1971_v44, %v1958_v45  ;;  %v1946_v50 = vadd.f32 %v1945_v49, %v1932_v48 }
 0x20f   : > { %1976 = vst [vmem:[%s3728_s5] sm:$0xff] %v1972_v47 }
 0x212   : > { %v1959_v51 = vpop.f32.mrf.mxu2 }
 0x213   : > { %v1960_v52 = vadd.f32 %v1959_v51, %v1946_v50  ;;  %v1973_v53 = vpop.f32.mrf.mxu3 }
 0x215   : > { %v1974_v54 = vadd.f32 %v1973_v53, %v1960_v52 }
 0x217   : > { %1977 = vst [vmem:[%s3728_s5 + $0x8] sm:$0xff] %v1974_v54 }
 0x218 PF: > { %s15_s22 = sadd.s32 1, %s3151_s22   ;;  %s3729_s18 = smov %s3139_s19 }
 0x219   : > { %p12_p12 = scmp.ge.s32.totalorder %s15_s22, 7   ;;  %s3730_s19 = smov %s3219_s26 }
 0x21a   : > { %s3731_s20 = smov %s3147_s21  ;;  %s3732_s21 = smov %s3734_s23 }
 0x21b   :  { %14 = sbr.rel (!%p12_p12) target bundleno = 3 (0x3), region = 118 }

</bundles_post_ra>
